<compile_context>
chip_gen: v6e
topology: v6e:2x2x1
jax: 0.10.0
libtpu: 0.0.40
codegen_flags: <defaults>
</compile_context>

<pallas_src>
import functools
import numpy as np
import jax
import jax.numpy as jnp
from jax.experimental import pallas as pl
from jax.experimental.pallas import tpu as pltpu


PROJ_DIM = 100
C0, H0, W0 = 24, 6, 6          # after Linear + Reshape
C1, H1, W1 = 12, 14, 14        # after ConvTranspose #1
C2, H2, W2 = 1, 28, 28         # after ConvTranspose #2
FLAT = C0 * H0 * W0            # 864
KSZ = 4                        # both deconv kernels are 4x4, stride 2


def _round_up(x, m):
    return (x + m - 1) // m * m


# ----------------------------- fused Pallas kernel ---------------------------

def _decoder_kernel(emb_ref, wlin_ref, blin_ref, m1_ref, b1_ref, m2_ref, b2_ref,
                    out_ref, a0_ref, a1_ref, a2_ref):
    """Whole decoder forward for one batch tile (tb rows).

    VMEM scratch layouts (rows = spatial_row * tb + b, cols = width * C + c):
      a0: (6*tb,  6*24)   a0[i*tb+b,  j*24+ci] = relu(linear(emb))[b, ci, i, j]
      a1: (14*tb, 14*12)  a1[oh*tb+b, ow*12+co] = relu(convT1)[b, co, oh, ow]
      a2: (28*tb, 28)     a2[oh*tb+b, ow]       = convT2 pre-sigmoid
    HBM output block is lane-dense: out[b, oh*28+ow].
    """
    tb = emb_ref.shape[0]
    f32 = jnp.float32

    # --- ReLU -> Linear(100, 864) -> Reshape(24,6,6) -> ReLU ------------------
    x = jnp.maximum(emb_ref[...], 0.0)
    for i in range(H0):
        h = jnp.dot(x, wlin_ref[i], preferred_element_type=f32) + blin_ref[i]
        a0_ref[i * tb:(i + 1) * tb, :] = jnp.maximum(h, 0.0)

    # --- ConvTranspose2d(24,12,4,stride=2,pad=0): 6x6 -> 14x14, then ReLU -----
    a1_ref[...] = jnp.broadcast_to(b1_ref[...], a1_ref.shape)
    x0 = a0_ref[...]                                               # (6*tb, 144)
    for kh in range(KSZ):
        y = jnp.dot(x0, m1_ref[kh], preferred_element_type=f32)    # (6*tb, 168)
        for i in range(H0):
            oh = 2 * i + kh                                        # always in [0, 14)
            a1_ref[oh * tb:(oh + 1) * tb, :] += y[i * tb:(i + 1) * tb, :]
    a1_ref[...] = jnp.maximum(a1_ref[...], 0.0)

    # --- ConvTranspose2d(12,1,4,stride=2,pad=1): 14x14 -> 28x28 ---------------
    a2_ref[...] = jnp.broadcast_to(b2_ref[...], a2_ref.shape)
    x1 = a1_ref[...]                                               # (14*tb, 168)
    for kh in range(KSZ):
        y = jnp.dot(x1, m2_ref[kh], preferred_element_type=f32)    # (14*tb, 28)
        for i in range(H1):
            oh = 2 * i + kh - 1                                    # cropped at edges
            if 0 <= oh < H2:
                a2_ref[oh * tb:(oh + 1) * tb, :] += y[i * tb:(i + 1) * tb, :]

    # --- Sigmoid + pack lane-dense (tb, 784) ----------------------------------
    # TODO(synk): pl.reciprocal(..., approx=True) would push the divide to the
    # EUP; exact form kept so the result stays within 1e-4 of the f32 reference.
    for oh in range(H2):
        z = a2_ref[oh * tb:(oh + 1) * tb, :]
        out_ref[:, oh * W2:(oh + 1) * W2] = 1.0 / (1.0 + jnp.exp(-z))


def _decoder_pallas_call(bpad, tb):
    return pl.pallas_call(
        _decoder_kernel,
        out_shape=jax.ShapeDtypeStruct((bpad, H2 * W2), jnp.float32),
        grid=(bpad // tb,),
        in_specs=[
            pl.BlockSpec((tb, PROJ_DIM), lambda g: (g, 0)),              # emb tile
            pl.BlockSpec((H0, PROJ_DIM, W0 * C0), lambda g: (0, 0, 0)),  # wlin
            pl.BlockSpec((H0, 1, W0 * C0), lambda g: (0, 0, 0)),         # blin
            pl.BlockSpec((KSZ, W0 * C0, W1 * C1), lambda g: (0, 0, 0)),  # m1
            pl.BlockSpec((1, W1 * C1), lambda g: (0, 0)),                # b1
            pl.BlockSpec((KSZ, W1 * C1, W2), lambda g: (0, 0, 0)),       # m2
            pl.BlockSpec((1, W2), lambda g: (0, 0)),                     # b2
        ],
        out_specs=pl.BlockSpec((tb, H2 * W2), lambda g: (g, 0)),
        scratch_shapes=[
            pltpu.VMEM((H0 * tb, W0 * C0), jnp.float32),
            pltpu.VMEM((H1 * tb, W1 * C1), jnp.float32),
            pltpu.VMEM((H2 * tb, W2), jnp.float32),
        ],
        compiler_params=pltpu.CompilerParams(
            dimension_semantics=("parallel",)),
    )


def decoder_forward(emb, packed):
    """emb: (B, 100) float.  Returns (B, 1, 28, 28)."""
    B = emb.shape[0]
    tb = min(64, _round_up(max(B, 1), 8))        # batch tile (sublane aligned)
    bpad = _round_up(B, tb)
    emb_p = jnp.pad(emb.astype(jnp.float32), ((0, bpad - B), (0, 0)))
    out = _decoder_pallas_call(bpad, tb)(
        emb_p, packed["wlin"], packed["blin"],
        packed["m1"], packed["b1"], packed["m2"], packed["b2"])
    # (bpad, 784) is lane-dense and contiguous -> pure reshape, no transpose.
    return out[:B].reshape(B, 1, H2, W2)


# ----------------------- one-time weight repacking ----------------------------

def pack_decoder_params(params):
    """Repack PyTorch-layout weights into the fused kernel's layout (runs once)."""
    w_lin = np.asarray(params["w_lin"], np.float32)   # (100, 864), col = ci*36+i*6+j
    b_lin = np.asarray(params["b_lin"], np.float32)   # (864,)
    w1 = np.asarray(params["w_ct1"], np.float32)      # (24, 12, 4, 4) = (Cin,Cout,kh,kw)
    b1 = np.asarray(params["b_ct1"], np.float32)      # (12,)
    w2 = np.asarray(params["w_ct2"], np.float32)      # (12, 1, 4, 4)
    b2 = np.asarray(params["b_ct2"], np.float32)      # (1,)

    # Linear weight per output image-row i: (100, 6*24), column = j*24 + ci.
    wlin = (w_lin.reshape(PROJ_DIM, C0, H0, W0)
                 .transpose(2, 0, 3, 1)
                 .reshape(H0, PROJ_DIM, W0 * C0))
    blin = b_lin.reshape(C0, H0, W0).transpose(1, 2, 0).reshape(H0, 1, W0 * C0)

    # ConvT #1 as per-kernel-row width-conv matrices:
    #   m1[kh, j*24+ci, ow*12+co] = w1[ci, co, kh, ow-2j]  (zero if kw not in [0,4))
    m1 = np.zeros((KSZ, W0 * C0, W1 * C1), np.float32)
    for kh in range(KSZ):
        for j in range(W0):
            for kw in range(KSZ):
                ow = 2 * j + kw
                m1[kh, j * C0:(j + 1) * C0, ow * C1:(ow + 1) * C1] = w1[:, :, kh, kw]
    b1m = np.tile(b1, W1).reshape(1, W1 * C1)

    # ConvT #2 (padding=1):
    #   m2[kh, j*12+ci, ow] = w2[ci, 0, kh, ow+1-2j]  (zero if kw not in [0,4))
    m2 = np.zeros((KSZ, W1 * C1, W2), np.float32)
    for kh in range(KSZ):
        for j in range(W1):
            for kw in range(KSZ):
                ow = 2 * j + kw - 1
                if 0 <= ow < W2:
                    m2[kh, j * C1:(j + 1) * C1, ow] = w2[:, 0, kh, kw]
    b2m = np.full((1, W2), b2[0], np.float32)

    return {"wlin": jnp.asarray(wlin), "blin": jnp.asarray(blin),
            "m1": jnp.asarray(m1), "b1": jnp.asarray(b1m),
            "m2": jnp.asarray(m2), "b2": jnp.asarray(b2m)}


# -------------------- PyTorch-layout params + pure-JAX reference --------------

def init_decoder_params(key):
    k1, k2, k3, k4, k5, k6 = jax.random.split(key, 6)

    def u(k, shape, fan_in):
        bound = 1.0 / np.sqrt(fan_in)
        return jax.random.uniform(k, shape, jnp.float32, -bound, bound)

    return {
        "w_lin": u(k1, (PROJ_DIM, FLAT), PROJ_DIM),   # stored (in, out)
        "b_lin": u(k2, (FLAT,), PROJ_DIM),
        "w_ct1": u(k3, (24, 12, 4, 4), 24 * 16),      # PyTorch (Cin, Cout, K, K)
        "b_ct1": u(k4, (12,), 24 * 16),
        "w_ct2": u(k5, (12, 1, 4, 4), 12 * 16),
        "b_ct2": u(k6, (1,), 12 * 16),
    }


def _ref_conv_transpose(x_nhwc, w_ct, b, stride, padding):
    Cin, Cout, K, _ = w_ct.shape
    w_hwio = jnp.transpose(w_ct[:, :, ::-1, ::-1], (2, 3, 0, 1))
    y = jax.lax.conv_general_dilated(
        x_nhwc, w_hwio, window_strides=(1, 1),
        padding=[(K - 1 - padding,) * 2] * 2,
        lhs_dilation=(stride, stride),
        dimension_numbers=("NHWC", "HWIO", "NHWC"))
    return y + b


def reference_decoder(emb, params):
    B = emb.shape[0]
    h = jnp.maximum(emb, 0.0)
    h = h @ params["w_lin"] + params["b_lin"]
    h = jnp.maximum(h, 0.0)
    x = jnp.transpose(h.reshape(B, C0, H0, W0), (0, 2, 3, 1))
    x = jnp.maximum(
        _ref_conv_transpose(x, params["w_ct1"], params["b_ct1"], 2, 0), 0.0)
    x = jax.nn.sigmoid(
        _ref_conv_transpose(x, params["w_ct2"], params["b_ct2"], 2, 1))
    return jnp.transpose(x, (0, 3, 1, 2))


# ------------------------------------ main ------------------------------------

if __name__ == "__main__":
    key = jax.random.PRNGKey(0)
    pkey, xkey = jax.random.split(key)
    params = init_decoder_params(pkey)
    packed = pack_decoder_params(params)       # one-time repack (not on hot path)

    B = 2
    emb = jax.random.normal(xkey, (B, PROJ_DIM), jnp.float32)

    fwd = jax.jit(decoder_forward)
    out = jax.block_until_ready(fwd(emb, packed))
    assert out.shape == (B, 1, 28, 28), out.shape

    ref = jax.block_until_ready(reference_decoder(emb, params))
    np.testing.assert_allclose(np.asarray(out), np.asarray(ref),
                               rtol=1e-4, atol=1e-4)

    print("KERNEL_OK")
</pallas_src>

<mosaic_0001>
module attributes {stable_mosaic.version = 11 : i64} {
  func.func @_decoder_kernel(%arg0: i32, %arg1: memref<8x100xf32, #tpu.memory_space<vmem>>, %arg2: memref<6x100x144xf32, #tpu.memory_space<vmem>>, %arg3: memref<6x1x144xf32, #tpu.memory_space<vmem>>, %arg4: memref<4x144x168xf32, #tpu.memory_space<vmem>>, %arg5: memref<1x168xf32, #tpu.memory_space<vmem>>, %arg6: memref<4x168x28xf32, #tpu.memory_space<vmem>>, %arg7: memref<1x28xf32, #tpu.memory_space<vmem>>, %arg8: memref<8x784xf32, #tpu.memory_space<vmem>>, %arg9: memref<48x144xf32, #tpu.memory_space<vmem>>, %arg10: memref<112x168xf32, #tpu.memory_space<vmem>>, %arg11: memref<224x28xf32, #tpu.memory_space<vmem>>) attributes {dimension_semantics = [#tpu.dimension_semantics<parallel>], iteration_bounds = array<i64: 1>, scalar_prefetch = 0 : i64, scratch_operands = 3 : i64, tpu.core_type = #tpu.core_type<tc>, window_params = [{transform_indices = @transform_0, window_bounds = array<i64: 8, 100>}, {pipeline_mode = #tpu.pipeline_mode<synchronous>, transform_indices = @transform_1, window_bounds = array<i64: 6, 100, 144>}, {pipeline_mode = #tpu.pipeline_mode<synchronous>, transform_indices = @transform_2, window_bounds = array<i64: 6, 1, 144>}, {pipeline_mode = #tpu.pipeline_mode<synchronous>, transform_indices = @transform_3, window_bounds = array<i64: 4, 144, 168>}, {pipeline_mode = #tpu.pipeline_mode<synchronous>, transform_indices = @transform_4, window_bounds = array<i64: 1, 168>}, {pipeline_mode = #tpu.pipeline_mode<synchronous>, transform_indices = @transform_5, window_bounds = array<i64: 4, 168, 28>}, {pipeline_mode = #tpu.pipeline_mode<synchronous>, transform_indices = @transform_6, window_bounds = array<i64: 1, 28>}, {transform_indices = @transform_7, window_bounds = array<i64: 8, 784>}]} {
    %c0 = arith.constant 0 : index
    %c0_0 = arith.constant 0 : index
    %0 = vector.load %arg1[%c0, %c0_0] : memref<8x100xf32, #tpu.memory_space<vmem>>, vector<8x100xf32>
    %cst = arith.constant 0.000000e+00 : f32
    %1 = vector.broadcast %cst : f32 to vector<8x100xf32>
    %2 = arith.maximumf %0, %1 : vector<8x100xf32>
    %c0_1 = arith.constant 0 : index
    %c0_2 = arith.constant 0 : index
    %c0_3 = arith.constant 0 : index
    %3 = vector.load %arg2[%c0_1, %c0_2, %c0_3] : memref<6x100x144xf32, #tpu.memory_space<vmem>>, vector<1x100x144xf32>
    %4 = vector.shape_cast %3 : vector<1x100x144xf32> to vector<100x144xf32>
    %cst_4 = arith.constant dense<0.000000e+00> : vector<8x144xf32>
    %5 = tpu.matmul %2, %4, %cst_4 {dimension_numbers = #tpu.dot_dimension_numbers<[1], [0], [0], [1], [0, 0, 1, 1], [], []>} : vector<8x100xf32>, vector<100x144xf32>, vector<8x144xf32> -> vector<8x144xf32>
    %c0_5 = arith.constant 0 : index
    %c0_6 = arith.constant 0 : index
    %c0_7 = arith.constant 0 : index
    %6 = vector.load %arg3[%c0_5, %c0_6, %c0_7] : memref<6x1x144xf32, #tpu.memory_space<vmem>>, vector<1x1x144xf32>
    %7 = vector.shape_cast %6 : vector<1x1x144xf32> to vector<1x144xf32>
    %8 = vector.broadcast %7 : vector<1x144xf32> to vector<8x144xf32>
    %9 = arith.addf %5, %8 : vector<8x144xf32>
    %cst_8 = arith.constant 0.000000e+00 : f32
    %10 = vector.broadcast %cst_8 : f32 to vector<8x144xf32>
    %11 = arith.maximumf %9, %10 : vector<8x144xf32>
    %c0_9 = arith.constant 0 : index
    %c0_10 = arith.constant 0 : index
    %12 = vector.load %arg9[%c0_9, %c0_10] : memref<48x144xf32, #tpu.memory_space<vmem>>, vector<8x144xf32>
    tpu.vector_store %arg9[%c0_9, %c0_10], %11 {strides = array<i32>} : memref<48x144xf32, #tpu.memory_space<vmem>>, vector<8x144xf32>,
    %c1 = arith.constant 1 : index
    %c0_11 = arith.constant 0 : index
    %c0_12 = arith.constant 0 : index
    %13 = vector.load %arg2[%c1, %c0_11, %c0_12] : memref<6x100x144xf32, #tpu.memory_space<vmem>>, vector<1x100x144xf32>
    %14 = vector.shape_cast %13 : vector<1x100x144xf32> to vector<100x144xf32>
    %cst_13 = arith.constant dense<0.000000e+00> : vector<8x144xf32>
    %15 = tpu.matmul %2, %14, %cst_13 {dimension_numbers = #tpu.dot_dimension_numbers<[1], [0], [0], [1], [0, 0, 1, 1], [], []>} : vector<8x100xf32>, vector<100x144xf32>, vector<8x144xf32> -> vector<8x144xf32>
    %c1_14 = arith.constant 1 : index
    %c0_15 = arith.constant 0 : index
    %c0_16 = arith.constant 0 : index
    %16 = vector.load %arg3[%c1_14, %c0_15, %c0_16] : memref<6x1x144xf32, #tpu.memory_space<vmem>>, vector<1x1x144xf32>
    %17 = vector.shape_cast %16 : vector<1x1x144xf32> to vector<1x144xf32>
    %18 = vector.broadcast %17 : vector<1x144xf32> to vector<8x144xf32>
    %19 = arith.addf %15, %18 : vector<8x144xf32>
    %cst_17 = arith.constant 0.000000e+00 : f32
    %20 = vector.broadcast %cst_17 : f32 to vector<8x144xf32>
    %21 = arith.maximumf %19, %20 : vector<8x144xf32>
    %c8 = arith.constant 8 : index
    %c0_18 = arith.constant 0 : index
    %22 = vector.load %arg9[%c8, %c0_18] : memref<48x144xf32, #tpu.memory_space<vmem>>, vector<8x144xf32>
    tpu.vector_store %arg9[%c8, %c0_18], %21 {strides = array<i32>} : memref<48x144xf32, #tpu.memory_space<vmem>>, vector<8x144xf32>,
    %c2 = arith.constant 2 : index
    %c0_19 = arith.constant 0 : index
    %c0_20 = arith.constant 0 : index
    %23 = vector.load %arg2[%c2, %c0_19, %c0_20] : memref<6x100x144xf32, #tpu.memory_space<vmem>>, vector<1x100x144xf32>
    %24 = vector.shape_cast %23 : vector<1x100x144xf32> to vector<100x144xf32>
    %cst_21 = arith.constant dense<0.000000e+00> : vector<8x144xf32>
    %25 = tpu.matmul %2, %24, %cst_21 {dimension_numbers = #tpu.dot_dimension_numbers<[1], [0], [0], [1], [0, 0, 1, 1], [], []>} : vector<8x100xf32>, vector<100x144xf32>, vector<8x144xf32> -> vector<8x144xf32>
    %c2_22 = arith.constant 2 : index
    %c0_23 = arith.constant 0 : index
    %c0_24 = arith.constant 0 : index
    %26 = vector.load %arg3[%c2_22, %c0_23, %c0_24] : memref<6x1x144xf32, #tpu.memory_space<vmem>>, vector<1x1x144xf32>
    %27 = vector.shape_cast %26 : vector<1x1x144xf32> to vector<1x144xf32>
    %28 = vector.broadcast %27 : vector<1x144xf32> to vector<8x144xf32>
    %29 = arith.addf %25, %28 : vector<8x144xf32>
    %cst_25 = arith.constant 0.000000e+00 : f32
    %30 = vector.broadcast %cst_25 : f32 to vector<8x144xf32>
    %31 = arith.maximumf %29, %30 : vector<8x144xf32>
    %c16 = arith.constant 16 : index
    %c0_26 = arith.constant 0 : index
    %32 = vector.load %arg9[%c16, %c0_26] : memref<48x144xf32, #tpu.memory_space<vmem>>, vector<8x144xf32>
    tpu.vector_store %arg9[%c16, %c0_26], %31 {strides = array<i32>} : memref<48x144xf32, #tpu.memory_space<vmem>>, vector<8x144xf32>,
    %c3 = arith.constant 3 : index
    %c0_27 = arith.constant 0 : index
    %c0_28 = arith.constant 0 : index
    %33 = vector.load %arg2[%c3, %c0_27, %c0_28] : memref<6x100x144xf32, #tpu.memory_space<vmem>>, vector<1x100x144xf32>
    %34 = vector.shape_cast %33 : vector<1x100x144xf32> to vector<100x144xf32>
    %cst_29 = arith.constant dense<0.000000e+00> : vector<8x144xf32>
    %35 = tpu.matmul %2, %34, %cst_29 {dimension_numbers = #tpu.dot_dimension_numbers<[1], [0], [0], [1], [0, 0, 1, 1], [], []>} : vector<8x100xf32>, vector<100x144xf32>, vector<8x144xf32> -> vector<8x144xf32>
    %c3_30 = arith.constant 3 : index
    %c0_31 = arith.constant 0 : index
    %c0_32 = arith.constant 0 : index
    %36 = vector.load %arg3[%c3_30, %c0_31, %c0_32] : memref<6x1x144xf32, #tpu.memory_space<vmem>>, vector<1x1x144xf32>
    %37 = vector.shape_cast %36 : vector<1x1x144xf32> to vector<1x144xf32>
    %38 = vector.broadcast %37 : vector<1x144xf32> to vector<8x144xf32>
    %39 = arith.addf %35, %38 : vector<8x144xf32>
    %cst_33 = arith.constant 0.000000e+00 : f32
    %40 = vector.broadcast %cst_33 : f32 to vector<8x144xf32>
    %41 = arith.maximumf %39, %40 : vector<8x144xf32>
    %c24 = arith.constant 24 : index
    %c0_34 = arith.constant 0 : index
    %42 = vector.load %arg9[%c24, %c0_34] : memref<48x144xf32, #tpu.memory_space<vmem>>, vector<8x144xf32>
    tpu.vector_store %arg9[%c24, %c0_34], %41 {strides = array<i32>} : memref<48x144xf32, #tpu.memory_space<vmem>>, vector<8x144xf32>,
    %c4 = arith.constant 4 : index
    %c0_35 = arith.constant 0 : index
    %c0_36 = arith.constant 0 : index
    %43 = vector.load %arg2[%c4, %c0_35, %c0_36] : memref<6x100x144xf32, #tpu.memory_space<vmem>>, vector<1x100x144xf32>
    %44 = vector.shape_cast %43 : vector<1x100x144xf32> to vector<100x144xf32>
    %cst_37 = arith.constant dense<0.000000e+00> : vector<8x144xf32>
    %45 = tpu.matmul %2, %44, %cst_37 {dimension_numbers = #tpu.dot_dimension_numbers<[1], [0], [0], [1], [0, 0, 1, 1], [], []>} : vector<8x100xf32>, vector<100x144xf32>, vector<8x144xf32> -> vector<8x144xf32>
    %c4_38 = arith.constant 4 : index
    %c0_39 = arith.constant 0 : index
    %c0_40 = arith.constant 0 : index
    %46 = vector.load %arg3[%c4_38, %c0_39, %c0_40] : memref<6x1x144xf32, #tpu.memory_space<vmem>>, vector<1x1x144xf32>
    %47 = vector.shape_cast %46 : vector<1x1x144xf32> to vector<1x144xf32>
    %48 = vector.broadcast %47 : vector<1x144xf32> to vector<8x144xf32>
    %49 = arith.addf %45, %48 : vector<8x144xf32>
    %cst_41 = arith.constant 0.000000e+00 : f32
    %50 = vector.broadcast %cst_41 : f32 to vector<8x144xf32>
    %51 = arith.maximumf %49, %50 : vector<8x144xf32>
    %c32 = arith.constant 32 : index
    %c0_42 = arith.constant 0 : index
    %52 = vector.load %arg9[%c32, %c0_42] : memref<48x144xf32, #tpu.memory_space<vmem>>, vector<8x144xf32>
    tpu.vector_store %arg9[%c32, %c0_42], %51 {strides = array<i32>} : memref<48x144xf32, #tpu.memory_space<vmem>>, vector<8x144xf32>,
    %c5 = arith.constant 5 : index
    %c0_43 = arith.constant 0 : index
    %c0_44 = arith.constant 0 : index
    %53 = vector.load %arg2[%c5, %c0_43, %c0_44] : memref<6x100x144xf32, #tpu.memory_space<vmem>>, vector<1x100x144xf32>
    %54 = vector.shape_cast %53 : vector<1x100x144xf32> to vector<100x144xf32>
    %cst_45 = arith.constant dense<0.000000e+00> : vector<8x144xf32>
    %55 = tpu.matmul %2, %54, %cst_45 {dimension_numbers = #tpu.dot_dimension_numbers<[1], [0], [0], [1], [0, 0, 1, 1], [], []>} : vector<8x100xf32>, vector<100x144xf32>, vector<8x144xf32> -> vector<8x144xf32>
    %c5_46 = arith.constant 5 : index
    %c0_47 = arith.constant 0 : index
    %c0_48 = arith.constant 0 : index
    %56 = vector.load %arg3[%c5_46, %c0_47, %c0_48] : memref<6x1x144xf32, #tpu.memory_space<vmem>>, vector<1x1x144xf32>
    %57 = vector.shape_cast %56 : vector<1x1x144xf32> to vector<1x144xf32>
    %58 = vector.broadcast %57 : vector<1x144xf32> to vector<8x144xf32>
    %59 = arith.addf %55, %58 : vector<8x144xf32>
    %cst_49 = arith.constant 0.000000e+00 : f32
    %60 = vector.broadcast %cst_49 : f32 to vector<8x144xf32>
    %61 = arith.maximumf %59, %60 : vector<8x144xf32>
    %c40 = arith.constant 40 : index
    %c0_50 = arith.constant 0 : index
    %62 = vector.load %arg9[%c40, %c0_50] : memref<48x144xf32, #tpu.memory_space<vmem>>, vector<8x144xf32>
    tpu.vector_store %arg9[%c40, %c0_50], %61 {strides = array<i32>} : memref<48x144xf32, #tpu.memory_space<vmem>>, vector<8x144xf32>,
    %c0_51 = arith.constant 0 : index
    %c0_52 = arith.constant 0 : index
    %63 = vector.load %arg5[%c0_51, %c0_52] : memref<1x168xf32, #tpu.memory_space<vmem>>, vector<1x168xf32>
    %64 = vector.shape_cast %63 : vector<1x168xf32> to vector<1x168xf32>
    %65 = vector.broadcast %64 : vector<1x168xf32> to vector<112x168xf32>
    %c0_53 = arith.constant 0 : index
    %c0_54 = arith.constant 0 : index
    %66 = vector.load %arg10[%c0_53, %c0_54] : memref<112x168xf32, #tpu.memory_space<vmem>>, vector<112x168xf32>
    tpu.vector_store %arg10[%c0_53, %c0_54], %65 {strides = array<i32>} : memref<112x168xf32, #tpu.memory_space<vmem>>, vector<112x168xf32>,
    %c0_55 = arith.constant 0 : index
    %c0_56 = arith.constant 0 : index
    %67 = vector.load %arg9[%c0_55, %c0_56] : memref<48x144xf32, #tpu.memory_space<vmem>>, vector<48x144xf32>
    %c0_57 = arith.constant 0 : index
    %c0_58 = arith.constant 0 : index
    %c0_59 = arith.constant 0 : index
    %68 = vector.load %arg4[%c0_57, %c0_58, %c0_59] : memref<4x144x168xf32, #tpu.memory_space<vmem>>, vector<1x144x168xf32>
    %69 = vector.shape_cast %68 : vector<1x144x168xf32> to vector<144x168xf32>
    %cst_60 = arith.constant dense<0.000000e+00> : vector<48x168xf32>
    %70 = tpu.matmul %67, %69, %cst_60 {dimension_numbers = #tpu.dot_dimension_numbers<[1], [0], [0], [1], [0, 0, 1, 1], [], []>} : vector<48x144xf32>, vector<144x168xf32>, vector<48x168xf32> -> vector<48x168xf32>
    %c0_61 = arith.constant 0 : index
    %c0_62 = arith.constant 0 : index
    %71 = vector.load %arg10[%c0_61, %c0_62] : memref<112x168xf32, #tpu.memory_space<vmem>>, vector<8x168xf32>
    %72 = vector.extract_strided_slice %70 {offsets = [0, 0], sizes = [8, 168], strides = [1, 1]} : vector<48x168xf32> to vector<8x168xf32>
    %73 = arith.addf %71, %72 : vector<8x168xf32>
    %c0_63 = arith.constant 0 : index
    %c0_64 = arith.constant 0 : index
    %74 = vector.load %arg10[%c0_63, %c0_64] : memref<112x168xf32, #tpu.memory_space<vmem>>, vector<8x168xf32>
    tpu.vector_store %arg10[%c0_63, %c0_64], %73 {strides = array<i32>} : memref<112x168xf32, #tpu.memory_space<vmem>>, vector<8x168xf32>,
    %c16_65 = arith.constant 16 : index
    %c0_66 = arith.constant 0 : index
    %75 = vector.load %arg10[%c16_65, %c0_66] : memref<112x168xf32, #tpu.memory_space<vmem>>, vector<8x168xf32>
    %76 = vector.extract_strided_slice %70 {offsets = [8, 0], sizes = [8, 168], strides = [1, 1]} : vector<48x168xf32> to vector<8x168xf32>
    %77 = arith.addf %75, %76 : vector<8x168xf32>
    %c16_67 = arith.constant 16 : index
    %c0_68 = arith.constant 0 : index
    %78 = vector.load %arg10[%c16_67, %c0_68] : memref<112x168xf32, #tpu.memory_space<vmem>>, vector<8x168xf32>
    tpu.vector_store %arg10[%c16_67, %c0_68], %77 {strides = array<i32>} : memref<112x168xf32, #tpu.memory_space<vmem>>, vector<8x168xf32>,
    %c32_69 = arith.constant 32 : index
    %c0_70 = arith.constant 0 : index
    %79 = vector.load %arg10[%c32_69, %c0_70] : memref<112x168xf32, #tpu.memory_space<vmem>>, vector<8x168xf32>
    %80 = vector.extract_strided_slice %70 {offsets = [16, 0], sizes = [8, 168], strides = [1, 1]} : vector<48x168xf32> to vector<8x168xf32>
    %81 = arith.addf %79, %80 : vector<8x168xf32>
    %c32_71 = arith.constant 32 : index
    %c0_72 = arith.constant 0 : index
    %82 = vector.load %arg10[%c32_71, %c0_72] : memref<112x168xf32, #tpu.memory_space<vmem>>, vector<8x168xf32>
    tpu.vector_store %arg10[%c32_71, %c0_72], %81 {strides = array<i32>} : memref<112x168xf32, #tpu.memory_space<vmem>>, vector<8x168xf32>,
    %c48 = arith.constant 48 : index
    %c0_73 = arith.constant 0 : index
    %83 = vector.load %arg10[%c48, %c0_73] : memref<112x168xf32, #tpu.memory_space<vmem>>, vector<8x168xf32>
    %84 = vector.extract_strided_slice %70 {offsets = [24, 0], sizes = [8, 168], strides = [1, 1]} : vector<48x168xf32> to vector<8x168xf32>
    %85 = arith.addf %83, %84 : vector<8x168xf32>
    %c48_74 = arith.constant 48 : index
    %c0_75 = arith.constant 0 : index
    %86 = vector.load %arg10[%c48_74, %c0_75] : memref<112x168xf32, #tpu.memory_space<vmem>>, vector<8x168xf32>
    tpu.vector_store %arg10[%c48_74, %c0_75], %85 {strides = array<i32>} : memref<112x168xf32, #tpu.memory_space<vmem>>, vector<8x168xf32>,
    %c64 = arith.constant 64 : index
    %c0_76 = arith.constant 0 : index
    %87 = vector.load %arg10[%c64, %c0_76] : memref<112x168xf32, #tpu.memory_space<vmem>>, vector<8x168xf32>
    %88 = vector.extract_strided_slice %70 {offsets = [32, 0], sizes = [8, 168], strides = [1, 1]} : vector<48x168xf32> to vector<8x168xf32>
    %89 = arith.addf %87, %88 : vector<8x168xf32>
    %c64_77 = arith.constant 64 : index
    %c0_78 = arith.constant 0 : index
    %90 = vector.load %arg10[%c64_77, %c0_78] : memref<112x168xf32, #tpu.memory_space<vmem>>, vector<8x168xf32>
    tpu.vector_store %arg10[%c64_77, %c0_78], %89 {strides = array<i32>} : memref<112x168xf32, #tpu.memory_space<vmem>>, vector<8x168xf32>,
    %c80 = arith.constant 80 : index
    %c0_79 = arith.constant 0 : index
    %91 = vector.load %arg10[%c80, %c0_79] : memref<112x168xf32, #tpu.memory_space<vmem>>, vector<8x168xf32>
    %92 = vector.extract_strided_slice %70 {offsets = [40, 0], sizes = [8, 168], strides = [1, 1]} : vector<48x168xf32> to vector<8x168xf32>
    %93 = arith.addf %91, %92 : vector<8x168xf32>
    %c80_80 = arith.constant 80 : index
    %c0_81 = arith.constant 0 : index
    %94 = vector.load %arg10[%c80_80, %c0_81] : memref<112x168xf32, #tpu.memory_space<vmem>>, vector<8x168xf32>
    tpu.vector_store %arg10[%c80_80, %c0_81], %93 {strides = array<i32>} : memref<112x168xf32, #tpu.memory_space<vmem>>, vector<8x168xf32>,
    %c1_82 = arith.constant 1 : index
    %c0_83 = arith.constant 0 : index
    %c0_84 = arith.constant 0 : index
    %95 = vector.load %arg4[%c1_82, %c0_83, %c0_84] : memref<4x144x168xf32, #tpu.memory_space<vmem>>, vector<1x144x168xf32>
    %96 = vector.shape_cast %95 : vector<1x144x168xf32> to vector<144x168xf32>
    %cst_85 = arith.constant dense<0.000000e+00> : vector<48x168xf32>
    %97 = tpu.matmul %67, %96, %cst_85 {dimension_numbers = #tpu.dot_dimension_numbers<[1], [0], [0], [1], [0, 0, 1, 1], [], []>} : vector<48x144xf32>, vector<144x168xf32>, vector<48x168xf32> -> vector<48x168xf32>
    %c8_86 = arith.constant 8 : index
    %c0_87 = arith.constant 0 : index
    %98 = vector.load %arg10[%c8_86, %c0_87] : memref<112x168xf32, #tpu.memory_space<vmem>>, vector<8x168xf32>
    %99 = vector.extract_strided_slice %97 {offsets = [0, 0], sizes = [8, 168], strides = [1, 1]} : vector<48x168xf32> to vector<8x168xf32>
    %100 = arith.addf %98, %99 : vector<8x168xf32>
    %c8_88 = arith.constant 8 : index
    %c0_89 = arith.constant 0 : index
    %101 = vector.load %arg10[%c8_88, %c0_89] : memref<112x168xf32, #tpu.memory_space<vmem>>, vector<8x168xf32>
    tpu.vector_store %arg10[%c8_88, %c0_89], %100 {strides = array<i32>} : memref<112x168xf32, #tpu.memory_space<vmem>>, vector<8x168xf32>,
    %c24_90 = arith.constant 24 : index
    %c0_91 = arith.constant 0 : index
    %102 = vector.load %arg10[%c24_90, %c0_91] : memref<112x168xf32, #tpu.memory_space<vmem>>, vector<8x168xf32>
    %103 = vector.extract_strided_slice %97 {offsets = [8, 0], sizes = [8, 168], strides = [1, 1]} : vector<48x168xf32> to vector<8x168xf32>
    %104 = arith.addf %102, %103 : vector<8x168xf32>
    %c24_92 = arith.constant 24 : index
    %c0_93 = arith.constant 0 : index
    %105 = vector.load %arg10[%c24_92, %c0_93] : memref<112x168xf32, #tpu.memory_space<vmem>>, vector<8x168xf32>
    tpu.vector_store %arg10[%c24_92, %c0_93], %104 {strides = array<i32>} : memref<112x168xf32, #tpu.memory_space<vmem>>, vector<8x168xf32>,
    %c40_94 = arith.constant 40 : index
    %c0_95 = arith.constant 0 : index
    %106 = vector.load %arg10[%c40_94, %c0_95] : memref<112x168xf32, #tpu.memory_space<vmem>>, vector<8x168xf32>
    %107 = vector.extract_strided_slice %97 {offsets = [16, 0], sizes = [8, 168], strides = [1, 1]} : vector<48x168xf32> to vector<8x168xf32>
    %108 = arith.addf %106, %107 : vector<8x168xf32>
    %c40_96 = arith.constant 40 : index
    %c0_97 = arith.constant 0 : index
    %109 = vector.load %arg10[%c40_96, %c0_97] : memref<112x168xf32, #tpu.memory_space<vmem>>, vector<8x168xf32>
    tpu.vector_store %arg10[%c40_96, %c0_97], %108 {strides = array<i32>} : memref<112x168xf32, #tpu.memory_space<vmem>>, vector<8x168xf32>,
    %c56 = arith.constant 56 : index
    %c0_98 = arith.constant 0 : index
    %110 = vector.load %arg10[%c56, %c0_98] : memref<112x168xf32, #tpu.memory_space<vmem>>, vector<8x168xf32>
    %111 = vector.extract_strided_slice %97 {offsets = [24, 0], sizes = [8, 168], strides = [1, 1]} : vector<48x168xf32> to vector<8x168xf32>
    %112 = arith.addf %110, %111 : vector<8x168xf32>
    %c56_99 = arith.constant 56 : index
    %c0_100 = arith.constant 0 : index
    %113 = vector.load %arg10[%c56_99, %c0_100] : memref<112x168xf32, #tpu.memory_space<vmem>>, vector<8x168xf32>
    tpu.vector_store %arg10[%c56_99, %c0_100], %112 {strides = array<i32>} : memref<112x168xf32, #tpu.memory_space<vmem>>, vector<8x168xf32>,
    %c72 = arith.constant 72 : index
    %c0_101 = arith.constant 0 : index
    %114 = vector.load %arg10[%c72, %c0_101] : memref<112x168xf32, #tpu.memory_space<vmem>>, vector<8x168xf32>
    %115 = vector.extract_strided_slice %97 {offsets = [32, 0], sizes = [8, 168], strides = [1, 1]} : vector<48x168xf32> to vector<8x168xf32>
    %116 = arith.addf %114, %115 : vector<8x168xf32>
    %c72_102 = arith.constant 72 : index
    %c0_103 = arith.constant 0 : index
    %117 = vector.load %arg10[%c72_102, %c0_103] : memref<112x168xf32, #tpu.memory_space<vmem>>, vector<8x168xf32>
    tpu.vector_store %arg10[%c72_102, %c0_103], %116 {strides = array<i32>} : memref<112x168xf32, #tpu.memory_space<vmem>>, vector<8x168xf32>,
    %c88 = arith.constant 88 : index
    %c0_104 = arith.constant 0 : index
    %118 = vector.load %arg10[%c88, %c0_104] : memref<112x168xf32, #tpu.memory_space<vmem>>, vector<8x168xf32>
    %119 = vector.extract_strided_slice %97 {offsets = [40, 0], sizes = [8, 168], strides = [1, 1]} : vector<48x168xf32> to vector<8x168xf32>
    %120 = arith.addf %118, %119 : vector<8x168xf32>
    %c88_105 = arith.constant 88 : index
    %c0_106 = arith.constant 0 : index
    %121 = vector.load %arg10[%c88_105, %c0_106] : memref<112x168xf32, #tpu.memory_space<vmem>>, vector<8x168xf32>
    tpu.vector_store %arg10[%c88_105, %c0_106], %120 {strides = array<i32>} : memref<112x168xf32, #tpu.memory_space<vmem>>, vector<8x168xf32>,
    %c2_107 = arith.constant 2 : index
    %c0_108 = arith.constant 0 : index
    %c0_109 = arith.constant 0 : index
    %122 = vector.load %arg4[%c2_107, %c0_108, %c0_109] : memref<4x144x168xf32, #tpu.memory_space<vmem>>, vector<1x144x168xf32>
    %123 = vector.shape_cast %122 : vector<1x144x168xf32> to vector<144x168xf32>
    %cst_110 = arith.constant dense<0.000000e+00> : vector<48x168xf32>
    %124 = tpu.matmul %67, %123, %cst_110 {dimension_numbers = #tpu.dot_dimension_numbers<[1], [0], [0], [1], [0, 0, 1, 1], [], []>} : vector<48x144xf32>, vector<144x168xf32>, vector<48x168xf32> -> vector<48x168xf32>
    %c16_111 = arith.constant 16 : index
    %c0_112 = arith.constant 0 : index
    %125 = vector.load %arg10[%c16_111, %c0_112] : memref<112x168xf32, #tpu.memory_space<vmem>>, vector<8x168xf32>
    %126 = vector.extract_strided_slice %124 {offsets = [0, 0], sizes = [8, 168], strides = [1, 1]} : vector<48x168xf32> to vector<8x168xf32>
    %127 = arith.addf %125, %126 : vector<8x168xf32>
    %c16_113 = arith.constant 16 : index
    %c0_114 = arith.constant 0 : index
    %128 = vector.load %arg10[%c16_113, %c0_114] : memref<112x168xf32, #tpu.memory_space<vmem>>, vector<8x168xf32>
    tpu.vector_store %arg10[%c16_113, %c0_114], %127 {strides = array<i32>} : memref<112x168xf32, #tpu.memory_space<vmem>>, vector<8x168xf32>,
    %c32_115 = arith.constant 32 : index
    %c0_116 = arith.constant 0 : index
    %129 = vector.load %arg10[%c32_115, %c0_116] : memref<112x168xf32, #tpu.memory_space<vmem>>, vector<8x168xf32>
    %130 = vector.extract_strided_slice %124 {offsets = [8, 0], sizes = [8, 168], strides = [1, 1]} : vector<48x168xf32> to vector<8x168xf32>
    %131 = arith.addf %129, %130 : vector<8x168xf32>
    %c32_117 = arith.constant 32 : index
    %c0_118 = arith.constant 0 : index
    %132 = vector.load %arg10[%c32_117, %c0_118] : memref<112x168xf32, #tpu.memory_space<vmem>>, vector<8x168xf32>
    tpu.vector_store %arg10[%c32_117, %c0_118], %131 {strides = array<i32>} : memref<112x168xf32, #tpu.memory_space<vmem>>, vector<8x168xf32>,
    %c48_119 = arith.constant 48 : index
    %c0_120 = arith.constant 0 : index
    %133 = vector.load %arg10[%c48_119, %c0_120] : memref<112x168xf32, #tpu.memory_space<vmem>>, vector<8x168xf32>
    %134 = vector.extract_strided_slice %124 {offsets = [16, 0], sizes = [8, 168], strides = [1, 1]} : vector<48x168xf32> to vector<8x168xf32>
    %135 = arith.addf %133, %134 : vector<8x168xf32>
    %c48_121 = arith.constant 48 : index
    %c0_122 = arith.constant 0 : index
    %136 = vector.load %arg10[%c48_121, %c0_122] : memref<112x168xf32, #tpu.memory_space<vmem>>, vector<8x168xf32>
    tpu.vector_store %arg10[%c48_121, %c0_122], %135 {strides = array<i32>} : memref<112x168xf32, #tpu.memory_space<vmem>>, vector<8x168xf32>,
    %c64_123 = arith.constant 64 : index
    %c0_124 = arith.constant 0 : index
    %137 = vector.load %arg10[%c64_123, %c0_124] : memref<112x168xf32, #tpu.memory_space<vmem>>, vector<8x168xf32>
    %138 = vector.extract_strided_slice %124 {offsets = [24, 0], sizes = [8, 168], strides = [1, 1]} : vector<48x168xf32> to vector<8x168xf32>
    %139 = arith.addf %137, %138 : vector<8x168xf32>
    %c64_125 = arith.constant 64 : index
    %c0_126 = arith.constant 0 : index
    %140 = vector.load %arg10[%c64_125, %c0_126] : memref<112x168xf32, #tpu.memory_space<vmem>>, vector<8x168xf32>
    tpu.vector_store %arg10[%c64_125, %c0_126], %139 {strides = array<i32>} : memref<112x168xf32, #tpu.memory_space<vmem>>, vector<8x168xf32>,
    %c80_127 = arith.constant 80 : index
    %c0_128 = arith.constant 0 : index
    %141 = vector.load %arg10[%c80_127, %c0_128] : memref<112x168xf32, #tpu.memory_space<vmem>>, vector<8x168xf32>
    %142 = vector.extract_strided_slice %124 {offsets = [32, 0], sizes = [8, 168], strides = [1, 1]} : vector<48x168xf32> to vector<8x168xf32>
    %143 = arith.addf %141, %142 : vector<8x168xf32>
    %c80_129 = arith.constant 80 : index
    %c0_130 = arith.constant 0 : index
    %144 = vector.load %arg10[%c80_129, %c0_130] : memref<112x168xf32, #tpu.memory_space<vmem>>, vector<8x168xf32>
    tpu.vector_store %arg10[%c80_129, %c0_130], %143 {strides = array<i32>} : memref<112x168xf32, #tpu.memory_space<vmem>>, vector<8x168xf32>,
    %c96 = arith.constant 96 : index
    %c0_131 = arith.constant 0 : index
    %145 = vector.load %arg10[%c96, %c0_131] : memref<112x168xf32, #tpu.memory_space<vmem>>, vector<8x168xf32>
    %146 = vector.extract_strided_slice %124 {offsets = [40, 0], sizes = [8, 168], strides = [1, 1]} : vector<48x168xf32> to vector<8x168xf32>
    %147 = arith.addf %145, %146 : vector<8x168xf32>
    %c96_132 = arith.constant 96 : index
    %c0_133 = arith.constant 0 : index
    %148 = vector.load %arg10[%c96_132, %c0_133] : memref<112x168xf32, #tpu.memory_space<vmem>>, vector<8x168xf32>
    tpu.vector_store %arg10[%c96_132, %c0_133], %147 {strides = array<i32>} : memref<112x168xf32, #tpu.memory_space<vmem>>, vector<8x168xf32>,
    %c3_134 = arith.constant 3 : index
    %c0_135 = arith.constant 0 : index
    %c0_136 = arith.constant 0 : index
    %149 = vector.load %arg4[%c3_134, %c0_135, %c0_136] : memref<4x144x168xf32, #tpu.memory_space<vmem>>, vector<1x144x168xf32>
    %150 = vector.shape_cast %149 : vector<1x144x168xf32> to vector<144x168xf32>
    %cst_137 = arith.constant dense<0.000000e+00> : vector<48x168xf32>
    %151 = tpu.matmul %67, %150, %cst_137 {dimension_numbers = #tpu.dot_dimension_numbers<[1], [0], [0], [1], [0, 0, 1, 1], [], []>} : vector<48x144xf32>, vector<144x168xf32>, vector<48x168xf32> -> vector<48x168xf32>
    %c24_138 = arith.constant 24 : index
    %c0_139 = arith.constant 0 : index
    %152 = vector.load %arg10[%c24_138, %c0_139] : memref<112x168xf32, #tpu.memory_space<vmem>>, vector<8x168xf32>
    %153 = vector.extract_strided_slice %151 {offsets = [0, 0], sizes = [8, 168], strides = [1, 1]} : vector<48x168xf32> to vector<8x168xf32>
    %154 = arith.addf %152, %153 : vector<8x168xf32>
    %c24_140 = arith.constant 24 : index
    %c0_141 = arith.constant 0 : index
    %155 = vector.load %arg10[%c24_140, %c0_141] : memref<112x168xf32, #tpu.memory_space<vmem>>, vector<8x168xf32>
    tpu.vector_store %arg10[%c24_140, %c0_141], %154 {strides = array<i32>} : memref<112x168xf32, #tpu.memory_space<vmem>>, vector<8x168xf32>,
    %c40_142 = arith.constant 40 : index
    %c0_143 = arith.constant 0 : index
    %156 = vector.load %arg10[%c40_142, %c0_143] : memref<112x168xf32, #tpu.memory_space<vmem>>, vector<8x168xf32>
    %157 = vector.extract_strided_slice %151 {offsets = [8, 0], sizes = [8, 168], strides = [1, 1]} : vector<48x168xf32> to vector<8x168xf32>
    %158 = arith.addf %156, %157 : vector<8x168xf32>
    %c40_144 = arith.constant 40 : index
    %c0_145 = arith.constant 0 : index
    %159 = vector.load %arg10[%c40_144, %c0_145] : memref<112x168xf32, #tpu.memory_space<vmem>>, vector<8x168xf32>
    tpu.vector_store %arg10[%c40_144, %c0_145], %158 {strides = array<i32>} : memref<112x168xf32, #tpu.memory_space<vmem>>, vector<8x168xf32>,
    %c56_146 = arith.constant 56 : index
    %c0_147 = arith.constant 0 : index
    %160 = vector.load %arg10[%c56_146, %c0_147] : memref<112x168xf32, #tpu.memory_space<vmem>>, vector<8x168xf32>
    %161 = vector.extract_strided_slice %151 {offsets = [16, 0], sizes = [8, 168], strides = [1, 1]} : vector<48x168xf32> to vector<8x168xf32>
    %162 = arith.addf %160, %161 : vector<8x168xf32>
    %c56_148 = arith.constant 56 : index
    %c0_149 = arith.constant 0 : index
    %163 = vector.load %arg10[%c56_148, %c0_149] : memref<112x168xf32, #tpu.memory_space<vmem>>, vector<8x168xf32>
    tpu.vector_store %arg10[%c56_148, %c0_149], %162 {strides = array<i32>} : memref<112x168xf32, #tpu.memory_space<vmem>>, vector<8x168xf32>,
    %c72_150 = arith.constant 72 : index
    %c0_151 = arith.constant 0 : index
    %164 = vector.load %arg10[%c72_150, %c0_151] : memref<112x168xf32, #tpu.memory_space<vmem>>, vector<8x168xf32>
    %165 = vector.extract_strided_slice %151 {offsets = [24, 0], sizes = [8, 168], strides = [1, 1]} : vector<48x168xf32> to vector<8x168xf32>
    %166 = arith.addf %164, %165 : vector<8x168xf32>
    %c72_152 = arith.constant 72 : index
    %c0_153 = arith.constant 0 : index
    %167 = vector.load %arg10[%c72_152, %c0_153] : memref<112x168xf32, #tpu.memory_space<vmem>>, vector<8x168xf32>
    tpu.vector_store %arg10[%c72_152, %c0_153], %166 {strides = array<i32>} : memref<112x168xf32, #tpu.memory_space<vmem>>, vector<8x168xf32>,
    %c88_154 = arith.constant 88 : index
    %c0_155 = arith.constant 0 : index
    %168 = vector.load %arg10[%c88_154, %c0_155] : memref<112x168xf32, #tpu.memory_space<vmem>>, vector<8x168xf32>
    %169 = vector.extract_strided_slice %151 {offsets = [32, 0], sizes = [8, 168], strides = [1, 1]} : vector<48x168xf32> to vector<8x168xf32>
    %170 = arith.addf %168, %169 : vector<8x168xf32>
    %c88_156 = arith.constant 88 : index
    %c0_157 = arith.constant 0 : index
    %171 = vector.load %arg10[%c88_156, %c0_157] : memref<112x168xf32, #tpu.memory_space<vmem>>, vector<8x168xf32>
    tpu.vector_store %arg10[%c88_156, %c0_157], %170 {strides = array<i32>} : memref<112x168xf32, #tpu.memory_space<vmem>>, vector<8x168xf32>,
    %c104 = arith.constant 104 : index
    %c0_158 = arith.constant 0 : index
    %172 = vector.load %arg10[%c104, %c0_158] : memref<112x168xf32, #tpu.memory_space<vmem>>, vector<8x168xf32>
    %173 = vector.extract_strided_slice %151 {offsets = [40, 0], sizes = [8, 168], strides = [1, 1]} : vector<48x168xf32> to vector<8x168xf32>
    %174 = arith.addf %172, %173 : vector<8x168xf32>
    %c104_159 = arith.constant 104 : index
    %c0_160 = arith.constant 0 : index
    %175 = vector.load %arg10[%c104_159, %c0_160] : memref<112x168xf32, #tpu.memory_space<vmem>>, vector<8x168xf32>
    tpu.vector_store %arg10[%c104_159, %c0_160], %174 {strides = array<i32>} : memref<112x168xf32, #tpu.memory_space<vmem>>, vector<8x168xf32>,
    %c0_161 = arith.constant 0 : index
    %c0_162 = arith.constant 0 : index
    %176 = vector.load %arg10[%c0_161, %c0_162] : memref<112x168xf32, #tpu.memory_space<vmem>>, vector<112x168xf32>
    %cst_163 = arith.constant 0.000000e+00 : f32
    %177 = vector.broadcast %cst_163 : f32 to vector<112x168xf32>
    %178 = arith.maximumf %176, %177 : vector<112x168xf32>
    %c0_164 = arith.constant 0 : index
    %c0_165 = arith.constant 0 : index
    %179 = vector.load %arg10[%c0_164, %c0_165] : memref<112x168xf32, #tpu.memory_space<vmem>>, vector<112x168xf32>
    tpu.vector_store %arg10[%c0_164, %c0_165], %178 {strides = array<i32>} : memref<112x168xf32, #tpu.memory_space<vmem>>, vector<112x168xf32>,
    %c0_166 = arith.constant 0 : index
    %c0_167 = arith.constant 0 : index
    %180 = vector.load %arg7[%c0_166, %c0_167] : memref<1x28xf32, #tpu.memory_space<vmem>>, vector<1x28xf32>
    %181 = vector.shape_cast %180 : vector<1x28xf32> to vector<1x28xf32>
    %182 = vector.broadcast %181 : vector<1x28xf32> to vector<224x28xf32>
    %c0_168 = arith.constant 0 : index
    %c0_169 = arith.constant 0 : index
    %183 = vector.load %arg11[%c0_168, %c0_169] : memref<224x28xf32, #tpu.memory_space<vmem>>, vector<224x28xf32>
    tpu.vector_store %arg11[%c0_168, %c0_169], %182 {strides = array<i32>} : memref<224x28xf32, #tpu.memory_space<vmem>>, vector<224x28xf32>,
    %c0_170 = arith.constant 0 : index
    %c0_171 = arith.constant 0 : index
    %184 = vector.load %arg10[%c0_170, %c0_171] : memref<112x168xf32, #tpu.memory_space<vmem>>, vector<112x168xf32>
    %c0_172 = arith.constant 0 : index
    %c0_173 = arith.constant 0 : index
    %c0_174 = arith.constant 0 : index
    %185 = vector.load %arg6[%c0_172, %c0_173, %c0_174] : memref<4x168x28xf32, #tpu.memory_space<vmem>>, vector<1x168x28xf32>
    %186 = vector.shape_cast %185 : vector<1x168x28xf32> to vector<168x28xf32>
    %cst_175 = arith.constant dense<0.000000e+00> : vector<112x28xf32>
    %187 = tpu.matmul %184, %186, %cst_175 {dimension_numbers = #tpu.dot_dimension_numbers<[1], [0], [0], [1], [0, 0, 1, 1], [], []>} : vector<112x168xf32>, vector<168x28xf32>, vector<112x28xf32> -> vector<112x28xf32>
    %c8_176 = arith.constant 8 : index
    %c0_177 = arith.constant 0 : index
    %188 = vector.load %arg11[%c8_176, %c0_177] : memref<224x28xf32, #tpu.memory_space<vmem>>, vector<8x28xf32>
    %189 = vector.extract_strided_slice %187 {offsets = [8, 0], sizes = [8, 28], strides = [1, 1]} : vector<112x28xf32> to vector<8x28xf32>
    %190 = arith.addf %188, %189 : vector<8x28xf32>
    %c8_178 = arith.constant 8 : index
    %c0_179 = arith.constant 0 : index
    %191 = vector.load %arg11[%c8_178, %c0_179] : memref<224x28xf32, #tpu.memory_space<vmem>>, vector<8x28xf32>
    tpu.vector_store %arg11[%c8_178, %c0_179], %190 {strides = array<i32>} : memref<224x28xf32, #tpu.memory_space<vmem>>, vector<8x28xf32>,
    %c24_180 = arith.constant 24 : index
    %c0_181 = arith.constant 0 : index
    %192 = vector.load %arg11[%c24_180, %c0_181] : memref<224x28xf32, #tpu.memory_space<vmem>>, vector<8x28xf32>
    %193 = vector.extract_strided_slice %187 {offsets = [16, 0], sizes = [8, 28], strides = [1, 1]} : vector<112x28xf32> to vector<8x28xf32>
    %194 = arith.addf %192, %193 : vector<8x28xf32>
    %c24_182 = arith.constant 24 : index
    %c0_183 = arith.constant 0 : index
    %195 = vector.load %arg11[%c24_182, %c0_183] : memref<224x28xf32, #tpu.memory_space<vmem>>, vector<8x28xf32>
    tpu.vector_store %arg11[%c24_182, %c0_183], %194 {strides = array<i32>} : memref<224x28xf32, #tpu.memory_space<vmem>>, vector<8x28xf32>,
    %c40_184 = arith.constant 40 : index
    %c0_185 = arith.constant 0 : index
    %196 = vector.load %arg11[%c40_184, %c0_185] : memref<224x28xf32, #tpu.memory_space<vmem>>, vector<8x28xf32>
    %197 = vector.extract_strided_slice %187 {offsets = [24, 0], sizes = [8, 28], strides = [1, 1]} : vector<112x28xf32> to vector<8x28xf32>
    %198 = arith.addf %196, %197 : vector<8x28xf32>
    %c40_186 = arith.constant 40 : index
    %c0_187 = arith.constant 0 : index
    %199 = vector.load %arg11[%c40_186, %c0_187] : memref<224x28xf32, #tpu.memory_space<vmem>>, vector<8x28xf32>
    tpu.vector_store %arg11[%c40_186, %c0_187], %198 {strides = array<i32>} : memref<224x28xf32, #tpu.memory_space<vmem>>, vector<8x28xf32>,
    %c56_188 = arith.constant 56 : index
    %c0_189 = arith.constant 0 : index
    %200 = vector.load %arg11[%c56_188, %c0_189] : memref<224x28xf32, #tpu.memory_space<vmem>>, vector<8x28xf32>
    %201 = vector.extract_strided_slice %187 {offsets = [32, 0], sizes = [8, 28], strides = [1, 1]} : vector<112x28xf32> to vector<8x28xf32>
    %202 = arith.addf %200, %201 : vector<8x28xf32>
    %c56_190 = arith.constant 56 : index
    %c0_191 = arith.constant 0 : index
    %203 = vector.load %arg11[%c56_190, %c0_191] : memref<224x28xf32, #tpu.memory_space<vmem>>, vector<8x28xf32>
    tpu.vector_store %arg11[%c56_190, %c0_191], %202 {strides = array<i32>} : memref<224x28xf32, #tpu.memory_space<vmem>>, vector<8x28xf32>,
    %c72_192 = arith.constant 72 : index
    %c0_193 = arith.constant 0 : index
    %204 = vector.load %arg11[%c72_192, %c0_193] : memref<224x28xf32, #tpu.memory_space<vmem>>, vector<8x28xf32>
    %205 = vector.extract_strided_slice %187 {offsets = [40, 0], sizes = [8, 28], strides = [1, 1]} : vector<112x28xf32> to vector<8x28xf32>
    %206 = arith.addf %204, %205 : vector<8x28xf32>
    %c72_194 = arith.constant 72 : index
    %c0_195 = arith.constant 0 : index
    %207 = vector.load %arg11[%c72_194, %c0_195] : memref<224x28xf32, #tpu.memory_space<vmem>>, vector<8x28xf32>
    tpu.vector_store %arg11[%c72_194, %c0_195], %206 {strides = array<i32>} : memref<224x28xf32, #tpu.memory_space<vmem>>, vector<8x28xf32>,
    %c88_196 = arith.constant 88 : index
    %c0_197 = arith.constant 0 : index
    %208 = vector.load %arg11[%c88_196, %c0_197] : memref<224x28xf32, #tpu.memory_space<vmem>>, vector<8x28xf32>
    %209 = vector.extract_strided_slice %187 {offsets = [48, 0], sizes = [8, 28], strides = [1, 1]} : vector<112x28xf32> to vector<8x28xf32>
    %210 = arith.addf %208, %209 : vector<8x28xf32>
    %c88_198 = arith.constant 88 : index
    %c0_199 = arith.constant 0 : index
    %211 = vector.load %arg11[%c88_198, %c0_199] : memref<224x28xf32, #tpu.memory_space<vmem>>, vector<8x28xf32>
    tpu.vector_store %arg11[%c88_198, %c0_199], %210 {strides = array<i32>} : memref<224x28xf32, #tpu.memory_space<vmem>>, vector<8x28xf32>,
    %c104_200 = arith.constant 104 : index
    %c0_201 = arith.constant 0 : index
    %212 = vector.load %arg11[%c104_200, %c0_201] : memref<224x28xf32, #tpu.memory_space<vmem>>, vector<8x28xf32>
    %213 = vector.extract_strided_slice %187 {offsets = [56, 0], sizes = [8, 28], strides = [1, 1]} : vector<112x28xf32> to vector<8x28xf32>
    %214 = arith.addf %212, %213 : vector<8x28xf32>
    %c104_202 = arith.constant 104 : index
    %c0_203 = arith.constant 0 : index
    %215 = vector.load %arg11[%c104_202, %c0_203] : memref<224x28xf32, #tpu.memory_space<vmem>>, vector<8x28xf32>
    tpu.vector_store %arg11[%c104_202, %c0_203], %214 {strides = array<i32>} : memref<224x28xf32, #tpu.memory_space<vmem>>, vector<8x28xf32>,
    %c120 = arith.constant 120 : index
    %c0_204 = arith.constant 0 : index
    %216 = vector.load %arg11[%c120, %c0_204] : memref<224x28xf32, #tpu.memory_space<vmem>>, vector<8x28xf32>
    %217 = vector.extract_strided_slice %187 {offsets = [64, 0], sizes = [8, 28], strides = [1, 1]} : vector<112x28xf32> to vector<8x28xf32>
    %218 = arith.addf %216, %217 : vector<8x28xf32>
    %c120_205 = arith.constant 120 : index
    %c0_206 = arith.constant 0 : index
    %219 = vector.load %arg11[%c120_205, %c0_206] : memref<224x28xf32, #tpu.memory_space<vmem>>, vector<8x28xf32>
    tpu.vector_store %arg11[%c120_205, %c0_206], %218 {strides = array<i32>} : memref<224x28xf32, #tpu.memory_space<vmem>>, vector<8x28xf32>,
    %c136 = arith.constant 136 : index
    %c0_207 = arith.constant 0 : index
    %220 = vector.load %arg11[%c136, %c0_207] : memref<224x28xf32, #tpu.memory_space<vmem>>, vector<8x28xf32>
    %221 = vector.extract_strided_slice %187 {offsets = [72, 0], sizes = [8, 28], strides = [1, 1]} : vector<112x28xf32> to vector<8x28xf32>
    %222 = arith.addf %220, %221 : vector<8x28xf32>
    %c136_208 = arith.constant 136 : index
    %c0_209 = arith.constant 0 : index
    %223 = vector.load %arg11[%c136_208, %c0_209] : memref<224x28xf32, #tpu.memory_space<vmem>>, vector<8x28xf32>
    tpu.vector_store %arg11[%c136_208, %c0_209], %222 {strides = array<i32>} : memref<224x28xf32, #tpu.memory_space<vmem>>, vector<8x28xf32>,
    %c152 = arith.constant 152 : index
    %c0_210 = arith.constant 0 : index
    %224 = vector.load %arg11[%c152, %c0_210] : memref<224x28xf32, #tpu.memory_space<vmem>>, vector<8x28xf32>
    %225 = vector.extract_strided_slice %187 {offsets = [80, 0], sizes = [8, 28], strides = [1, 1]} : vector<112x28xf32> to vector<8x28xf32>
    %226 = arith.addf %224, %225 : vector<8x28xf32>
    %c152_211 = arith.constant 152 : index
    %c0_212 = arith.constant 0 : index
    %227 = vector.load %arg11[%c152_211, %c0_212] : memref<224x28xf32, #tpu.memory_space<vmem>>, vector<8x28xf32>
    tpu.vector_store %arg11[%c152_211, %c0_212], %226 {strides = array<i32>} : memref<224x28xf32, #tpu.memory_space<vmem>>, vector<8x28xf32>,
    %c168 = arith.constant 168 : index
    %c0_213 = arith.constant 0 : index
    %228 = vector.load %arg11[%c168, %c0_213] : memref<224x28xf32, #tpu.memory_space<vmem>>, vector<8x28xf32>
    %229 = vector.extract_strided_slice %187 {offsets = [88, 0], sizes = [8, 28], strides = [1, 1]} : vector<112x28xf32> to vector<8x28xf32>
    %230 = arith.addf %228, %229 : vector<8x28xf32>
    %c168_214 = arith.constant 168 : index
    %c0_215 = arith.constant 0 : index
    %231 = vector.load %arg11[%c168_214, %c0_215] : memref<224x28xf32, #tpu.memory_space<vmem>>, vector<8x28xf32>
    tpu.vector_store %arg11[%c168_214, %c0_215], %230 {strides = array<i32>} : memref<224x28xf32, #tpu.memory_space<vmem>>, vector<8x28xf32>,
    %c184 = arith.constant 184 : index
    %c0_216 = arith.constant 0 : index
    %232 = vector.load %arg11[%c184, %c0_216] : memref<224x28xf32, #tpu.memory_space<vmem>>, vector<8x28xf32>
    %233 = vector.extract_strided_slice %187 {offsets = [96, 0], sizes = [8, 28], strides = [1, 1]} : vector<112x28xf32> to vector<8x28xf32>
    %234 = arith.addf %232, %233 : vector<8x28xf32>
    %c184_217 = arith.constant 184 : index
    %c0_218 = arith.constant 0 : index
    %235 = vector.load %arg11[%c184_217, %c0_218] : memref<224x28xf32, #tpu.memory_space<vmem>>, vector<8x28xf32>
    tpu.vector_store %arg11[%c184_217, %c0_218], %234 {strides = array<i32>} : memref<224x28xf32, #tpu.memory_space<vmem>>, vector<8x28xf32>,
    %c200 = arith.constant 200 : index
    %c0_219 = arith.constant 0 : index
    %236 = vector.load %arg11[%c200, %c0_219] : memref<224x28xf32, #tpu.memory_space<vmem>>, vector<8x28xf32>
    %237 = vector.extract_strided_slice %187 {offsets = [104, 0], sizes = [8, 28], strides = [1, 1]} : vector<112x28xf32> to vector<8x28xf32>
    %238 = arith.addf %236, %237 : vector<8x28xf32>
    %c200_220 = arith.constant 200 : index
    %c0_221 = arith.constant 0 : index
    %239 = vector.load %arg11[%c200_220, %c0_221] : memref<224x28xf32, #tpu.memory_space<vmem>>, vector<8x28xf32>
    tpu.vector_store %arg11[%c200_220, %c0_221], %238 {strides = array<i32>} : memref<224x28xf32, #tpu.memory_space<vmem>>, vector<8x28xf32>,
    %c1_222 = arith.constant 1 : index
    %c0_223 = arith.constant 0 : index
    %c0_224 = arith.constant 0 : index
    %240 = vector.load %arg6[%c1_222, %c0_223, %c0_224] : memref<4x168x28xf32, #tpu.memory_space<vmem>>, vector<1x168x28xf32>
    %241 = vector.shape_cast %240 : vector<1x168x28xf32> to vector<168x28xf32>
    %cst_225 = arith.constant dense<0.000000e+00> : vector<112x28xf32>
    %242 = tpu.matmul %184, %241, %cst_225 {dimension_numbers = #tpu.dot_dimension_numbers<[1], [0], [0], [1], [0, 0, 1, 1], [], []>} : vector<112x168xf32>, vector<168x28xf32>, vector<112x28xf32> -> vector<112x28xf32>
    %c0_226 = arith.constant 0 : index
    %c0_227 = arith.constant 0 : index
    %243 = vector.load %arg11[%c0_226, %c0_227] : memref<224x28xf32, #tpu.memory_space<vmem>>, vector<8x28xf32>
    %244 = vector.extract_strided_slice %242 {offsets = [0, 0], sizes = [8, 28], strides = [1, 1]} : vector<112x28xf32> to vector<8x28xf32>
    %245 = arith.addf %243, %244 : vector<8x28xf32>
    %c0_228 = arith.constant 0 : index
    %c0_229 = arith.constant 0 : index
    %246 = vector.load %arg11[%c0_228, %c0_229] : memref<224x28xf32, #tpu.memory_space<vmem>>, vector<8x28xf32>
    tpu.vector_store %arg11[%c0_228, %c0_229], %245 {strides = array<i32>} : memref<224x28xf32, #tpu.memory_space<vmem>>, vector<8x28xf32>,
    %c16_230 = arith.constant 16 : index
    %c0_231 = arith.constant 0 : index
    %247 = vector.load %arg11[%c16_230, %c0_231] : memref<224x28xf32, #tpu.memory_space<vmem>>, vector<8x28xf32>
    %248 = vector.extract_strided_slice %242 {offsets = [8, 0], sizes = [8, 28], strides = [1, 1]} : vector<112x28xf32> to vector<8x28xf32>
    %249 = arith.addf %247, %248 : vector<8x28xf32>
    %c16_232 = arith.constant 16 : index
    %c0_233 = arith.constant 0 : index
    %250 = vector.load %arg11[%c16_232, %c0_233] : memref<224x28xf32, #tpu.memory_space<vmem>>, vector<8x28xf32>
    tpu.vector_store %arg11[%c16_232, %c0_233], %249 {strides = array<i32>} : memref<224x28xf32, #tpu.memory_space<vmem>>, vector<8x28xf32>,
    %c32_234 = arith.constant 32 : index
    %c0_235 = arith.constant 0 : index
    %251 = vector.load %arg11[%c32_234, %c0_235] : memref<224x28xf32, #tpu.memory_space<vmem>>, vector<8x28xf32>
    %252 = vector.extract_strided_slice %242 {offsets = [16, 0], sizes = [8, 28], strides = [1, 1]} : vector<112x28xf32> to vector<8x28xf32>
    %253 = arith.addf %251, %252 : vector<8x28xf32>
    %c32_236 = arith.constant 32 : index
    %c0_237 = arith.constant 0 : index
    %254 = vector.load %arg11[%c32_236, %c0_237] : memref<224x28xf32, #tpu.memory_space<vmem>>, vector<8x28xf32>
    tpu.vector_store %arg11[%c32_236, %c0_237], %253 {strides = array<i32>} : memref<224x28xf32, #tpu.memory_space<vmem>>, vector<8x28xf32>,
    %c48_238 = arith.constant 48 : index
    %c0_239 = arith.constant 0 : index
    %255 = vector.load %arg11[%c48_238, %c0_239] : memref<224x28xf32, #tpu.memory_space<vmem>>, vector<8x28xf32>
    %256 = vector.extract_strided_slice %242 {offsets = [24, 0], sizes = [8, 28], strides = [1, 1]} : vector<112x28xf32> to vector<8x28xf32>
    %257 = arith.addf %255, %256 : vector<8x28xf32>
    %c48_240 = arith.constant 48 : index
    %c0_241 = arith.constant 0 : index
    %258 = vector.load %arg11[%c48_240, %c0_241] : memref<224x28xf32, #tpu.memory_space<vmem>>, vector<8x28xf32>
    tpu.vector_store %arg11[%c48_240, %c0_241], %257 {strides = array<i32>} : memref<224x28xf32, #tpu.memory_space<vmem>>, vector<8x28xf32>,
    %c64_242 = arith.constant 64 : index
    %c0_243 = arith.constant 0 : index
    %259 = vector.load %arg11[%c64_242, %c0_243] : memref<224x28xf32, #tpu.memory_space<vmem>>, vector<8x28xf32>
    %260 = vector.extract_strided_slice %242 {offsets = [32, 0], sizes = [8, 28], strides = [1, 1]} : vector<112x28xf32> to vector<8x28xf32>
    %261 = arith.addf %259, %260 : vector<8x28xf32>
    %c64_244 = arith.constant 64 : index
    %c0_245 = arith.constant 0 : index
    %262 = vector.load %arg11[%c64_244, %c0_245] : memref<224x28xf32, #tpu.memory_space<vmem>>, vector<8x28xf32>
    tpu.vector_store %arg11[%c64_244, %c0_245], %261 {strides = array<i32>} : memref<224x28xf32, #tpu.memory_space<vmem>>, vector<8x28xf32>,
    %c80_246 = arith.constant 80 : index
    %c0_247 = arith.constant 0 : index
    %263 = vector.load %arg11[%c80_246, %c0_247] : memref<224x28xf32, #tpu.memory_space<vmem>>, vector<8x28xf32>
    %264 = vector.extract_strided_slice %242 {offsets = [40, 0], sizes = [8, 28], strides = [1, 1]} : vector<112x28xf32> to vector<8x28xf32>
    %265 = arith.addf %263, %264 : vector<8x28xf32>
    %c80_248 = arith.constant 80 : index
    %c0_249 = arith.constant 0 : index
    %266 = vector.load %arg11[%c80_248, %c0_249] : memref<224x28xf32, #tpu.memory_space<vmem>>, vector<8x28xf32>
    tpu.vector_store %arg11[%c80_248, %c0_249], %265 {strides = array<i32>} : memref<224x28xf32, #tpu.memory_space<vmem>>, vector<8x28xf32>,
    %c96_250 = arith.constant 96 : index
    %c0_251 = arith.constant 0 : index
    %267 = vector.load %arg11[%c96_250, %c0_251] : memref<224x28xf32, #tpu.memory_space<vmem>>, vector<8x28xf32>
    %268 = vector.extract_strided_slice %242 {offsets = [48, 0], sizes = [8, 28], strides = [1, 1]} : vector<112x28xf32> to vector<8x28xf32>
    %269 = arith.addf %267, %268 : vector<8x28xf32>
    %c96_252 = arith.constant 96 : index
    %c0_253 = arith.constant 0 : index
    %270 = vector.load %arg11[%c96_252, %c0_253] : memref<224x28xf32, #tpu.memory_space<vmem>>, vector<8x28xf32>
    tpu.vector_store %arg11[%c96_252, %c0_253], %269 {strides = array<i32>} : memref<224x28xf32, #tpu.memory_space<vmem>>, vector<8x28xf32>,
    %c112 = arith.constant 112 : index
    %c0_254 = arith.constant 0 : index
    %271 = vector.load %arg11[%c112, %c0_254] : memref<224x28xf32, #tpu.memory_space<vmem>>, vector<8x28xf32>
    %272 = vector.extract_strided_slice %242 {offsets = [56, 0], sizes = [8, 28], strides = [1, 1]} : vector<112x28xf32> to vector<8x28xf32>
    %273 = arith.addf %271, %272 : vector<8x28xf32>
    %c112_255 = arith.constant 112 : index
    %c0_256 = arith.constant 0 : index
    %274 = vector.load %arg11[%c112_255, %c0_256] : memref<224x28xf32, #tpu.memory_space<vmem>>, vector<8x28xf32>
    tpu.vector_store %arg11[%c112_255, %c0_256], %273 {strides = array<i32>} : memref<224x28xf32, #tpu.memory_space<vmem>>, vector<8x28xf32>,
    %c128 = arith.constant 128 : index
    %c0_257 = arith.constant 0 : index
    %275 = vector.load %arg11[%c128, %c0_257] : memref<224x28xf32, #tpu.memory_space<vmem>>, vector<8x28xf32>
    %276 = vector.extract_strided_slice %242 {offsets = [64, 0], sizes = [8, 28], strides = [1, 1]} : vector<112x28xf32> to vector<8x28xf32>
    %277 = arith.addf %275, %276 : vector<8x28xf32>
    %c128_258 = arith.constant 128 : index
    %c0_259 = arith.constant 0 : index
    %278 = vector.load %arg11[%c128_258, %c0_259] : memref<224x28xf32, #tpu.memory_space<vmem>>, vector<8x28xf32>
    tpu.vector_store %arg11[%c128_258, %c0_259], %277 {strides = array<i32>} : memref<224x28xf32, #tpu.memory_space<vmem>>, vector<8x28xf32>,
    %c144 = arith.constant 144 : index
    %c0_260 = arith.constant 0 : index
    %279 = vector.load %arg11[%c144, %c0_260] : memref<224x28xf32, #tpu.memory_space<vmem>>, vector<8x28xf32>
    %280 = vector.extract_strided_slice %242 {offsets = [72, 0], sizes = [8, 28], strides = [1, 1]} : vector<112x28xf32> to vector<8x28xf32>
    %281 = arith.addf %279, %280 : vector<8x28xf32>
    %c144_261 = arith.constant 144 : index
    %c0_262 = arith.constant 0 : index
    %282 = vector.load %arg11[%c144_261, %c0_262] : memref<224x28xf32, #tpu.memory_space<vmem>>, vector<8x28xf32>
    tpu.vector_store %arg11[%c144_261, %c0_262], %281 {strides = array<i32>} : memref<224x28xf32, #tpu.memory_space<vmem>>, vector<8x28xf32>,
    %c160 = arith.constant 160 : index
    %c0_263 = arith.constant 0 : index
    %283 = vector.load %arg11[%c160, %c0_263] : memref<224x28xf32, #tpu.memory_space<vmem>>, vector<8x28xf32>
    %284 = vector.extract_strided_slice %242 {offsets = [80, 0], sizes = [8, 28], strides = [1, 1]} : vector<112x28xf32> to vector<8x28xf32>
    %285 = arith.addf %283, %284 : vector<8x28xf32>
    %c160_264 = arith.constant 160 : index
    %c0_265 = arith.constant 0 : index
    %286 = vector.load %arg11[%c160_264, %c0_265] : memref<224x28xf32, #tpu.memory_space<vmem>>, vector<8x28xf32>
    tpu.vector_store %arg11[%c160_264, %c0_265], %285 {strides = array<i32>} : memref<224x28xf32, #tpu.memory_space<vmem>>, vector<8x28xf32>,
    %c176 = arith.constant 176 : index
    %c0_266 = arith.constant 0 : index
    %287 = vector.load %arg11[%c176, %c0_266] : memref<224x28xf32, #tpu.memory_space<vmem>>, vector<8x28xf32>
    %288 = vector.extract_strided_slice %242 {offsets = [88, 0], sizes = [8, 28], strides = [1, 1]} : vector<112x28xf32> to vector<8x28xf32>
    %289 = arith.addf %287, %288 : vector<8x28xf32>
    %c176_267 = arith.constant 176 : index
    %c0_268 = arith.constant 0 : index
    %290 = vector.load %arg11[%c176_267, %c0_268] : memref<224x28xf32, #tpu.memory_space<vmem>>, vector<8x28xf32>
    tpu.vector_store %arg11[%c176_267, %c0_268], %289 {strides = array<i32>} : memref<224x28xf32, #tpu.memory_space<vmem>>, vector<8x28xf32>,
    %c192 = arith.constant 192 : index
    %c0_269 = arith.constant 0 : index
    %291 = vector.load %arg11[%c192, %c0_269] : memref<224x28xf32, #tpu.memory_space<vmem>>, vector<8x28xf32>
    %292 = vector.extract_strided_slice %242 {offsets = [96, 0], sizes = [8, 28], strides = [1, 1]} : vector<112x28xf32> to vector<8x28xf32>
    %293 = arith.addf %291, %292 : vector<8x28xf32>
    %c192_270 = arith.constant 192 : index
    %c0_271 = arith.constant 0 : index
    %294 = vector.load %arg11[%c192_270, %c0_271] : memref<224x28xf32, #tpu.memory_space<vmem>>, vector<8x28xf32>
    tpu.vector_store %arg11[%c192_270, %c0_271], %293 {strides = array<i32>} : memref<224x28xf32, #tpu.memory_space<vmem>>, vector<8x28xf32>,
    %c208 = arith.constant 208 : index
    %c0_272 = arith.constant 0 : index
    %295 = vector.load %arg11[%c208, %c0_272] : memref<224x28xf32, #tpu.memory_space<vmem>>, vector<8x28xf32>
    %296 = vector.extract_strided_slice %242 {offsets = [104, 0], sizes = [8, 28], strides = [1, 1]} : vector<112x28xf32> to vector<8x28xf32>
    %297 = arith.addf %295, %296 : vector<8x28xf32>
    %c208_273 = arith.constant 208 : index
    %c0_274 = arith.constant 0 : index
    %298 = vector.load %arg11[%c208_273, %c0_274] : memref<224x28xf32, #tpu.memory_space<vmem>>, vector<8x28xf32>
    tpu.vector_store %arg11[%c208_273, %c0_274], %297 {strides = array<i32>} : memref<224x28xf32, #tpu.memory_space<vmem>>, vector<8x28xf32>,
    %c2_275 = arith.constant 2 : index
    %c0_276 = arith.constant 0 : index
    %c0_277 = arith.constant 0 : index
    %299 = vector.load %arg6[%c2_275, %c0_276, %c0_277] : memref<4x168x28xf32, #tpu.memory_space<vmem>>, vector<1x168x28xf32>
    %300 = vector.shape_cast %299 : vector<1x168x28xf32> to vector<168x28xf32>
    %cst_278 = arith.constant dense<0.000000e+00> : vector<112x28xf32>
    %301 = tpu.matmul %184, %300, %cst_278 {dimension_numbers = #tpu.dot_dimension_numbers<[1], [0], [0], [1], [0, 0, 1, 1], [], []>} : vector<112x168xf32>, vector<168x28xf32>, vector<112x28xf32> -> vector<112x28xf32>
    %c8_279 = arith.constant 8 : index
    %c0_280 = arith.constant 0 : index
    %302 = vector.load %arg11[%c8_279, %c0_280] : memref<224x28xf32, #tpu.memory_space<vmem>>, vector<8x28xf32>
    %303 = vector.extract_strided_slice %301 {offsets = [0, 0], sizes = [8, 28], strides = [1, 1]} : vector<112x28xf32> to vector<8x28xf32>
    %304 = arith.addf %302, %303 : vector<8x28xf32>
    %c8_281 = arith.constant 8 : index
    %c0_282 = arith.constant 0 : index
    %305 = vector.load %arg11[%c8_281, %c0_282] : memref<224x28xf32, #tpu.memory_space<vmem>>, vector<8x28xf32>
    tpu.vector_store %arg11[%c8_281, %c0_282], %304 {strides = array<i32>} : memref<224x28xf32, #tpu.memory_space<vmem>>, vector<8x28xf32>,
    %c24_283 = arith.constant 24 : index
    %c0_284 = arith.constant 0 : index
    %306 = vector.load %arg11[%c24_283, %c0_284] : memref<224x28xf32, #tpu.memory_space<vmem>>, vector<8x28xf32>
    %307 = vector.extract_strided_slice %301 {offsets = [8, 0], sizes = [8, 28], strides = [1, 1]} : vector<112x28xf32> to vector<8x28xf32>
    %308 = arith.addf %306, %307 : vector<8x28xf32>
    %c24_285 = arith.constant 24 : index
    %c0_286 = arith.constant 0 : index
    %309 = vector.load %arg11[%c24_285, %c0_286] : memref<224x28xf32, #tpu.memory_space<vmem>>, vector<8x28xf32>
    tpu.vector_store %arg11[%c24_285, %c0_286], %308 {strides = array<i32>} : memref<224x28xf32, #tpu.memory_space<vmem>>, vector<8x28xf32>,
    %c40_287 = arith.constant 40 : index
    %c0_288 = arith.constant 0 : index
    %310 = vector.load %arg11[%c40_287, %c0_288] : memref<224x28xf32, #tpu.memory_space<vmem>>, vector<8x28xf32>
    %311 = vector.extract_strided_slice %301 {offsets = [16, 0], sizes = [8, 28], strides = [1, 1]} : vector<112x28xf32> to vector<8x28xf32>
    %312 = arith.addf %310, %311 : vector<8x28xf32>
    %c40_289 = arith.constant 40 : index
    %c0_290 = arith.constant 0 : index
    %313 = vector.load %arg11[%c40_289, %c0_290] : memref<224x28xf32, #tpu.memory_space<vmem>>, vector<8x28xf32>
    tpu.vector_store %arg11[%c40_289, %c0_290], %312 {strides = array<i32>} : memref<224x28xf32, #tpu.memory_space<vmem>>, vector<8x28xf32>,
    %c56_291 = arith.constant 56 : index
    %c0_292 = arith.constant 0 : index
    %314 = vector.load %arg11[%c56_291, %c0_292] : memref<224x28xf32, #tpu.memory_space<vmem>>, vector<8x28xf32>
    %315 = vector.extract_strided_slice %301 {offsets = [24, 0], sizes = [8, 28], strides = [1, 1]} : vector<112x28xf32> to vector<8x28xf32>
    %316 = arith.addf %314, %315 : vector<8x28xf32>
    %c56_293 = arith.constant 56 : index
    %c0_294 = arith.constant 0 : index
    %317 = vector.load %arg11[%c56_293, %c0_294] : memref<224x28xf32, #tpu.memory_space<vmem>>, vector<8x28xf32>
    tpu.vector_store %arg11[%c56_293, %c0_294], %316 {strides = array<i32>} : memref<224x28xf32, #tpu.memory_space<vmem>>, vector<8x28xf32>,
    %c72_295 = arith.constant 72 : index
    %c0_296 = arith.constant 0 : index
    %318 = vector.load %arg11[%c72_295, %c0_296] : memref<224x28xf32, #tpu.memory_space<vmem>>, vector<8x28xf32>
    %319 = vector.extract_strided_slice %301 {offsets = [32, 0], sizes = [8, 28], strides = [1, 1]} : vector<112x28xf32> to vector<8x28xf32>
    %320 = arith.addf %318, %319 : vector<8x28xf32>
    %c72_297 = arith.constant 72 : index
    %c0_298 = arith.constant 0 : index
    %321 = vector.load %arg11[%c72_297, %c0_298] : memref<224x28xf32, #tpu.memory_space<vmem>>, vector<8x28xf32>
    tpu.vector_store %arg11[%c72_297, %c0_298], %320 {strides = array<i32>} : memref<224x28xf32, #tpu.memory_space<vmem>>, vector<8x28xf32>,
    %c88_299 = arith.constant 88 : index
    %c0_300 = arith.constant 0 : index
    %322 = vector.load %arg11[%c88_299, %c0_300] : memref<224x28xf32, #tpu.memory_space<vmem>>, vector<8x28xf32>
    %323 = vector.extract_strided_slice %301 {offsets = [40, 0], sizes = [8, 28], strides = [1, 1]} : vector<112x28xf32> to vector<8x28xf32>
    %324 = arith.addf %322, %323 : vector<8x28xf32>
    %c88_301 = arith.constant 88 : index
    %c0_302 = arith.constant 0 : index
    %325 = vector.load %arg11[%c88_301, %c0_302] : memref<224x28xf32, #tpu.memory_space<vmem>>, vector<8x28xf32>
    tpu.vector_store %arg11[%c88_301, %c0_302], %324 {strides = array<i32>} : memref<224x28xf32, #tpu.memory_space<vmem>>, vector<8x28xf32>,
    %c104_303 = arith.constant 104 : index
    %c0_304 = arith.constant 0 : index
    %326 = vector.load %arg11[%c104_303, %c0_304] : memref<224x28xf32, #tpu.memory_space<vmem>>, vector<8x28xf32>
    %327 = vector.extract_strided_slice %301 {offsets = [48, 0], sizes = [8, 28], strides = [1, 1]} : vector<112x28xf32> to vector<8x28xf32>
    %328 = arith.addf %326, %327 : vector<8x28xf32>
    %c104_305 = arith.constant 104 : index
    %c0_306 = arith.constant 0 : index
    %329 = vector.load %arg11[%c104_305, %c0_306] : memref<224x28xf32, #tpu.memory_space<vmem>>, vector<8x28xf32>
    tpu.vector_store %arg11[%c104_305, %c0_306], %328 {strides = array<i32>} : memref<224x28xf32, #tpu.memory_space<vmem>>, vector<8x28xf32>,
    %c120_307 = arith.constant 120 : index
    %c0_308 = arith.constant 0 : index
    %330 = vector.load %arg11[%c120_307, %c0_308] : memref<224x28xf32, #tpu.memory_space<vmem>>, vector<8x28xf32>
    %331 = vector.extract_strided_slice %301 {offsets = [56, 0], sizes = [8, 28], strides = [1, 1]} : vector<112x28xf32> to vector<8x28xf32>
    %332 = arith.addf %330, %331 : vector<8x28xf32>
    %c120_309 = arith.constant 120 : index
    %c0_310 = arith.constant 0 : index
    %333 = vector.load %arg11[%c120_309, %c0_310] : memref<224x28xf32, #tpu.memory_space<vmem>>, vector<8x28xf32>
    tpu.vector_store %arg11[%c120_309, %c0_310], %332 {strides = array<i32>} : memref<224x28xf32, #tpu.memory_space<vmem>>, vector<8x28xf32>,
    %c136_311 = arith.constant 136 : index
    %c0_312 = arith.constant 0 : index
    %334 = vector.load %arg11[%c136_311, %c0_312] : memref<224x28xf32, #tpu.memory_space<vmem>>, vector<8x28xf32>
    %335 = vector.extract_strided_slice %301 {offsets = [64, 0], sizes = [8, 28], strides = [1, 1]} : vector<112x28xf32> to vector<8x28xf32>
    %336 = arith.addf %334, %335 : vector<8x28xf32>
    %c136_313 = arith.constant 136 : index
    %c0_314 = arith.constant 0 : index
    %337 = vector.load %arg11[%c136_313, %c0_314] : memref<224x28xf32, #tpu.memory_space<vmem>>, vector<8x28xf32>
    tpu.vector_store %arg11[%c136_313, %c0_314], %336 {strides = array<i32>} : memref<224x28xf32, #tpu.memory_space<vmem>>, vector<8x28xf32>,
    %c152_315 = arith.constant 152 : index
    %c0_316 = arith.constant 0 : index
    %338 = vector.load %arg11[%c152_315, %c0_316] : memref<224x28xf32, #tpu.memory_space<vmem>>, vector<8x28xf32>
    %339 = vector.extract_strided_slice %301 {offsets = [72, 0], sizes = [8, 28], strides = [1, 1]} : vector<112x28xf32> to vector<8x28xf32>
    %340 = arith.addf %338, %339 : vector<8x28xf32>
    %c152_317 = arith.constant 152 : index
    %c0_318 = arith.constant 0 : index
    %341 = vector.load %arg11[%c152_317, %c0_318] : memref<224x28xf32, #tpu.memory_space<vmem>>, vector<8x28xf32>
    tpu.vector_store %arg11[%c152_317, %c0_318], %340 {strides = array<i32>} : memref<224x28xf32, #tpu.memory_space<vmem>>, vector<8x28xf32>,
    %c168_319 = arith.constant 168 : index
    %c0_320 = arith.constant 0 : index
    %342 = vector.load %arg11[%c168_319, %c0_320] : memref<224x28xf32, #tpu.memory_space<vmem>>, vector<8x28xf32>
    %343 = vector.extract_strided_slice %301 {offsets = [80, 0], sizes = [8, 28], strides = [1, 1]} : vector<112x28xf32> to vector<8x28xf32>
    %344 = arith.addf %342, %343 : vector<8x28xf32>
    %c168_321 = arith.constant 168 : index
    %c0_322 = arith.constant 0 : index
    %345 = vector.load %arg11[%c168_321, %c0_322] : memref<224x28xf32, #tpu.memory_space<vmem>>, vector<8x28xf32>
    tpu.vector_store %arg11[%c168_321, %c0_322], %344 {strides = array<i32>} : memref<224x28xf32, #tpu.memory_space<vmem>>, vector<8x28xf32>,
    %c184_323 = arith.constant 184 : index
    %c0_324 = arith.constant 0 : index
    %346 = vector.load %arg11[%c184_323, %c0_324] : memref<224x28xf32, #tpu.memory_space<vmem>>, vector<8x28xf32>
    %347 = vector.extract_strided_slice %301 {offsets = [88, 0], sizes = [8, 28], strides = [1, 1]} : vector<112x28xf32> to vector<8x28xf32>
    %348 = arith.addf %346, %347 : vector<8x28xf32>
    %c184_325 = arith.constant 184 : index
    %c0_326 = arith.constant 0 : index
    %349 = vector.load %arg11[%c184_325, %c0_326] : memref<224x28xf32, #tpu.memory_space<vmem>>, vector<8x28xf32>
    tpu.vector_store %arg11[%c184_325, %c0_326], %348 {strides = array<i32>} : memref<224x28xf32, #tpu.memory_space<vmem>>, vector<8x28xf32>,
    %c200_327 = arith.constant 200 : index
    %c0_328 = arith.constant 0 : index
    %350 = vector.load %arg11[%c200_327, %c0_328] : memref<224x28xf32, #tpu.memory_space<vmem>>, vector<8x28xf32>
    %351 = vector.extract_strided_slice %301 {offsets = [96, 0], sizes = [8, 28], strides = [1, 1]} : vector<112x28xf32> to vector<8x28xf32>
    %352 = arith.addf %350, %351 : vector<8x28xf32>
    %c200_329 = arith.constant 200 : index
    %c0_330 = arith.constant 0 : index
    %353 = vector.load %arg11[%c200_329, %c0_330] : memref<224x28xf32, #tpu.memory_space<vmem>>, vector<8x28xf32>
    tpu.vector_store %arg11[%c200_329, %c0_330], %352 {strides = array<i32>} : memref<224x28xf32, #tpu.memory_space<vmem>>, vector<8x28xf32>,
    %c216 = arith.constant 216 : index
    %c0_331 = arith.constant 0 : index
    %354 = vector.load %arg11[%c216, %c0_331] : memref<224x28xf32, #tpu.memory_space<vmem>>, vector<8x28xf32>
    %355 = vector.extract_strided_slice %301 {offsets = [104, 0], sizes = [8, 28], strides = [1, 1]} : vector<112x28xf32> to vector<8x28xf32>
    %356 = arith.addf %354, %355 : vector<8x28xf32>
    %c216_332 = arith.constant 216 : index
    %c0_333 = arith.constant 0 : index
    %357 = vector.load %arg11[%c216_332, %c0_333] : memref<224x28xf32, #tpu.memory_space<vmem>>, vector<8x28xf32>
    tpu.vector_store %arg11[%c216_332, %c0_333], %356 {strides = array<i32>} : memref<224x28xf32, #tpu.memory_space<vmem>>, vector<8x28xf32>,
    %c3_334 = arith.constant 3 : index
    %c0_335 = arith.constant 0 : index
    %c0_336 = arith.constant 0 : index
    %358 = vector.load %arg6[%c3_334, %c0_335, %c0_336] : memref<4x168x28xf32, #tpu.memory_space<vmem>>, vector<1x168x28xf32>
    %359 = vector.shape_cast %358 : vector<1x168x28xf32> to vector<168x28xf32>
    %cst_337 = arith.constant dense<0.000000e+00> : vector<112x28xf32>
    %360 = tpu.matmul %184, %359, %cst_337 {dimension_numbers = #tpu.dot_dimension_numbers<[1], [0], [0], [1], [0, 0, 1, 1], [], []>} : vector<112x168xf32>, vector<168x28xf32>, vector<112x28xf32> -> vector<112x28xf32>
    %c16_338 = arith.constant 16 : index
    %c0_339 = arith.constant 0 : index
    %361 = vector.load %arg11[%c16_338, %c0_339] : memref<224x28xf32, #tpu.memory_space<vmem>>, vector<8x28xf32>
    %362 = vector.extract_strided_slice %360 {offsets = [0, 0], sizes = [8, 28], strides = [1, 1]} : vector<112x28xf32> to vector<8x28xf32>
    %363 = arith.addf %361, %362 : vector<8x28xf32>
    %c16_340 = arith.constant 16 : index
    %c0_341 = arith.constant 0 : index
    %364 = vector.load %arg11[%c16_340, %c0_341] : memref<224x28xf32, #tpu.memory_space<vmem>>, vector<8x28xf32>
    tpu.vector_store %arg11[%c16_340, %c0_341], %363 {strides = array<i32>} : memref<224x28xf32, #tpu.memory_space<vmem>>, vector<8x28xf32>,
    %c32_342 = arith.constant 32 : index
    %c0_343 = arith.constant 0 : index
    %365 = vector.load %arg11[%c32_342, %c0_343] : memref<224x28xf32, #tpu.memory_space<vmem>>, vector<8x28xf32>
    %366 = vector.extract_strided_slice %360 {offsets = [8, 0], sizes = [8, 28], strides = [1, 1]} : vector<112x28xf32> to vector<8x28xf32>
    %367 = arith.addf %365, %366 : vector<8x28xf32>
    %c32_344 = arith.constant 32 : index
    %c0_345 = arith.constant 0 : index
    %368 = vector.load %arg11[%c32_344, %c0_345] : memref<224x28xf32, #tpu.memory_space<vmem>>, vector<8x28xf32>
    tpu.vector_store %arg11[%c32_344, %c0_345], %367 {strides = array<i32>} : memref<224x28xf32, #tpu.memory_space<vmem>>, vector<8x28xf32>,
    %c48_346 = arith.constant 48 : index
    %c0_347 = arith.constant 0 : index
    %369 = vector.load %arg11[%c48_346, %c0_347] : memref<224x28xf32, #tpu.memory_space<vmem>>, vector<8x28xf32>
    %370 = vector.extract_strided_slice %360 {offsets = [16, 0], sizes = [8, 28], strides = [1, 1]} : vector<112x28xf32> to vector<8x28xf32>
    %371 = arith.addf %369, %370 : vector<8x28xf32>
    %c48_348 = arith.constant 48 : index
    %c0_349 = arith.constant 0 : index
    %372 = vector.load %arg11[%c48_348, %c0_349] : memref<224x28xf32, #tpu.memory_space<vmem>>, vector<8x28xf32>
    tpu.vector_store %arg11[%c48_348, %c0_349], %371 {strides = array<i32>} : memref<224x28xf32, #tpu.memory_space<vmem>>, vector<8x28xf32>,
    %c64_350 = arith.constant 64 : index
    %c0_351 = arith.constant 0 : index
    %373 = vector.load %arg11[%c64_350, %c0_351] : memref<224x28xf32, #tpu.memory_space<vmem>>, vector<8x28xf32>
    %374 = vector.extract_strided_slice %360 {offsets = [24, 0], sizes = [8, 28], strides = [1, 1]} : vector<112x28xf32> to vector<8x28xf32>
    %375 = arith.addf %373, %374 : vector<8x28xf32>
    %c64_352 = arith.constant 64 : index
    %c0_353 = arith.constant 0 : index
    %376 = vector.load %arg11[%c64_352, %c0_353] : memref<224x28xf32, #tpu.memory_space<vmem>>, vector<8x28xf32>
    tpu.vector_store %arg11[%c64_352, %c0_353], %375 {strides = array<i32>} : memref<224x28xf32, #tpu.memory_space<vmem>>, vector<8x28xf32>,
    %c80_354 = arith.constant 80 : index
    %c0_355 = arith.constant 0 : index
    %377 = vector.load %arg11[%c80_354, %c0_355] : memref<224x28xf32, #tpu.memory_space<vmem>>, vector<8x28xf32>
    %378 = vector.extract_strided_slice %360 {offsets = [32, 0], sizes = [8, 28], strides = [1, 1]} : vector<112x28xf32> to vector<8x28xf32>
    %379 = arith.addf %377, %378 : vector<8x28xf32>
    %c80_356 = arith.constant 80 : index
    %c0_357 = arith.constant 0 : index
    %380 = vector.load %arg11[%c80_356, %c0_357] : memref<224x28xf32, #tpu.memory_space<vmem>>, vector<8x28xf32>
    tpu.vector_store %arg11[%c80_356, %c0_357], %379 {strides = array<i32>} : memref<224x28xf32, #tpu.memory_space<vmem>>, vector<8x28xf32>,
    %c96_358 = arith.constant 96 : index
    %c0_359 = arith.constant 0 : index
    %381 = vector.load %arg11[%c96_358, %c0_359] : memref<224x28xf32, #tpu.memory_space<vmem>>, vector<8x28xf32>
    %382 = vector.extract_strided_slice %360 {offsets = [40, 0], sizes = [8, 28], strides = [1, 1]} : vector<112x28xf32> to vector<8x28xf32>
    %383 = arith.addf %381, %382 : vector<8x28xf32>
    %c96_360 = arith.constant 96 : index
    %c0_361 = arith.constant 0 : index
    %384 = vector.load %arg11[%c96_360, %c0_361] : memref<224x28xf32, #tpu.memory_space<vmem>>, vector<8x28xf32>
    tpu.vector_store %arg11[%c96_360, %c0_361], %383 {strides = array<i32>} : memref<224x28xf32, #tpu.memory_space<vmem>>, vector<8x28xf32>,
    %c112_362 = arith.constant 112 : index
    %c0_363 = arith.constant 0 : index
    %385 = vector.load %arg11[%c112_362, %c0_363] : memref<224x28xf32, #tpu.memory_space<vmem>>, vector<8x28xf32>
    %386 = vector.extract_strided_slice %360 {offsets = [48, 0], sizes = [8, 28], strides = [1, 1]} : vector<112x28xf32> to vector<8x28xf32>
    %387 = arith.addf %385, %386 : vector<8x28xf32>
    %c112_364 = arith.constant 112 : index
    %c0_365 = arith.constant 0 : index
    %388 = vector.load %arg11[%c112_364, %c0_365] : memref<224x28xf32, #tpu.memory_space<vmem>>, vector<8x28xf32>
    tpu.vector_store %arg11[%c112_364, %c0_365], %387 {strides = array<i32>} : memref<224x28xf32, #tpu.memory_space<vmem>>, vector<8x28xf32>,
    %c128_366 = arith.constant 128 : index
    %c0_367 = arith.constant 0 : index
    %389 = vector.load %arg11[%c128_366, %c0_367] : memref<224x28xf32, #tpu.memory_space<vmem>>, vector<8x28xf32>
    %390 = vector.extract_strided_slice %360 {offsets = [56, 0], sizes = [8, 28], strides = [1, 1]} : vector<112x28xf32> to vector<8x28xf32>
    %391 = arith.addf %389, %390 : vector<8x28xf32>
    %c128_368 = arith.constant 128 : index
    %c0_369 = arith.constant 0 : index
    %392 = vector.load %arg11[%c128_368, %c0_369] : memref<224x28xf32, #tpu.memory_space<vmem>>, vector<8x28xf32>
    tpu.vector_store %arg11[%c128_368, %c0_369], %391 {strides = array<i32>} : memref<224x28xf32, #tpu.memory_space<vmem>>, vector<8x28xf32>,
    %c144_370 = arith.constant 144 : index
    %c0_371 = arith.constant 0 : index
    %393 = vector.load %arg11[%c144_370, %c0_371] : memref<224x28xf32, #tpu.memory_space<vmem>>, vector<8x28xf32>
    %394 = vector.extract_strided_slice %360 {offsets = [64, 0], sizes = [8, 28], strides = [1, 1]} : vector<112x28xf32> to vector<8x28xf32>
    %395 = arith.addf %393, %394 : vector<8x28xf32>
    %c144_372 = arith.constant 144 : index
    %c0_373 = arith.constant 0 : index
    %396 = vector.load %arg11[%c144_372, %c0_373] : memref<224x28xf32, #tpu.memory_space<vmem>>, vector<8x28xf32>
    tpu.vector_store %arg11[%c144_372, %c0_373], %395 {strides = array<i32>} : memref<224x28xf32, #tpu.memory_space<vmem>>, vector<8x28xf32>,
    %c160_374 = arith.constant 160 : index
    %c0_375 = arith.constant 0 : index
    %397 = vector.load %arg11[%c160_374, %c0_375] : memref<224x28xf32, #tpu.memory_space<vmem>>, vector<8x28xf32>
    %398 = vector.extract_strided_slice %360 {offsets = [72, 0], sizes = [8, 28], strides = [1, 1]} : vector<112x28xf32> to vector<8x28xf32>
    %399 = arith.addf %397, %398 : vector<8x28xf32>
    %c160_376 = arith.constant 160 : index
    %c0_377 = arith.constant 0 : index
    %400 = vector.load %arg11[%c160_376, %c0_377] : memref<224x28xf32, #tpu.memory_space<vmem>>, vector<8x28xf32>
    tpu.vector_store %arg11[%c160_376, %c0_377], %399 {strides = array<i32>} : memref<224x28xf32, #tpu.memory_space<vmem>>, vector<8x28xf32>,
    %c176_378 = arith.constant 176 : index
    %c0_379 = arith.constant 0 : index
    %401 = vector.load %arg11[%c176_378, %c0_379] : memref<224x28xf32, #tpu.memory_space<vmem>>, vector<8x28xf32>
    %402 = vector.extract_strided_slice %360 {offsets = [80, 0], sizes = [8, 28], strides = [1, 1]} : vector<112x28xf32> to vector<8x28xf32>
    %403 = arith.addf %401, %402 : vector<8x28xf32>
    %c176_380 = arith.constant 176 : index
    %c0_381 = arith.constant 0 : index
    %404 = vector.load %arg11[%c176_380, %c0_381] : memref<224x28xf32, #tpu.memory_space<vmem>>, vector<8x28xf32>
    tpu.vector_store %arg11[%c176_380, %c0_381], %403 {strides = array<i32>} : memref<224x28xf32, #tpu.memory_space<vmem>>, vector<8x28xf32>,
    %c192_382 = arith.constant 192 : index
    %c0_383 = arith.constant 0 : index
    %405 = vector.load %arg11[%c192_382, %c0_383] : memref<224x28xf32, #tpu.memory_space<vmem>>, vector<8x28xf32>
    %406 = vector.extract_strided_slice %360 {offsets = [88, 0], sizes = [8, 28], strides = [1, 1]} : vector<112x28xf32> to vector<8x28xf32>
    %407 = arith.addf %405, %406 : vector<8x28xf32>
    %c192_384 = arith.constant 192 : index
    %c0_385 = arith.constant 0 : index
    %408 = vector.load %arg11[%c192_384, %c0_385] : memref<224x28xf32, #tpu.memory_space<vmem>>, vector<8x28xf32>
    tpu.vector_store %arg11[%c192_384, %c0_385], %407 {strides = array<i32>} : memref<224x28xf32, #tpu.memory_space<vmem>>, vector<8x28xf32>,
    %c208_386 = arith.constant 208 : index
    %c0_387 = arith.constant 0 : index
    %409 = vector.load %arg11[%c208_386, %c0_387] : memref<224x28xf32, #tpu.memory_space<vmem>>, vector<8x28xf32>
    %410 = vector.extract_strided_slice %360 {offsets = [96, 0], sizes = [8, 28], strides = [1, 1]} : vector<112x28xf32> to vector<8x28xf32>
    %411 = arith.addf %409, %410 : vector<8x28xf32>
    %c208_388 = arith.constant 208 : index
    %c0_389 = arith.constant 0 : index
    %412 = vector.load %arg11[%c208_388, %c0_389] : memref<224x28xf32, #tpu.memory_space<vmem>>, vector<8x28xf32>
    tpu.vector_store %arg11[%c208_388, %c0_389], %411 {strides = array<i32>} : memref<224x28xf32, #tpu.memory_space<vmem>>, vector<8x28xf32>,
    %c0_390 = arith.constant 0 : index
    %c0_391 = arith.constant 0 : index
    %413 = vector.load %arg11[%c0_390, %c0_391] : memref<224x28xf32, #tpu.memory_space<vmem>>, vector<8x28xf32>
    %cst_392 = arith.constant 0.000000e+00 : f32
    %414 = vector.broadcast %cst_392 : f32 to vector<8x28xf32>
    %415 = arith.subf %414, %413 : vector<8x28xf32>
    %416 = math.exp %415 : vector<8x28xf32>
    %cst_393 = arith.constant 1.000000e+00 : f32
    %417 = vector.broadcast %cst_393 : f32 to vector<8x28xf32>
    %418 = arith.addf %417, %416 : vector<8x28xf32>
    %cst_394 = arith.constant 1.000000e+00 : f32
    %419 = vector.broadcast %cst_394 : f32 to vector<8x28xf32>
    %420 = arith.divf %419, %418 : vector<8x28xf32>
    %c0_395 = arith.constant 0 : index
    %c0_396 = arith.constant 0 : index
    %421 = vector.load %arg8[%c0_395, %c0_396] : memref<8x784xf32, #tpu.memory_space<vmem>>, vector<8x28xf32>
    tpu.vector_store %arg8[%c0_395, %c0_396], %420 {strides = array<i32>} : memref<8x784xf32, #tpu.memory_space<vmem>>, vector<8x28xf32>,
    %c8_397 = arith.constant 8 : index
    %c0_398 = arith.constant 0 : index
    %422 = vector.load %arg11[%c8_397, %c0_398] : memref<224x28xf32, #tpu.memory_space<vmem>>, vector<8x28xf32>
    %cst_399 = arith.constant 0.000000e+00 : f32
    %423 = vector.broadcast %cst_399 : f32 to vector<8x28xf32>
    %424 = arith.subf %423, %422 : vector<8x28xf32>
    %425 = math.exp %424 : vector<8x28xf32>
    %cst_400 = arith.constant 1.000000e+00 : f32
    %426 = vector.broadcast %cst_400 : f32 to vector<8x28xf32>
    %427 = arith.addf %426, %425 : vector<8x28xf32>
    %cst_401 = arith.constant 1.000000e+00 : f32
    %428 = vector.broadcast %cst_401 : f32 to vector<8x28xf32>
    %429 = arith.divf %428, %427 : vector<8x28xf32>
    %c0_402 = arith.constant 0 : index
    %c28 = arith.constant 28 : index
    %430 = vector.load %arg8[%c0_402, %c28] : memref<8x784xf32, #tpu.memory_space<vmem>>, vector<8x28xf32>
    tpu.vector_store %arg8[%c0_402, %c28], %429 {strides = array<i32>} : memref<8x784xf32, #tpu.memory_space<vmem>>, vector<8x28xf32>,
    %c16_403 = arith.constant 16 : index
    %c0_404 = arith.constant 0 : index
    %431 = vector.load %arg11[%c16_403, %c0_404] : memref<224x28xf32, #tpu.memory_space<vmem>>, vector<8x28xf32>
    %cst_405 = arith.constant 0.000000e+00 : f32
    %432 = vector.broadcast %cst_405 : f32 to vector<8x28xf32>
    %433 = arith.subf %432, %431 : vector<8x28xf32>
    %434 = math.exp %433 : vector<8x28xf32>
    %cst_406 = arith.constant 1.000000e+00 : f32
    %435 = vector.broadcast %cst_406 : f32 to vector<8x28xf32>
    %436 = arith.addf %435, %434 : vector<8x28xf32>
    %cst_407 = arith.constant 1.000000e+00 : f32
    %437 = vector.broadcast %cst_407 : f32 to vector<8x28xf32>
    %438 = arith.divf %437, %436 : vector<8x28xf32>
    %c0_408 = arith.constant 0 : index
    %c56_409 = arith.constant 56 : index
    %439 = vector.load %arg8[%c0_408, %c56_409] : memref<8x784xf32, #tpu.memory_space<vmem>>, vector<8x28xf32>
    tpu.vector_store %arg8[%c0_408, %c56_409], %438 {strides = array<i32>} : memref<8x784xf32, #tpu.memory_space<vmem>>, vector<8x28xf32>,
    %c24_410 = arith.constant 24 : index
    %c0_411 = arith.constant 0 : index
    %440 = vector.load %arg11[%c24_410, %c0_411] : memref<224x28xf32, #tpu.memory_space<vmem>>, vector<8x28xf32>
    %cst_412 = arith.constant 0.000000e+00 : f32
    %441 = vector.broadcast %cst_412 : f32 to vector<8x28xf32>
    %442 = arith.subf %441, %440 : vector<8x28xf32>
    %443 = math.exp %442 : vector<8x28xf32>
    %cst_413 = arith.constant 1.000000e+00 : f32
    %444 = vector.broadcast %cst_413 : f32 to vector<8x28xf32>
    %445 = arith.addf %444, %443 : vector<8x28xf32>
    %cst_414 = arith.constant 1.000000e+00 : f32
    %446 = vector.broadcast %cst_414 : f32 to vector<8x28xf32>
    %447 = arith.divf %446, %445 : vector<8x28xf32>
    %c0_415 = arith.constant 0 : index
    %c84 = arith.constant 84 : index
    %448 = vector.load %arg8[%c0_415, %c84] : memref<8x784xf32, #tpu.memory_space<vmem>>, vector<8x28xf32>
    tpu.vector_store %arg8[%c0_415, %c84], %447 {strides = array<i32>} : memref<8x784xf32, #tpu.memory_space<vmem>>, vector<8x28xf32>,
    %c32_416 = arith.constant 32 : index
    %c0_417 = arith.constant 0 : index
    %449 = vector.load %arg11[%c32_416, %c0_417] : memref<224x28xf32, #tpu.memory_space<vmem>>, vector<8x28xf32>
    %cst_418 = arith.constant 0.000000e+00 : f32
    %450 = vector.broadcast %cst_418 : f32 to vector<8x28xf32>
    %451 = arith.subf %450, %449 : vector<8x28xf32>
    %452 = math.exp %451 : vector<8x28xf32>
    %cst_419 = arith.constant 1.000000e+00 : f32
    %453 = vector.broadcast %cst_419 : f32 to vector<8x28xf32>
    %454 = arith.addf %453, %452 : vector<8x28xf32>
    %cst_420 = arith.constant 1.000000e+00 : f32
    %455 = vector.broadcast %cst_420 : f32 to vector<8x28xf32>
    %456 = arith.divf %455, %454 : vector<8x28xf32>
    %c0_421 = arith.constant 0 : index
    %c112_422 = arith.constant 112 : index
    %457 = vector.load %arg8[%c0_421, %c112_422] : memref<8x784xf32, #tpu.memory_space<vmem>>, vector<8x28xf32>
    tpu.vector_store %arg8[%c0_421, %c112_422], %456 {strides = array<i32>} : memref<8x784xf32, #tpu.memory_space<vmem>>, vector<8x28xf32>,
    %c40_423 = arith.constant 40 : index
    %c0_424 = arith.constant 0 : index
    %458 = vector.load %arg11[%c40_423, %c0_424] : memref<224x28xf32, #tpu.memory_space<vmem>>, vector<8x28xf32>
    %cst_425 = arith.constant 0.000000e+00 : f32
    %459 = vector.broadcast %cst_425 : f32 to vector<8x28xf32>
    %460 = arith.subf %459, %458 : vector<8x28xf32>
    %461 = math.exp %460 : vector<8x28xf32>
    %cst_426 = arith.constant 1.000000e+00 : f32
    %462 = vector.broadcast %cst_426 : f32 to vector<8x28xf32>
    %463 = arith.addf %462, %461 : vector<8x28xf32>
    %cst_427 = arith.constant 1.000000e+00 : f32
    %464 = vector.broadcast %cst_427 : f32 to vector<8x28xf32>
    %465 = arith.divf %464, %463 : vector<8x28xf32>
    %c0_428 = arith.constant 0 : index
    %c140 = arith.constant 140 : index
    %466 = vector.load %arg8[%c0_428, %c140] : memref<8x784xf32, #tpu.memory_space<vmem>>, vector<8x28xf32>
    tpu.vector_store %arg8[%c0_428, %c140], %465 {strides = array<i32>} : memref<8x784xf32, #tpu.memory_space<vmem>>, vector<8x28xf32>,
    %c48_429 = arith.constant 48 : index
    %c0_430 = arith.constant 0 : index
    %467 = vector.load %arg11[%c48_429, %c0_430] : memref<224x28xf32, #tpu.memory_space<vmem>>, vector<8x28xf32>
    %cst_431 = arith.constant 0.000000e+00 : f32
    %468 = vector.broadcast %cst_431 : f32 to vector<8x28xf32>
    %469 = arith.subf %468, %467 : vector<8x28xf32>
    %470 = math.exp %469 : vector<8x28xf32>
    %cst_432 = arith.constant 1.000000e+00 : f32
    %471 = vector.broadcast %cst_432 : f32 to vector<8x28xf32>
    %472 = arith.addf %471, %470 : vector<8x28xf32>
    %cst_433 = arith.constant 1.000000e+00 : f32
    %473 = vector.broadcast %cst_433 : f32 to vector<8x28xf32>
    %474 = arith.divf %473, %472 : vector<8x28xf32>
    %c0_434 = arith.constant 0 : index
    %c168_435 = arith.constant 168 : index
    %475 = vector.load %arg8[%c0_434, %c168_435] : memref<8x784xf32, #tpu.memory_space<vmem>>, vector<8x28xf32>
    tpu.vector_store %arg8[%c0_434, %c168_435], %474 {strides = array<i32>} : memref<8x784xf32, #tpu.memory_space<vmem>>, vector<8x28xf32>,
    %c56_436 = arith.constant 56 : index
    %c0_437 = arith.constant 0 : index
    %476 = vector.load %arg11[%c56_436, %c0_437] : memref<224x28xf32, #tpu.memory_space<vmem>>, vector<8x28xf32>
    %cst_438 = arith.constant 0.000000e+00 : f32
    %477 = vector.broadcast %cst_438 : f32 to vector<8x28xf32>
    %478 = arith.subf %477, %476 : vector<8x28xf32>
    %479 = math.exp %478 : vector<8x28xf32>
    %cst_439 = arith.constant 1.000000e+00 : f32
    %480 = vector.broadcast %cst_439 : f32 to vector<8x28xf32>
    %481 = arith.addf %480, %479 : vector<8x28xf32>
    %cst_440 = arith.constant 1.000000e+00 : f32
    %482 = vector.broadcast %cst_440 : f32 to vector<8x28xf32>
    %483 = arith.divf %482, %481 : vector<8x28xf32>
    %c0_441 = arith.constant 0 : index
    %c196 = arith.constant 196 : index
    %484 = vector.load %arg8[%c0_441, %c196] : memref<8x784xf32, #tpu.memory_space<vmem>>, vector<8x28xf32>
    tpu.vector_store %arg8[%c0_441, %c196], %483 {strides = array<i32>} : memref<8x784xf32, #tpu.memory_space<vmem>>, vector<8x28xf32>,
    %c64_442 = arith.constant 64 : index
    %c0_443 = arith.constant 0 : index
    %485 = vector.load %arg11[%c64_442, %c0_443] : memref<224x28xf32, #tpu.memory_space<vmem>>, vector<8x28xf32>
    %cst_444 = arith.constant 0.000000e+00 : f32
    %486 = vector.broadcast %cst_444 : f32 to vector<8x28xf32>
    %487 = arith.subf %486, %485 : vector<8x28xf32>
    %488 = math.exp %487 : vector<8x28xf32>
    %cst_445 = arith.constant 1.000000e+00 : f32
    %489 = vector.broadcast %cst_445 : f32 to vector<8x28xf32>
    %490 = arith.addf %489, %488 : vector<8x28xf32>
    %cst_446 = arith.constant 1.000000e+00 : f32
    %491 = vector.broadcast %cst_446 : f32 to vector<8x28xf32>
    %492 = arith.divf %491, %490 : vector<8x28xf32>
    %c0_447 = arith.constant 0 : index
    %c224 = arith.constant 224 : index
    %493 = vector.load %arg8[%c0_447, %c224] : memref<8x784xf32, #tpu.memory_space<vmem>>, vector<8x28xf32>
    tpu.vector_store %arg8[%c0_447, %c224], %492 {strides = array<i32>} : memref<8x784xf32, #tpu.memory_space<vmem>>, vector<8x28xf32>,
    %c72_448 = arith.constant 72 : index
    %c0_449 = arith.constant 0 : index
    %494 = vector.load %arg11[%c72_448, %c0_449] : memref<224x28xf32, #tpu.memory_space<vmem>>, vector<8x28xf32>
    %cst_450 = arith.constant 0.000000e+00 : f32
    %495 = vector.broadcast %cst_450 : f32 to vector<8x28xf32>
    %496 = arith.subf %495, %494 : vector<8x28xf32>
    %497 = math.exp %496 : vector<8x28xf32>
    %cst_451 = arith.constant 1.000000e+00 : f32
    %498 = vector.broadcast %cst_451 : f32 to vector<8x28xf32>
    %499 = arith.addf %498, %497 : vector<8x28xf32>
    %cst_452 = arith.constant 1.000000e+00 : f32
    %500 = vector.broadcast %cst_452 : f32 to vector<8x28xf32>
    %501 = arith.divf %500, %499 : vector<8x28xf32>
    %c0_453 = arith.constant 0 : index
    %c252 = arith.constant 252 : index
    %502 = vector.load %arg8[%c0_453, %c252] : memref<8x784xf32, #tpu.memory_space<vmem>>, vector<8x28xf32>
    tpu.vector_store %arg8[%c0_453, %c252], %501 {strides = array<i32>} : memref<8x784xf32, #tpu.memory_space<vmem>>, vector<8x28xf32>,
    %c80_454 = arith.constant 80 : index
    %c0_455 = arith.constant 0 : index
    %503 = vector.load %arg11[%c80_454, %c0_455] : memref<224x28xf32, #tpu.memory_space<vmem>>, vector<8x28xf32>
    %cst_456 = arith.constant 0.000000e+00 : f32
    %504 = vector.broadcast %cst_456 : f32 to vector<8x28xf32>
    %505 = arith.subf %504, %503 : vector<8x28xf32>
    %506 = math.exp %505 : vector<8x28xf32>
    %cst_457 = arith.constant 1.000000e+00 : f32
    %507 = vector.broadcast %cst_457 : f32 to vector<8x28xf32>
    %508 = arith.addf %507, %506 : vector<8x28xf32>
    %cst_458 = arith.constant 1.000000e+00 : f32
    %509 = vector.broadcast %cst_458 : f32 to vector<8x28xf32>
    %510 = arith.divf %509, %508 : vector<8x28xf32>
    %c0_459 = arith.constant 0 : index
    %c280 = arith.constant 280 : index
    %511 = vector.load %arg8[%c0_459, %c280] : memref<8x784xf32, #tpu.memory_space<vmem>>, vector<8x28xf32>
    tpu.vector_store %arg8[%c0_459, %c280], %510 {strides = array<i32>} : memref<8x784xf32, #tpu.memory_space<vmem>>, vector<8x28xf32>,
    %c88_460 = arith.constant 88 : index
    %c0_461 = arith.constant 0 : index
    %512 = vector.load %arg11[%c88_460, %c0_461] : memref<224x28xf32, #tpu.memory_space<vmem>>, vector<8x28xf32>
    %cst_462 = arith.constant 0.000000e+00 : f32
    %513 = vector.broadcast %cst_462 : f32 to vector<8x28xf32>
    %514 = arith.subf %513, %512 : vector<8x28xf32>
    %515 = math.exp %514 : vector<8x28xf32>
    %cst_463 = arith.constant 1.000000e+00 : f32
    %516 = vector.broadcast %cst_463 : f32 to vector<8x28xf32>
    %517 = arith.addf %516, %515 : vector<8x28xf32>
    %cst_464 = arith.constant 1.000000e+00 : f32
    %518 = vector.broadcast %cst_464 : f32 to vector<8x28xf32>
    %519 = arith.divf %518, %517 : vector<8x28xf32>
    %c0_465 = arith.constant 0 : index
    %c308 = arith.constant 308 : index
    %520 = vector.load %arg8[%c0_465, %c308] : memref<8x784xf32, #tpu.memory_space<vmem>>, vector<8x28xf32>
    tpu.vector_store %arg8[%c0_465, %c308], %519 {strides = array<i32>} : memref<8x784xf32, #tpu.memory_space<vmem>>, vector<8x28xf32>,
    %c96_466 = arith.constant 96 : index
    %c0_467 = arith.constant 0 : index
    %521 = vector.load %arg11[%c96_466, %c0_467] : memref<224x28xf32, #tpu.memory_space<vmem>>, vector<8x28xf32>
    %cst_468 = arith.constant 0.000000e+00 : f32
    %522 = vector.broadcast %cst_468 : f32 to vector<8x28xf32>
    %523 = arith.subf %522, %521 : vector<8x28xf32>
    %524 = math.exp %523 : vector<8x28xf32>
    %cst_469 = arith.constant 1.000000e+00 : f32
    %525 = vector.broadcast %cst_469 : f32 to vector<8x28xf32>
    %526 = arith.addf %525, %524 : vector<8x28xf32>
    %cst_470 = arith.constant 1.000000e+00 : f32
    %527 = vector.broadcast %cst_470 : f32 to vector<8x28xf32>
    %528 = arith.divf %527, %526 : vector<8x28xf32>
    %c0_471 = arith.constant 0 : index
    %c336 = arith.constant 336 : index
    %529 = vector.load %arg8[%c0_471, %c336] : memref<8x784xf32, #tpu.memory_space<vmem>>, vector<8x28xf32>
    tpu.vector_store %arg8[%c0_471, %c336], %528 {strides = array<i32>} : memref<8x784xf32, #tpu.memory_space<vmem>>, vector<8x28xf32>,
    %c104_472 = arith.constant 104 : index
    %c0_473 = arith.constant 0 : index
    %530 = vector.load %arg11[%c104_472, %c0_473] : memref<224x28xf32, #tpu.memory_space<vmem>>, vector<8x28xf32>
    %cst_474 = arith.constant 0.000000e+00 : f32
    %531 = vector.broadcast %cst_474 : f32 to vector<8x28xf32>
    %532 = arith.subf %531, %530 : vector<8x28xf32>
    %533 = math.exp %532 : vector<8x28xf32>
    %cst_475 = arith.constant 1.000000e+00 : f32
    %534 = vector.broadcast %cst_475 : f32 to vector<8x28xf32>
    %535 = arith.addf %534, %533 : vector<8x28xf32>
    %cst_476 = arith.constant 1.000000e+00 : f32
    %536 = vector.broadcast %cst_476 : f32 to vector<8x28xf32>
    %537 = arith.divf %536, %535 : vector<8x28xf32>
    %c0_477 = arith.constant 0 : index
    %c364 = arith.constant 364 : index
    %538 = vector.load %arg8[%c0_477, %c364] : memref<8x784xf32, #tpu.memory_space<vmem>>, vector<8x28xf32>
    tpu.vector_store %arg8[%c0_477, %c364], %537 {strides = array<i32>} : memref<8x784xf32, #tpu.memory_space<vmem>>, vector<8x28xf32>,
    %c112_478 = arith.constant 112 : index
    %c0_479 = arith.constant 0 : index
    %539 = vector.load %arg11[%c112_478, %c0_479] : memref<224x28xf32, #tpu.memory_space<vmem>>, vector<8x28xf32>
    %cst_480 = arith.constant 0.000000e+00 : f32
    %540 = vector.broadcast %cst_480 : f32 to vector<8x28xf32>
    %541 = arith.subf %540, %539 : vector<8x28xf32>
    %542 = math.exp %541 : vector<8x28xf32>
    %cst_481 = arith.constant 1.000000e+00 : f32
    %543 = vector.broadcast %cst_481 : f32 to vector<8x28xf32>
    %544 = arith.addf %543, %542 : vector<8x28xf32>
    %cst_482 = arith.constant 1.000000e+00 : f32
    %545 = vector.broadcast %cst_482 : f32 to vector<8x28xf32>
    %546 = arith.divf %545, %544 : vector<8x28xf32>
    %c0_483 = arith.constant 0 : index
    %c392 = arith.constant 392 : index
    %547 = vector.load %arg8[%c0_483, %c392] : memref<8x784xf32, #tpu.memory_space<vmem>>, vector<8x28xf32>
    tpu.vector_store %arg8[%c0_483, %c392], %546 {strides = array<i32>} : memref<8x784xf32, #tpu.memory_space<vmem>>, vector<8x28xf32>,
    %c120_484 = arith.constant 120 : index
    %c0_485 = arith.constant 0 : index
    %548 = vector.load %arg11[%c120_484, %c0_485] : memref<224x28xf32, #tpu.memory_space<vmem>>, vector<8x28xf32>
    %cst_486 = arith.constant 0.000000e+00 : f32
    %549 = vector.broadcast %cst_486 : f32 to vector<8x28xf32>
    %550 = arith.subf %549, %548 : vector<8x28xf32>
    %551 = math.exp %550 : vector<8x28xf32>
    %cst_487 = arith.constant 1.000000e+00 : f32
    %552 = vector.broadcast %cst_487 : f32 to vector<8x28xf32>
    %553 = arith.addf %552, %551 : vector<8x28xf32>
    %cst_488 = arith.constant 1.000000e+00 : f32
    %554 = vector.broadcast %cst_488 : f32 to vector<8x28xf32>
    %555 = arith.divf %554, %553 : vector<8x28xf32>
    %c0_489 = arith.constant 0 : index
    %c420 = arith.constant 420 : index
    %556 = vector.load %arg8[%c0_489, %c420] : memref<8x784xf32, #tpu.memory_space<vmem>>, vector<8x28xf32>
    tpu.vector_store %arg8[%c0_489, %c420], %555 {strides = array<i32>} : memref<8x784xf32, #tpu.memory_space<vmem>>, vector<8x28xf32>,
    %c128_490 = arith.constant 128 : index
    %c0_491 = arith.constant 0 : index
    %557 = vector.load %arg11[%c128_490, %c0_491] : memref<224x28xf32, #tpu.memory_space<vmem>>, vector<8x28xf32>
    %cst_492 = arith.constant 0.000000e+00 : f32
    %558 = vector.broadcast %cst_492 : f32 to vector<8x28xf32>
    %559 = arith.subf %558, %557 : vector<8x28xf32>
    %560 = math.exp %559 : vector<8x28xf32>
    %cst_493 = arith.constant 1.000000e+00 : f32
    %561 = vector.broadcast %cst_493 : f32 to vector<8x28xf32>
    %562 = arith.addf %561, %560 : vector<8x28xf32>
    %cst_494 = arith.constant 1.000000e+00 : f32
    %563 = vector.broadcast %cst_494 : f32 to vector<8x28xf32>
    %564 = arith.divf %563, %562 : vector<8x28xf32>
    %c0_495 = arith.constant 0 : index
    %c448 = arith.constant 448 : index
    %565 = vector.load %arg8[%c0_495, %c448] : memref<8x784xf32, #tpu.memory_space<vmem>>, vector<8x28xf32>
    tpu.vector_store %arg8[%c0_495, %c448], %564 {strides = array<i32>} : memref<8x784xf32, #tpu.memory_space<vmem>>, vector<8x28xf32>,
    %c136_496 = arith.constant 136 : index
    %c0_497 = arith.constant 0 : index
    %566 = vector.load %arg11[%c136_496, %c0_497] : memref<224x28xf32, #tpu.memory_space<vmem>>, vector<8x28xf32>
    %cst_498 = arith.constant 0.000000e+00 : f32
    %567 = vector.broadcast %cst_498 : f32 to vector<8x28xf32>
    %568 = arith.subf %567, %566 : vector<8x28xf32>
    %569 = math.exp %568 : vector<8x28xf32>
    %cst_499 = arith.constant 1.000000e+00 : f32
    %570 = vector.broadcast %cst_499 : f32 to vector<8x28xf32>
    %571 = arith.addf %570, %569 : vector<8x28xf32>
    %cst_500 = arith.constant 1.000000e+00 : f32
    %572 = vector.broadcast %cst_500 : f32 to vector<8x28xf32>
    %573 = arith.divf %572, %571 : vector<8x28xf32>
    %c0_501 = arith.constant 0 : index
    %c476 = arith.constant 476 : index
    %574 = vector.load %arg8[%c0_501, %c476] : memref<8x784xf32, #tpu.memory_space<vmem>>, vector<8x28xf32>
    tpu.vector_store %arg8[%c0_501, %c476], %573 {strides = array<i32>} : memref<8x784xf32, #tpu.memory_space<vmem>>, vector<8x28xf32>,
    %c144_502 = arith.constant 144 : index
    %c0_503 = arith.constant 0 : index
    %575 = vector.load %arg11[%c144_502, %c0_503] : memref<224x28xf32, #tpu.memory_space<vmem>>, vector<8x28xf32>
    %cst_504 = arith.constant 0.000000e+00 : f32
    %576 = vector.broadcast %cst_504 : f32 to vector<8x28xf32>
    %577 = arith.subf %576, %575 : vector<8x28xf32>
    %578 = math.exp %577 : vector<8x28xf32>
    %cst_505 = arith.constant 1.000000e+00 : f32
    %579 = vector.broadcast %cst_505 : f32 to vector<8x28xf32>
    %580 = arith.addf %579, %578 : vector<8x28xf32>
    %cst_506 = arith.constant 1.000000e+00 : f32
    %581 = vector.broadcast %cst_506 : f32 to vector<8x28xf32>
    %582 = arith.divf %581, %580 : vector<8x28xf32>
    %c0_507 = arith.constant 0 : index
    %c504 = arith.constant 504 : index
    %583 = vector.load %arg8[%c0_507, %c504] : memref<8x784xf32, #tpu.memory_space<vmem>>, vector<8x28xf32>
    tpu.vector_store %arg8[%c0_507, %c504], %582 {strides = array<i32>} : memref<8x784xf32, #tpu.memory_space<vmem>>, vector<8x28xf32>,
    %c152_508 = arith.constant 152 : index
    %c0_509 = arith.constant 0 : index
    %584 = vector.load %arg11[%c152_508, %c0_509] : memref<224x28xf32, #tpu.memory_space<vmem>>, vector<8x28xf32>
    %cst_510 = arith.constant 0.000000e+00 : f32
    %585 = vector.broadcast %cst_510 : f32 to vector<8x28xf32>
    %586 = arith.subf %585, %584 : vector<8x28xf32>
    %587 = math.exp %586 : vector<8x28xf32>
    %cst_511 = arith.constant 1.000000e+00 : f32
    %588 = vector.broadcast %cst_511 : f32 to vector<8x28xf32>
    %589 = arith.addf %588, %587 : vector<8x28xf32>
    %cst_512 = arith.constant 1.000000e+00 : f32
    %590 = vector.broadcast %cst_512 : f32 to vector<8x28xf32>
    %591 = arith.divf %590, %589 : vector<8x28xf32>
    %c0_513 = arith.constant 0 : index
    %c532 = arith.constant 532 : index
    %592 = vector.load %arg8[%c0_513, %c532] : memref<8x784xf32, #tpu.memory_space<vmem>>, vector<8x28xf32>
    tpu.vector_store %arg8[%c0_513, %c532], %591 {strides = array<i32>} : memref<8x784xf32, #tpu.memory_space<vmem>>, vector<8x28xf32>,
    %c160_514 = arith.constant 160 : index
    %c0_515 = arith.constant 0 : index
    %593 = vector.load %arg11[%c160_514, %c0_515] : memref<224x28xf32, #tpu.memory_space<vmem>>, vector<8x28xf32>
    %cst_516 = arith.constant 0.000000e+00 : f32
    %594 = vector.broadcast %cst_516 : f32 to vector<8x28xf32>
    %595 = arith.subf %594, %593 : vector<8x28xf32>
    %596 = math.exp %595 : vector<8x28xf32>
    %cst_517 = arith.constant 1.000000e+00 : f32
    %597 = vector.broadcast %cst_517 : f32 to vector<8x28xf32>
    %598 = arith.addf %597, %596 : vector<8x28xf32>
    %cst_518 = arith.constant 1.000000e+00 : f32
    %599 = vector.broadcast %cst_518 : f32 to vector<8x28xf32>
    %600 = arith.divf %599, %598 : vector<8x28xf32>
    %c0_519 = arith.constant 0 : index
    %c560 = arith.constant 560 : index
    %601 = vector.load %arg8[%c0_519, %c560] : memref<8x784xf32, #tpu.memory_space<vmem>>, vector<8x28xf32>
    tpu.vector_store %arg8[%c0_519, %c560], %600 {strides = array<i32>} : memref<8x784xf32, #tpu.memory_space<vmem>>, vector<8x28xf32>,
    %c168_520 = arith.constant 168 : index
    %c0_521 = arith.constant 0 : index
    %602 = vector.load %arg11[%c168_520, %c0_521] : memref<224x28xf32, #tpu.memory_space<vmem>>, vector<8x28xf32>
    %cst_522 = arith.constant 0.000000e+00 : f32
    %603 = vector.broadcast %cst_522 : f32 to vector<8x28xf32>
    %604 = arith.subf %603, %602 : vector<8x28xf32>
    %605 = math.exp %604 : vector<8x28xf32>
    %cst_523 = arith.constant 1.000000e+00 : f32
    %606 = vector.broadcast %cst_523 : f32 to vector<8x28xf32>
    %607 = arith.addf %606, %605 : vector<8x28xf32>
    %cst_524 = arith.constant 1.000000e+00 : f32
    %608 = vector.broadcast %cst_524 : f32 to vector<8x28xf32>
    %609 = arith.divf %608, %607 : vector<8x28xf32>
    %c0_525 = arith.constant 0 : index
    %c588 = arith.constant 588 : index
    %610 = vector.load %arg8[%c0_525, %c588] : memref<8x784xf32, #tpu.memory_space<vmem>>, vector<8x28xf32>
    tpu.vector_store %arg8[%c0_525, %c588], %609 {strides = array<i32>} : memref<8x784xf32, #tpu.memory_space<vmem>>, vector<8x28xf32>,
    %c176_526 = arith.constant 176 : index
    %c0_527 = arith.constant 0 : index
    %611 = vector.load %arg11[%c176_526, %c0_527] : memref<224x28xf32, #tpu.memory_space<vmem>>, vector<8x28xf32>
    %cst_528 = arith.constant 0.000000e+00 : f32
    %612 = vector.broadcast %cst_528 : f32 to vector<8x28xf32>
    %613 = arith.subf %612, %611 : vector<8x28xf32>
    %614 = math.exp %613 : vector<8x28xf32>
    %cst_529 = arith.constant 1.000000e+00 : f32
    %615 = vector.broadcast %cst_529 : f32 to vector<8x28xf32>
    %616 = arith.addf %615, %614 : vector<8x28xf32>
    %cst_530 = arith.constant 1.000000e+00 : f32
    %617 = vector.broadcast %cst_530 : f32 to vector<8x28xf32>
    %618 = arith.divf %617, %616 : vector<8x28xf32>
    %c0_531 = arith.constant 0 : index
    %c616 = arith.constant 616 : index
    %619 = vector.load %arg8[%c0_531, %c616] : memref<8x784xf32, #tpu.memory_space<vmem>>, vector<8x28xf32>
    tpu.vector_store %arg8[%c0_531, %c616], %618 {strides = array<i32>} : memref<8x784xf32, #tpu.memory_space<vmem>>, vector<8x28xf32>,
    %c184_532 = arith.constant 184 : index
    %c0_533 = arith.constant 0 : index
    %620 = vector.load %arg11[%c184_532, %c0_533] : memref<224x28xf32, #tpu.memory_space<vmem>>, vector<8x28xf32>
    %cst_534 = arith.constant 0.000000e+00 : f32
    %621 = vector.broadcast %cst_534 : f32 to vector<8x28xf32>
    %622 = arith.subf %621, %620 : vector<8x28xf32>
    %623 = math.exp %622 : vector<8x28xf32>
    %cst_535 = arith.constant 1.000000e+00 : f32
    %624 = vector.broadcast %cst_535 : f32 to vector<8x28xf32>
    %625 = arith.addf %624, %623 : vector<8x28xf32>
    %cst_536 = arith.constant 1.000000e+00 : f32
    %626 = vector.broadcast %cst_536 : f32 to vector<8x28xf32>
    %627 = arith.divf %626, %625 : vector<8x28xf32>
    %c0_537 = arith.constant 0 : index
    %c644 = arith.constant 644 : index
    %628 = vector.load %arg8[%c0_537, %c644] : memref<8x784xf32, #tpu.memory_space<vmem>>, vector<8x28xf32>
    tpu.vector_store %arg8[%c0_537, %c644], %627 {strides = array<i32>} : memref<8x784xf32, #tpu.memory_space<vmem>>, vector<8x28xf32>,
    %c192_538 = arith.constant 192 : index
    %c0_539 = arith.constant 0 : index
    %629 = vector.load %arg11[%c192_538, %c0_539] : memref<224x28xf32, #tpu.memory_space<vmem>>, vector<8x28xf32>
    %cst_540 = arith.constant 0.000000e+00 : f32
    %630 = vector.broadcast %cst_540 : f32 to vector<8x28xf32>
    %631 = arith.subf %630, %629 : vector<8x28xf32>
    %632 = math.exp %631 : vector<8x28xf32>
    %cst_541 = arith.constant 1.000000e+00 : f32
    %633 = vector.broadcast %cst_541 : f32 to vector<8x28xf32>
    %634 = arith.addf %633, %632 : vector<8x28xf32>
    %cst_542 = arith.constant 1.000000e+00 : f32
    %635 = vector.broadcast %cst_542 : f32 to vector<8x28xf32>
    %636 = arith.divf %635, %634 : vector<8x28xf32>
    %c0_543 = arith.constant 0 : index
    %c672 = arith.constant 672 : index
    %637 = vector.load %arg8[%c0_543, %c672] : memref<8x784xf32, #tpu.memory_space<vmem>>, vector<8x28xf32>
    tpu.vector_store %arg8[%c0_543, %c672], %636 {strides = array<i32>} : memref<8x784xf32, #tpu.memory_space<vmem>>, vector<8x28xf32>,
    %c200_544 = arith.constant 200 : index
    %c0_545 = arith.constant 0 : index
    %638 = vector.load %arg11[%c200_544, %c0_545] : memref<224x28xf32, #tpu.memory_space<vmem>>, vector<8x28xf32>
    %cst_546 = arith.constant 0.000000e+00 : f32
    %639 = vector.broadcast %cst_546 : f32 to vector<8x28xf32>
    %640 = arith.subf %639, %638 : vector<8x28xf32>
    %641 = math.exp %640 : vector<8x28xf32>
    %cst_547 = arith.constant 1.000000e+00 : f32
    %642 = vector.broadcast %cst_547 : f32 to vector<8x28xf32>
    %643 = arith.addf %642, %641 : vector<8x28xf32>
    %cst_548 = arith.constant 1.000000e+00 : f32
    %644 = vector.broadcast %cst_548 : f32 to vector<8x28xf32>
    %645 = arith.divf %644, %643 : vector<8x28xf32>
    %c0_549 = arith.constant 0 : index
    %c700 = arith.constant 700 : index
    %646 = vector.load %arg8[%c0_549, %c700] : memref<8x784xf32, #tpu.memory_space<vmem>>, vector<8x28xf32>
    tpu.vector_store %arg8[%c0_549, %c700], %645 {strides = array<i32>} : memref<8x784xf32, #tpu.memory_space<vmem>>, vector<8x28xf32>,
    %c208_550 = arith.constant 208 : index
    %c0_551 = arith.constant 0 : index
    %647 = vector.load %arg11[%c208_550, %c0_551] : memref<224x28xf32, #tpu.memory_space<vmem>>, vector<8x28xf32>
    %cst_552 = arith.constant 0.000000e+00 : f32
    %648 = vector.broadcast %cst_552 : f32 to vector<8x28xf32>
    %649 = arith.subf %648, %647 : vector<8x28xf32>
    %650 = math.exp %649 : vector<8x28xf32>
    %cst_553 = arith.constant 1.000000e+00 : f32
    %651 = vector.broadcast %cst_553 : f32 to vector<8x28xf32>
    %652 = arith.addf %651, %650 : vector<8x28xf32>
    %cst_554 = arith.constant 1.000000e+00 : f32
    %653 = vector.broadcast %cst_554 : f32 to vector<8x28xf32>
    %654 = arith.divf %653, %652 : vector<8x28xf32>
    %c0_555 = arith.constant 0 : index
    %c728 = arith.constant 728 : index
    %655 = vector.load %arg8[%c0_555, %c728] : memref<8x784xf32, #tpu.memory_space<vmem>>, vector<8x28xf32>
    tpu.vector_store %arg8[%c0_555, %c728], %654 {strides = array<i32>} : memref<8x784xf32, #tpu.memory_space<vmem>>, vector<8x28xf32>,
    %c216_556 = arith.constant 216 : index
    %c0_557 = arith.constant 0 : index
    %656 = vector.load %arg11[%c216_556, %c0_557] : memref<224x28xf32, #tpu.memory_space<vmem>>, vector<8x28xf32>
    %cst_558 = arith.constant 0.000000e+00 : f32
    %657 = vector.broadcast %cst_558 : f32 to vector<8x28xf32>
    %658 = arith.subf %657, %656 : vector<8x28xf32>
    %659 = math.exp %658 : vector<8x28xf32>
    %cst_559 = arith.constant 1.000000e+00 : f32
    %660 = vector.broadcast %cst_559 : f32 to vector<8x28xf32>
    %661 = arith.addf %660, %659 : vector<8x28xf32>
    %cst_560 = arith.constant 1.000000e+00 : f32
    %662 = vector.broadcast %cst_560 : f32 to vector<8x28xf32>
    %663 = arith.divf %662, %661 : vector<8x28xf32>
    %c0_561 = arith.constant 0 : index
    %c756 = arith.constant 756 : index
    %664 = vector.load %arg8[%c0_561, %c756] : memref<8x784xf32, #tpu.memory_space<vmem>>, vector<8x28xf32>
    tpu.vector_store %arg8[%c0_561, %c756], %663 {strides = array<i32>} : memref<8x784xf32, #tpu.memory_space<vmem>>, vector<8x28xf32>,
    return
  }
  func.func @transform_0(%arg0: i32) -> (i32, i32) {
    %c0_i32 = arith.constant 0 : i32
    %c0_i32_0 = arith.constant 0 : i32
    return %arg0, %c0_i32 : i32, i32
  }
  func.func @transform_1(%arg0: i32) -> (i32, i32, i32) {
    %c0_i32 = arith.constant 0 : i32
    %c0_i32_0 = arith.constant 0 : i32
    %c0_i32_1 = arith.constant 0 : i32
    %c0_i32_2 = arith.constant 0 : i32
    return %c0_i32, %c0_i32_0, %c0_i32_1 : i32, i32, i32
  }
  func.func @transform_2(%arg0: i32) -> (i32, i32, i32) {
    %c0_i32 = arith.constant 0 : i32
    %c0_i32_0 = arith.constant 0 : i32
    %c0_i32_1 = arith.constant 0 : i32
    %c0_i32_2 = arith.constant 0 : i32
    return %c0_i32, %c0_i32_0, %c0_i32_1 : i32, i32, i32
  }
  func.func @transform_3(%arg0: i32) -> (i32, i32, i32) {
    %c0_i32 = arith.constant 0 : i32
    %c0_i32_0 = arith.constant 0 : i32
    %c0_i32_1 = arith.constant 0 : i32
    %c0_i32_2 = arith.constant 0 : i32
    return %c0_i32, %c0_i32_0, %c0_i32_1 : i32, i32, i32
  }
  func.func @transform_4(%arg0: i32) -> (i32, i32) {
    %c0_i32 = arith.constant 0 : i32
    %c0_i32_0 = arith.constant 0 : i32
    %c0_i32_1 = arith.constant 0 : i32
    return %c0_i32, %c0_i32_0 : i32, i32
  }
  func.func @transform_5(%arg0: i32) -> (i32, i32, i32) {
    %c0_i32 = arith.constant 0 : i32
    %c0_i32_0 = arith.constant 0 : i32
    %c0_i32_1 = arith.constant 0 : i32
    %c0_i32_2 = arith.constant 0 : i32
    return %c0_i32, %c0_i32_0, %c0_i32_1 : i32, i32, i32
  }
  func.func @transform_6(%arg0: i32) -> (i32, i32) {
    %c0_i32 = arith.constant 0 : i32
    %c0_i32_0 = arith.constant 0 : i32
    %c0_i32_1 = arith.constant 0 : i32
    return %c0_i32, %c0_i32_0 : i32, i32
  }
  func.func @transform_7(%arg0: i32) -> (i32, i32) {
    %c0_i32 = arith.constant 0 : i32
    %c0_i32_0 = arith.constant 0 : i32
    return %arg0, %c0_i32 : i32, i32
  }
}

</mosaic_0001>

<bundles_post_ra>
// kernel: decoder_forward.1
= control target key start
LH: loop header
LB: loop body
LE: loop exit
PB: predicated region body
PF: predicated region fallthrough
CT: control target
= control target key end

     0   :  { %vm70_vm0 = vcmask 1043456   ;;  %v3421_v3 = vmov 0.0   ;;  %vm66_vm1 = vcmask 818176   ;;  %vm151_vm2 = vcmask 130048   ;;  %s3422_s23 = smov 28   ;;  %s3423_s24 = smov 56   ;;  %s5406_s1 = inlined_call_operand.vmem [shape: f32[6,100,144], index: 1, kind: input, shape index: {}]   ;;  %s5407_s0 = inlined_call_operand.vmem [shape: f32[8,100], index: 0, kind: input, shape index: {}]   ;;  %s5408_s3 = inlined_call_operand.vmem [shape: f32[4,144,168], index: 3, kind: input, shape index: {}]   ;;  %s5409_s4 = inlined_call_operand.vmem [shape: f32[1,168], index: 4, kind: input, shape index: {}]   ;;  %s5410_s2 = inlined_call_operand.vmem [shape: f32[6,1,144], index: 2, kind: input, shape index: {}]   ;;  %s5411_s5 = inlined_call_operand.vmem [shape: f32[4,168,28], index: 5, kind: input, shape index: {}]   ;;  %s5412_s6 = inlined_call_operand.vmem [shape: f32[1,28], index: 6, kind: input, shape index: {}]   ;;  %s5413_s7 = inlined_call_operand.vmem [shape: f32[8,784], index: 7, kind: output, shape index: {}]  }
   0x1   :  { %v53_v0 = vld [vmem:[%s5406_s1 + $0xc8] sm:$0xf]  ;;  %v52_v1 = vld [vmem:[%s5406_s1 + $0xc0] sm:$0xf]  ;;  %v51_v2 = vld [vmem:[%s5406_s1 + $0xb8] sm:$0xff]  ;;  %141 = vmatprep.mubr.f32.mxu0 %v3421_v3  ;;  %263 = vmatprep.mubr.f32.mxu1 %v3421_v3  ;;  %vm771_vm3 = vcmask 326656  }
   0x2   :  { %2875 = vmatprep.subr.msk.mxu0 %vm70_vm0, %v53_v0  ;;  %v2903_v4 = vld [vmem:[%s5406_s1 + $0x198] sm:$0xf]  ;;  %v50_v5 = vld [vmem:[%s5406_s1 + $0xb0] sm:$0xff]  ;;  %v49_v7 = vld [vmem:[%s5406_s1 + $0xa8] sm:$0xff]  ;;  %vm1615_vm4 = vcmask 228352   ;;  %s3425_s25 = smov 12  }
   0x3   :  { %v2902_v6 = vld [vmem:[%s5406_s1 + $0x190] sm:$0xf]  ;;  %2876 = vmatpush1.msk.msra.mxu0 %vm70_vm0, %v52_v1  ;;  %2905 = vmatprep.subr.msk.mxu1 %vm70_vm0, %v2903_v4  ;;  %v2901_v8 = vld [vmem:[%s5406_s1 + $0x188] sm:$0xff]  ;;  %v48_v9 = vld [vmem:[%s5406_s1 + $0xa0] sm:$0xff]  ;;  %s3426_s26 = smov 84   ;;  %s3427_s27 = smov 40  }
   0x4   :  { %85 = vmatprep.subr.mxu0 %v51_v2  ;;  %2906 = vmatpush1.msk.msra.mxu1 %vm70_vm0, %v2902_v6  ;;  %v2900_v10 = vld [vmem:[%s5406_s1 + $0x180] sm:$0xff]  ;;  %v2899_v11 = vld [vmem:[%s5406_s1 + $0x178] sm:$0xff]  ;;  %v2898_v13 = vld [vmem:[%s5406_s1 + $0x170] sm:$0xff]  ;;  %s3428_s28 = smov 68   ;;  %s3429_s29 = smov 124   ;;  %vm2520_vm5 = vcmask 457952  }
   0x5   :  { %86 = vmatpush1.msra.mxu0 %v50_v5  ;;  %207 = vmatprep.subr.mxu1 %v2901_v8  ;;  %v47_v12 = vld [vmem:[%s5406_s1 + $0x98] sm:$0xff]  ;;  %v46_v14 = vld [vmem:[%s5406_s1 + $0x90] sm:$0xff]  ;;  %v2897_v15 = vld [vmem:[%s5406_s1 + $0x168] sm:$0xff]  ;;  %s3430_s30 = smov 96   ;;  %s3431_s8 = smov 24   ;;  %vm2533_vm6 = vcmask 687552  }
   0x6   :  { %87 = vmatprep.subr.mxu0 %v49_v7  ;;  %208 = vmatpush1.msra.mxu1 %v2900_v10  ;;  %v45_v16 = vld [vmem:[%s5406_s1 + $0x88] sm:$0xff]  ;;  %v2896_v17 = vld [vmem:[%s5406_s1 + $0x160] sm:$0xff]  ;;  %v2895_v19 = vld [vmem:[%s5406_s1 + $0x158] sm:$0xff]  ;;  %s3433_s9 = smov 52   ;;  %s3434_s10 = smov 80   ;;  %vm2561_vm7 = vcmask 97280  }
   0x7   :  { %88 = vmatpush1.msra.mxu0 %v48_v9  ;;  %209 = vmatprep.subr.mxu1 %v2899_v11  ;;  %v44_v18 = vld [vmem:[%s5406_s1 + $0x80] sm:$0xff]  ;;  %v43_v20 = vld [vmem:[%s5406_s1 + $0x78] sm:$0xff]  ;;  %v2894_v21 = vld [vmem:[%s5406_s1 + $0x150] sm:$0xff]  ;;  %s3435_s11 = smov 36   ;;  %s3437_s12 = smov 64   ;;  %vm2574_vm8 = vcmask 326752  }
   0x8   :  { %89 = vmatprep.subr.mxu0 %v47_v12  ;;  %210 = vmatpush1.msra.mxu1 %v2898_v13  ;;  %v42_v22 = vld [vmem:[%s5406_s1 + $0x70] sm:$0xff]  ;;  %v2893_v23 = vld [vmem:[%s5406_s1 + $0x148] sm:$0xff]  ;;  %v2892_v25 = vld [vmem:[%s5406_s1 + $0x140] sm:$0xff]  ;;  %s3438_s13 = smov 120   ;;  %s3440_s14 = smov 104   ;;  %vm2546_vm9 = vcmask 917152  }
   0x9   :  { %90 = vmatpush1.msra.mxu0 %v46_v14  ;;  %211 = vmatprep.subr.mxu1 %v2897_v15  ;;  %v41_v24 = vld [vmem:[%s5406_s1 + $0x68] sm:$0xff]  ;;  %v40_v26 = vld [vmem:[%s5406_s1 + $0x60] sm:$0xff]  ;;  %v2891_v27 = vld [vmem:[%s5406_s1 + $0x138] sm:$0xff]  ;;  %s3441_s15 = smov 20   ;;  %s3442_s16 = smov 48   ;;  %vm2587_vm10 = vcmask 556352  }
   0xa   :  { %91 = vmatprep.subr.mxu0 %v45_v16  ;;  %212 = vmatpush1.msra.mxu1 %v2896_v17  ;;  %v39_v28 = vld [vmem:[%s5406_s1 + $0x58] sm:$0xff]  ;;  %v2890_v29 = vld [vmem:[%s5406_s1 + $0x130] sm:$0xff]  ;;  %v2889_v31 = vld [vmem:[%s5406_s1 + $0x128] sm:$0xff]  ;;  %s3443_s17 = smov 4   ;;  %s3444_s18 = smov 76   ;;  %vm2559_vm11 = vcmask 1048448  }
   0xb   :  { %92 = vmatpush1.msra.mxu0 %v44_v18  ;;  %213 = vmatprep.subr.mxu1 %v2895_v19  ;;  %v38_v30 = vld [vmem:[%s5406_s1 + $0x50] sm:$0xff]  ;;  %v37_v32 = vld [vmem:[%s5406_s1 + $0x48] sm:$0xff]  ;;  %v2888_v33 = vld [vmem:[%s5406_s1 + $0x120] sm:$0xff]  ;;  %s3445_s19 = smov 32   ;;  %s3446_s20 = smov 60   ;;  %vm2600_vm12 = vcmask 785952  }
   0xc   :  { %93 = vmatprep.subr.mxu0 %v43_v20  ;;  %214 = vmatpush1.msra.mxu1 %v2894_v21  ;;  %v36_v34 = vld [vmem:[%s5406_s1 + $0x40] sm:$0xff]  ;;  %v2887_v35 = vld [vmem:[%s5406_s1 + $0x118] sm:$0xff]  ;;  %v2886_v37 = vld [vmem:[%s5406_s1 + $0x110] sm:$0xff]  ;;  %s3447_s21 = smov 116   ;;  %vm2628_vm13 = vcmask 195584   ;;  %vm2613_vm14 = vcmask 1015552  }
   0xd   :  { %94 = vmatpush1.msra.mxu0 %v42_v22  ;;  %215 = vmatprep.subr.mxu1 %v2893_v23  ;;  %v35_v36 = vld [vmem:[%s5406_s1 + $0x38] sm:$0xff]  ;;  %v34_v38 = vld [vmem:[%s5406_s1 + $0x30] sm:$0xff]  ;;  %v2885_v39 = vld [vmem:[%s5406_s1 + $0x108] sm:$0xff]  ;;  %vm2626_vm15 = vcmask 1048544  }
   0xe   :  { %95 = vmatprep.subr.mxu0 %v41_v24  ;;  %216 = vmatpush1.msra.mxu1 %v2892_v25  ;;  %v33_v40 = vld [vmem:[%s5406_s1 + $0x28] sm:$0xff]  ;;  %v2884_v41 = vld [vmem:[%s5406_s1 + $0x100] sm:$0xff]  ;;  %v2883_v43 = vld [vmem:[%s5406_s1 + $0xf8] sm:$0xff] }
   0xf   :  { %96 = vmatpush1.msra.mxu0 %v40_v26  ;;  %217 = vmatprep.subr.mxu1 %v2891_v27  ;;  %v32_v42 = vld [vmem:[%s5406_s1 + $0x20] sm:$0xff]  ;;  %v31_v44 = vld [vmem:[%s5406_s1 + $0x18] sm:$0xff]  ;;  %v2882_v45 = vld [vmem:[%s5406_s1 + $0xf0] sm:$0xff] }
  0x10   :  { %97 = vmatprep.subr.mxu0 %v39_v28  ;;  %218 = vmatpush1.msra.mxu1 %v2890_v29  ;;  %v26_v46 = vld [vmem:[%s5407_s0] sm:$0xff]  ;;  %v30_v47 = vld [vmem:[%s5406_s1 + $0x10] sm:$0xff]  ;;  %v2881_v48 = vld [vmem:[%s5406_s1 + $0xe8] sm:$0xff]  ;;  %s3432_s0 = smov 8  }
  0x11   :  { %98 = vmatpush1.msra.mxu0 %v38_v30  ;;  %219 = vmatprep.subr.mxu1 %v2889_v31  ;;  %v29_v49 = vld [vmem:[%s5406_s1 + $0x8] sm:$0xff]  ;;  %v2880_v50 = vld [vmem:[%s5406_s1 + $0xe0] sm:$0xff]  ;;  %v3648_v52 = vmax.f32 %v26_v46, 0.0  ;;  %v2879_v53 = vld [vmem:[%s5406_s1 + $0xd8] sm:$0xff] }
  0x12   :  { %99 = vmatprep.subr.mxu0 %v37_v32  ;;  %220 = vmatpush1.msra.mxu1 %v2888_v33  ;;  %v28_v51 = vld [vmem:[%s5406_s1] sm:$0xff]  ;;  %v2933_v54 = vld [vmem:[%s5406_s1 + $0x268] sm:$0xf]  ;;  %v2878_v55 = vld [vmem:[%s5406_s1 + $0xd0] sm:$0xff] }
  0x13   :  { %100 = vmatpush1.msra.mxu0 %v36_v34  ;;  %221 = vmatprep.subr.mxu1 %v2887_v35  ;;  %v2932_v56 = vld [vmem:[%s5406_s1 + $0x260] sm:$0xf]  ;;  %v2931_v57 = vld [vmem:[%s5406_s1 + $0x258] sm:$0xff]  ;;  %v2930_v59 = vld [vmem:[%s5406_s1 + $0x250] sm:$0xff] }
  0x14   :  { %101 = vmatprep.subr.mxu0 %v35_v36  ;;  %222 = vmatpush1.msra.mxu1 %v2886_v37  ;;  %v2963_v58 = vld [vmem:[%s5406_s1 + $0x338] sm:$0xf]  ;;  %v2962_v60 = vld [vmem:[%s5406_s1 + $0x330] sm:$0xf]  ;;  %v2929_v61 = vld [vmem:[%s5406_s1 + $0x248] sm:$0xff] }
  0x15   :  { %102 = vmatpush1.msra.mxu0 %v34_v38  ;;  %223 = vmatprep.subr.mxu1 %v2885_v39  ;;  %v2961_v62 = vld [vmem:[%s5406_s1 + $0x328] sm:$0xff]  ;;  %v2928_v63 = vld [vmem:[%s5406_s1 + $0x240] sm:$0xff]  ;;  %v2927_v1 = vld [vmem:[%s5406_s1 + $0x238] sm:$0xff] }
  0x16   :  { %103 = vmatprep.subr.mxu0 %v33_v40  ;;  %224 = vmatpush1.msra.mxu1 %v2884_v41  ;;  %v2960_v0 = vld [vmem:[%s5406_s1 + $0x320] sm:$0xff]  ;;  %v2959_v2 = vld [vmem:[%s5406_s1 + $0x318] sm:$0xff]  ;;  %v2926_v4 = vld [vmem:[%s5406_s1 + $0x230] sm:$0xff] }
  0x17   :  { %104 = vmatpush1.msra.mxu0 %v32_v42  ;;  %225 = vmatprep.subr.mxu1 %v2883_v43  ;;  %v2958_v5 = vld [vmem:[%s5406_s1 + $0x310] sm:$0xff]  ;;  %v2925_v6 = vld [vmem:[%s5406_s1 + $0x228] sm:$0xff]  ;;  %v2924_v8 = vld [vmem:[%s5406_s1 + $0x220] sm:$0xff] }
  0x18   :  { %105 = vmatprep.subr.mxu0 %v31_v44  ;;  %226 = vmatpush1.msra.mxu1 %v2882_v45  ;;  %v2957_v7 = vld [vmem:[%s5406_s1 + $0x308] sm:$0xff]  ;;  %v2956_v9 = vld [vmem:[%s5406_s1 + $0x300] sm:$0xff]  ;;  %v2923_v10 = vld [vmem:[%s5406_s1 + $0x218] sm:$0xff] }
  0x19   :  { %106 = vmatpush1.msra.mxu0 %v30_v47  ;;  %227 = vmatprep.subr.mxu1 %v2881_v48  ;;  %v2955_v11 = vld [vmem:[%s5406_s1 + $0x2f8] sm:$0xff]  ;;  %v2922_v12 = vld [vmem:[%s5406_s1 + $0x210] sm:$0xff]  ;;  %v2921_v14 = vld [vmem:[%s5406_s1 + $0x208] sm:$0xff] }
  0x1a   :  { %107 = vmatprep.subr.mxu0 %v29_v49  ;;  %228 = vmatpush1.msra.mxu1 %v2880_v50  ;;  %v2954_v13 = vld [vmem:[%s5406_s1 + $0x2f0] sm:$0xff]  ;;  %v2953_v15 = vld [vmem:[%s5406_s1 + $0x2e8] sm:$0xff]  ;;  %v2920_v16 = vld [vmem:[%s5406_s1 + $0x200] sm:$0xff] }
  0x1b   :  { %108 = vmatpush1.msra.mxu0 %v28_v51  ;;  %229 = vmatprep.subr.mxu1 %v2879_v53  ;;  %v2952_v17 = vld [vmem:[%s5406_s1 + $0x2e0] sm:$0xff]  ;;  %v2919_v18 = vld [vmem:[%s5406_s1 + $0x1f8] sm:$0xff]  ;;  %v2918_v20 = vld [vmem:[%s5406_s1 + $0x1f0] sm:$0xff] }
  0x1c   :  { %2877 = vmatmul.mubr.msk.f32.vlgmr.msra.gmra.mxu0 %vm66_vm1, %v3648_v52  ;;  %2935 = vmatprep.subr.msk.mxu0 %vm70_vm0, %v2933_v54  ;;  %v2951_v19 = vld [vmem:[%s5406_s1 + $0x2d8] sm:$0xff]  ;;  %v2950_v21 = vld [vmem:[%s5406_s1 + $0x2d0] sm:$0xff]  ;;  %v2917_v22 = vld [vmem:[%s5406_s1 + $0x1e8] sm:$0xff] }
  0x1d   :  { %230 = vmatpush1.msra.mxu1 %v2878_v55  ;;  %2936 = vmatpush1.msk.msra.mxu0 %vm70_vm0, %v2932_v56  ;;  %v2949_v23 = vld [vmem:[%s5406_s1 + $0x2c8] sm:$0xff]  ;;  %v2916_v24 = vld [vmem:[%s5406_s1 + $0x1e0] sm:$0xff]  ;;  %v2915_v26 = vld [vmem:[%s5406_s1 + $0x1d8] sm:$0xff] }
  0x1e   :  { %328 = vmatprep.subr.mxu0 %v2931_v57  ;;  %2965 = vmatprep.subr.msk.mxu1 %vm70_vm0, %v2963_v58  ;;  %v2948_v25 = vld [vmem:[%s5406_s1 + $0x2c0] sm:$0xff]  ;;  %v2947_v27 = vld [vmem:[%s5406_s1 + $0x2b8] sm:$0xff]  ;;  %v2914_v28 = vld [vmem:[%s5406_s1 + $0x1d0] sm:$0xff] }
  0x1f   :  { %2907 = vmatmul.mubr.msk.f32.vlgmr.msra.gmra.mxu1 %vm66_vm1, %v3648_v52  ;;  %329 = vmatpush1.msra.mxu0 %v2930_v59  ;;  %v2946_v29 = vld [vmem:[%s5406_s1 + $0x2b0] sm:$0xff]  ;;  %v2913_v30 = vld [vmem:[%s5406_s1 + $0x1c8] sm:$0xff]  ;;  %v2912_v32 = vld [vmem:[%s5406_s1 + $0x1c0] sm:$0xff] }
  0x20   :  { %2966 = vmatpush1.msk.msra.mxu1 %vm70_vm0, %v2962_v60  ;;  %330 = vmatprep.subr.mxu0 %v2929_v61  ;;  %v2945_v31 = vld [vmem:[%s5406_s1 + $0x2a8] sm:$0xff]  ;;  %v2944_v33 = vld [vmem:[%s5406_s1 + $0x2a0] sm:$0xff]  ;;  %v2911_v34 = vld [vmem:[%s5406_s1 + $0x1b8] sm:$0xff] }
  0x21   :  { %449 = vmatprep.subr.mxu1 %v2961_v62  ;;  %331 = vmatpush1.msra.mxu0 %v2928_v63  ;;  %v2943_v35 = vld [vmem:[%s5406_s1 + $0x298] sm:$0xff]  ;;  %v2910_v36 = vld [vmem:[%s5406_s1 + $0x1b0] sm:$0xff]  ;;  %v2909_v38 = vld [vmem:[%s5406_s1 + $0x1a8] sm:$0xff] }
  0x22   :  { %450 = vmatpush1.msra.mxu1 %v2960_v0  ;;  %332 = vmatprep.subr.mxu0 %v2927_v1  ;;  %v2942_v37 = vld [vmem:[%s5406_s1 + $0x290] sm:$0xff]  ;;  %v2941_v39 = vld [vmem:[%s5406_s1 + $0x288] sm:$0xff]  ;;  %v2908_v40 = vld [vmem:[%s5406_s1 + $0x1a0] sm:$0xff] }
  0x23   :  { %451 = vmatprep.subr.mxu1 %v2959_v2  ;;  %333 = vmatpush1.msra.mxu0 %v2926_v4  ;;  %v2940_v41 = vld [vmem:[%s5406_s1 + $0x280] sm:$0xff]  ;;  %v2939_v42 = vld [vmem:[%s5406_s1 + $0x278] sm:$0xff]  ;;  %v2993_v43 = vld [vmem:[%s5406_s1 + $0x408] sm:$0xf] }
  0x24   :  { %452 = vmatpush1.msra.mxu1 %v2958_v5  ;;  %334 = vmatprep.subr.mxu0 %v2925_v6  ;;  %v2938_v44 = vld [vmem:[%s5406_s1 + $0x270] sm:$0xff]  ;;  %v2992_v45 = vld [vmem:[%s5406_s1 + $0x400] sm:$0xf]  ;;  %v2991_v46 = vld [vmem:[%s5406_s1 + $0x3f8] sm:$0xff] }
  0x25   :  { %453 = vmatprep.subr.mxu1 %v2957_v7  ;;  %335 = vmatpush1.msra.mxu0 %v2924_v8  ;;  %v3023_v47 = vld [vmem:[%s5406_s1 + $0x4d8] sm:$0xf]  ;;  %v2990_v48 = vld [vmem:[%s5406_s1 + $0x3f0] sm:$0xff]  ;;  %v2989_v50 = vld [vmem:[%s5406_s1 + $0x3e8] sm:$0xff] }
  0x26   :  { %454 = vmatpush1.msra.mxu1 %v2956_v9  ;;  %336 = vmatprep.subr.mxu0 %v2923_v10  ;;  %v3022_v49 = vld [vmem:[%s5406_s1 + $0x4d0] sm:$0xf]  ;;  %v3021_v51 = vld [vmem:[%s5406_s1 + $0x4c8] sm:$0xff]  ;;  %v2988_v53 = vld [vmem:[%s5406_s1 + $0x3e0] sm:$0xff] }
  0x27   :  { %455 = vmatprep.subr.mxu1 %v2955_v11  ;;  %337 = vmatpush1.msra.mxu0 %v2922_v12  ;;  %v3020_v54 = vld [vmem:[%s5406_s1 + $0x4c0] sm:$0xff]  ;;  %v2987_v55 = vld [vmem:[%s5406_s1 + $0x3d8] sm:$0xff]  ;;  %v2986_v57 = vld [vmem:[%s5406_s1 + $0x3d0] sm:$0xff] }
  0x28   :  { %456 = vmatpush1.msra.mxu1 %v2954_v13  ;;  %338 = vmatprep.subr.mxu0 %v2921_v14  ;;  %v3019_v56 = vld [vmem:[%s5406_s1 + $0x4b8] sm:$0xff]  ;;  %v3018_v58 = vld [vmem:[%s5406_s1 + $0x4b0] sm:$0xff]  ;;  %v2985_v59 = vld [vmem:[%s5406_s1 + $0x3c8] sm:$0xff] }
  0x29   :  { %457 = vmatprep.subr.mxu1 %v2953_v15  ;;  %339 = vmatpush1.msra.mxu0 %v2920_v16  ;;  %v3017_v60 = vld [vmem:[%s5406_s1 + $0x4a8] sm:$0xff]  ;;  %v2984_v61 = vld [vmem:[%s5406_s1 + $0x3c0] sm:$0xff]  ;;  %v2983_v63 = vld [vmem:[%s5406_s1 + $0x3b8] sm:$0xff] }
  0x2a   :  { %458 = vmatpush1.msra.mxu1 %v2952_v17  ;;  %340 = vmatprep.subr.mxu0 %v2919_v18  ;;  %v3016_v62 = vld [vmem:[%s5406_s1 + $0x4a0] sm:$0xff]  ;;  %v3015_v0 = vld [vmem:[%s5406_s1 + $0x498] sm:$0xff]  ;;  %v2982_v1 = vld [vmem:[%s5406_s1 + $0x3b0] sm:$0xff] }
  0x2b   :  { %459 = vmatprep.subr.mxu1 %v2951_v19  ;;  %341 = vmatpush1.msra.mxu0 %v2918_v20  ;;  %v3014_v2 = vld [vmem:[%s5406_s1 + $0x490] sm:$0xff]  ;;  %v2981_v4 = vld [vmem:[%s5406_s1 + $0x3a8] sm:$0xff]  ;;  %v2980_v6 = vld [vmem:[%s5406_s1 + $0x3a0] sm:$0xff] }
  0x2c   :  { %460 = vmatpush1.msra.mxu1 %v2950_v21  ;;  %342 = vmatprep.subr.mxu0 %v2917_v22  ;;  %v3013_v5 = vld [vmem:[%s5406_s1 + $0x488] sm:$0xff]  ;;  %v3012_v7 = vld [vmem:[%s5406_s1 + $0x480] sm:$0xff]  ;;  %v2979_v8 = vld [vmem:[%s5406_s1 + $0x398] sm:$0xff] }
  0x2d   :  { %461 = vmatprep.subr.mxu1 %v2949_v23  ;;  %343 = vmatpush1.msra.mxu0 %v2916_v24  ;;  %v3011_v9 = vld [vmem:[%s5406_s1 + $0x478] sm:$0xff]  ;;  %v2978_v10 = vld [vmem:[%s5406_s1 + $0x390] sm:$0xff]  ;;  %v2977_v12 = vld [vmem:[%s5406_s1 + $0x388] sm:$0xff] }
  0x2e   :  { %462 = vmatpush1.msra.mxu1 %v2948_v25  ;;  %344 = vmatprep.subr.mxu0 %v2915_v26  ;;  %v3010_v11 = vld [vmem:[%s5406_s1 + $0x470] sm:$0xff]  ;;  %v3009_v13 = vld [vmem:[%s5406_s1 + $0x468] sm:$0xff]  ;;  %v2976_v14 = vld [vmem:[%s5406_s1 + $0x380] sm:$0xff] }
  0x2f   :  { %463 = vmatprep.subr.mxu1 %v2947_v27  ;;  %345 = vmatpush1.msra.mxu0 %v2914_v28  ;;  %v3008_v15 = vld [vmem:[%s5406_s1 + $0x460] sm:$0xff]  ;;  %v2975_v16 = vld [vmem:[%s5406_s1 + $0x378] sm:$0xff]  ;;  %v2974_v18 = vld [vmem:[%s5406_s1 + $0x370] sm:$0xff] }
  0x30   :  { %464 = vmatpush1.msra.mxu1 %v2946_v29  ;;  %346 = vmatprep.subr.mxu0 %v2913_v30  ;;  %v3007_v17 = vld [vmem:[%s5406_s1 + $0x458] sm:$0xff]  ;;  %v3006_v19 = vld [vmem:[%s5406_s1 + $0x450] sm:$0xff]  ;;  %v2973_v20 = vld [vmem:[%s5406_s1 + $0x368] sm:$0xff] }
  0x31   :  { %465 = vmatprep.subr.mxu1 %v2945_v31  ;;  %347 = vmatpush1.msra.mxu0 %v2912_v32  ;;  %v3005_v21 = vld [vmem:[%s5406_s1 + $0x448] sm:$0xff]  ;;  %v2972_v22 = vld [vmem:[%s5406_s1 + $0x360] sm:$0xff]  ;;  %v2971_v24 = vld [vmem:[%s5406_s1 + $0x358] sm:$0xff] }
  0x32   :  { %466 = vmatpush1.msra.mxu1 %v2944_v33  ;;  %348 = vmatprep.subr.mxu0 %v2911_v34  ;;  %v3004_v23 = vld [vmem:[%s5406_s1 + $0x440] sm:$0xff]  ;;  %v3003_v25 = vld [vmem:[%s5406_s1 + $0x438] sm:$0xff]  ;;  %v2970_v26 = vld [vmem:[%s5406_s1 + $0x350] sm:$0xff] }
  0x33   :  { %467 = vmatprep.subr.mxu1 %v2943_v35  ;;  %349 = vmatpush1.msra.mxu0 %v2910_v36  ;;  %v3002_v27 = vld [vmem:[%s5406_s1 + $0x430] sm:$0xff]  ;;  %v2969_v28 = vld [vmem:[%s5406_s1 + $0x348] sm:$0xff]  ;;  %v2968_v30 = vld [vmem:[%s5406_s1 + $0x340] sm:$0xff] }
  0x34   :  { %468 = vmatpush1.msra.mxu1 %v2942_v37  ;;  %350 = vmatprep.subr.mxu0 %v2909_v38  ;;  %v3001_v29 = vld [vmem:[%s5406_s1 + $0x428] sm:$0xff]  ;;  %v3000_v31 = vld [vmem:[%s5406_s1 + $0x420] sm:$0xff]  ;;  %v2999_v32 = vld [vmem:[%s5406_s1 + $0x418] sm:$0xff] }
  0x35   :  { %469 = vmatprep.subr.mxu1 %v2941_v39  ;;  %351 = vmatpush1.msra.mxu0 %v2908_v40  ;;  %v2998_v33 = vld [vmem:[%s5406_s1 + $0x410] sm:$0xff]  ;;  %v842_v34 = vld [vmem:[%s5408_s3 + $0xf8] sm:$0xff]  ;;  %v840_v38 = vld [vmem:[%s5408_s3 + $0xe8] sm:$0xff]  ;;  %s3436_s1 = smov 108  }
  0x36   :  { %384 = vmatprep.mubr.f32.mxu0 %v3421_v3  ;;  %470 = vmatpush1.msra.mxu1 %v2940_v41  ;;  %v3065_v35 = vld [vmem:[%s5408_s3 + $0x218] sm:$0xff]  ;;  %v841_v36 = vld [vmem:[%s5408_s3 + $0xf0] sm:$0xff]  ;;  %v3063_v39 = vld [vmem:[%s5408_s3 + $0x208] sm:$0xff] }
  0x37   :  { %2937 = vmatmul.mubr.msk.f32.vlgmr.msra.gmra.mxu0 %vm66_vm1, %v3648_v52  ;;  %471 = vmatprep.subr.mxu1 %v2939_v42  ;;  %v3064_v37 = vld [vmem:[%s5408_s3 + $0x210] sm:$0xff]  ;;  %v839_v40 = vld [vmem:[%s5408_s3 + $0xe0] sm:$0xff]  ;;  %v838_v42 = vld [vmem:[%s5408_s3 + $0xd8] sm:$0xff] }
  0x38   :  { %2995 = vmatprep.subr.msk.mxu0 %vm70_vm0, %v2993_v43  ;;  %472 = vmatpush1.msra.mxu1 %v2938_v44  ;;  %v3062_v41 = vld [vmem:[%s5408_s3 + $0x200] sm:$0xff]  ;;  %v837_v43 = vld [vmem:[%s5408_s3 + $0xd0] sm:$0xff] }
  0x39   :  { %2996 = vmatpush1.msk.msra.mxu0 %vm70_vm0, %v2992_v45  ;;  %505 = vmatprep.mubr.f32.mxu1 %v3421_v3  ;;  %v3060_v44 = vld [vmem:[%s5408_s3 + $0x1f0] sm:$0xff]  ;;  %v836_v45 = vld [vmem:[%s5408_s3 + $0xc8] sm:$0xff] }
  0x3a   :  { %570 = vmatprep.subr.mxu0 %v2991_v46  ;;  %3025 = vmatprep.subr.msk.mxu1 %vm70_vm0, %v3023_v47  ;;  %v56_v46 = vlaneseq  ;;  %v3059_v47 = vld [vmem:[%s5408_s3 + $0x1e8] sm:$0xff] }
  0x3b   :  { %2967 = vmatmul.mubr.msk.f32.vlgmr.msra.gmra.mxu1 %vm66_vm1, %v3648_v52  ;;  %571 = vmatpush1.msra.mxu0 %v2990_v48  ;;  %v835_v48 = vld [vmem:[%s5408_s3 + $0xc0] sm:$0xff] }
  0x3c   :  { %3026 = vmatpush1.msk.msra.mxu1 %vm70_vm0, %v3022_v49  ;;  %572 = vmatprep.subr.mxu0 %v2989_v50  ;;  %v3058_v49 = vld [vmem:[%s5408_s3 + $0x1e0] sm:$0xff]  ;;  %v834_v50 = vld [vmem:[%s5408_s3 + $0xb8] sm:$0xff]  ;;  %vm2641_vm0 = vcmask 425152  }
  0x3d   :  { %691 = vmatprep.subr.mxu1 %v3021_v51  ;;  %573 = vmatpush1.msra.mxu0 %v2988_v53  ;;  %v3057_v51 = vld [vmem:[%s5408_s3 + $0x1d8] sm:$0xff]  ;;  %v833_v53 = vld [vmem:[%s5408_s3 + $0xb0] sm:$0xff] }
  0x3e   :  { %692 = vmatpush1.msra.mxu1 %v3020_v54  ;;  %574 = vmatprep.subr.mxu0 %v2987_v55  ;;  %v3056_v54 = vld [vmem:[%s5408_s3 + $0x1d0] sm:$0xff]  ;;  %v832_v55 = vld [vmem:[%s5408_s3 + $0xa8] sm:$0xff] }
  0x3f   :  { %693 = vmatprep.subr.mxu1 %v3019_v56  ;;  %575 = vmatpush1.msra.mxu0 %v2986_v57  ;;  %v57_v56 = vshrl.u32 %v56_v46, 7  ;;  %v3055_v57 = vld [vmem:[%s5408_s3 + $0x1c8] sm:$0xff] }
  0x40   :  { %694 = vmatpush1.msra.mxu1 %v3018_v58  ;;  %576 = vmatprep.subr.mxu0 %v2985_v59  ;;  %v831_v58 = vld [vmem:[%s5408_s3 + $0xa0] sm:$0xff]  ;;  %v3067_v46 = vld [vmem:[%s5408_s3 + $0x228] sm:$0xff] }
  0x41   :  { %695 = vmatprep.subr.mxu1 %v3017_v60  ;;  %577 = vmatpush1.msra.mxu0 %v2984_v61  ;;  %v3054_v59 = vld [vmem:[%s5408_s3 + $0x1c0] sm:$0xff]  ;;  %v830_v60 = vld [vmem:[%s5408_s3 + $0x98] sm:$0xff] }
  0x42   :  { %696 = vmatpush1.msra.mxu1 %v3016_v62  ;;  %578 = vmatprep.subr.mxu0 %v2983_v63  ;;  %v3053_v61 = vld [vmem:[%s5408_s3 + $0x1b8] sm:$0xff]  ;;  %v829_v62 = vld [vmem:[%s5408_s3 + $0x90] sm:$0xff] }
  0x43   :  { %697 = vmatprep.subr.mxu1 %v3015_v0  ;;  %579 = vmatpush1.msra.mxu0 %v2982_v1  ;;  %v3052_v63 = vld [vmem:[%s5408_s3 + $0x1b0] sm:$0xff]  ;;  %v828_v0 = vld [vmem:[%s5408_s3 + $0x88] sm:$0xff]  ;;  %v4079_v1 = vsub.s32 0, %v57_v56 }
  0x44   :  { %698 = vmatpush1.msra.mxu1 %v3014_v2  ;;  %580 = vmatprep.subr.mxu0 %v2981_v4  ;;  %v3051_v2 = vld [vmem:[%s5408_s3 + $0x1a8] sm:$0xff]  ;;  %v827_v4 = vld [vmem:[%s5408_s3 + $0x80] sm:$0xff] }
  0x45   :  { %699 = vmatprep.subr.mxu1 %v3013_v5  ;;  %581 = vmatpush1.msra.mxu0 %v2980_v6  ;;  %v758_v5 = vld [vmem:[%s5409_s4] sm:$0x3]  ;;  %v4090_v6 = vsub.s32 1, %v57_v56  ;;  %s3424_s4 = smov 112  }
  0x46   :  { %700 = vmatpush1.msra.mxu1 %v3012_v7  ;;  %582 = vmatprep.subr.mxu0 %v2979_v8  ;;  %v3050_v7 = vld [vmem:[%s5408_s3 + $0x1a0] sm:$0xff]  ;;  %v826_v8 = vld [vmem:[%s5408_s3 + $0x78] sm:$0xff] }
  0x47   :  { %701 = vmatprep.subr.mxu1 %v3011_v9  ;;  %583 = vmatpush1.msra.mxu0 %v2978_v10  ;;  %v4099_v9 = vrot.slane %v758_v5, %v4079_v1  ;;  %v3049_v10 = vld [vmem:[%s5408_s3 + $0x198] sm:$0xff] }
  0x48   :  { %702 = vmatpush1.msra.mxu1 %v3010_v11  ;;  %584 = vmatprep.subr.mxu0 %v2977_v12  ;;  %v825_v11 = vld [vmem:[%s5408_s3 + $0x70] sm:$0xff]  ;;  %v4108_v12 = vrot.slane %v758_v5, %v4090_v6 }
  0x49   :  { %703 = vmatprep.subr.mxu1 %v3009_v13  ;;  %585 = vmatpush1.msra.mxu0 %v2976_v14  ;;  %v3048_v13 = vld [vmem:[%s5408_s3 + $0x190] sm:$0xff]  ;;  %v824_v14 = vld [vmem:[%s5408_s3 + $0x68] sm:$0xff]  ;;  %779 = vst [vmem:[#allocation3 + $0x40] sm:$0xff] %v4099_v9  ;;  %781 = vst [vmem:[#allocation3 + $0x50] sm:$0xff] %v4099_v9 }
  0x4a   :  { %704 = vmatpush1.msra.mxu1 %v3008_v15  ;;  %586 = vmatprep.subr.mxu0 %v2975_v16  ;;  %783 = vst [vmem:[#allocation3 + $0x60] sm:$0xff] %v4099_v9  ;;  %785 = vst [vmem:[#allocation3 + $0x70] sm:$0xff] %v4099_v9  ;;  %v3047_v15 = vld [vmem:[%s5408_s3 + $0x188] sm:$0xff]  ;;  %v823_v16 = vld [vmem:[%s5408_s3 + $0x60] sm:$0xff] }
  0x4b   :  { %705 = vmatprep.subr.mxu1 %v3007_v17  ;;  %587 = vmatpush1.msra.mxu0 %v2974_v18  ;;  %787 = vst [vmem:[#allocation3 + $0x80] sm:$0xff] %v4099_v9  ;;  %789 = vst [vmem:[#allocation3 + $0x90] sm:$0xff] %v4099_v9  ;;  %v3046_v17 = vld [vmem:[%s5408_s3 + $0x180] sm:$0xff]  ;;  %v822_v18 = vld [vmem:[%s5408_s3 + $0x58] sm:$0xff] }
  0x4c   :  { %706 = vmatpush1.msra.mxu1 %v3006_v19  ;;  %588 = vmatprep.subr.mxu0 %v2973_v20  ;;  %791 = vst [vmem:[#allocation3 + $0xa0] sm:$0xff] %v4099_v9  ;;  %793 = vst [vmem:[#allocation3 + $0xb0] sm:$0xff] %v4099_v9  ;;  %v3045_v19 = vld [vmem:[%s5408_s3 + $0x178] sm:$0xff]  ;;  %v821_v20 = vld [vmem:[%s5408_s3 + $0x50] sm:$0xff] }
  0x4d   :  { %707 = vmatprep.subr.mxu1 %v3005_v21  ;;  %589 = vmatpush1.msra.mxu0 %v2972_v22  ;;  %795 = vst [vmem:[#allocation3 + $0xc0] sm:$0xff] %v4099_v9  ;;  %797 = vst [vmem:[#allocation3 + $0xd0] sm:$0xff] %v4099_v9  ;;  %v3044_v21 = vld [vmem:[%s5408_s3 + $0x170] sm:$0xff]  ;;  %v820_v22 = vld [vmem:[%s5408_s3 + $0x48] sm:$0xff] }
  0x4e   :  { %708 = vmatpush1.msra.mxu1 %v3004_v23  ;;  %590 = vmatprep.subr.mxu0 %v2971_v24  ;;  %v3043_v23 = vld [vmem:[%s5408_s3 + $0x168] sm:$0xff]  ;;  %v819_v24 = vld [vmem:[%s5408_s3 + $0x40] sm:$0xff]  ;;  %772 = vst.msk [vmem:[#allocation3 + $0x8] sm:$0xff] %vm771_vm3, %v4108_v12  ;;  %774 = vst.msk [vmem:[#allocation3 + $0x18] sm:$0xff] %vm771_vm3, %v4108_v12 }
  0x4f   :  { %709 = vmatprep.subr.mxu1 %v3003_v25  ;;  %591 = vmatpush1.msra.mxu0 %v2970_v26  ;;  %v3042_v25 = vld [vmem:[%s5408_s3 + $0x160] sm:$0xff]  ;;  %v818_v26 = vld [vmem:[%s5408_s3 + $0x38] sm:$0xff]  ;;  %776 = vst.msk [vmem:[#allocation3 + $0x28] sm:$0xff] %vm771_vm3, %v4108_v12  ;;  %778 = vst.msk [vmem:[#allocation3 + $0x38] sm:$0xff] %vm771_vm3, %v4108_v12 }
  0x50   :  { %710 = vmatpush1.msra.mxu1 %v3002_v27  ;;  %592 = vmatprep.subr.mxu0 %v2969_v28  ;;  %v3041_v27 = vld [vmem:[%s5408_s3 + $0x158] sm:$0xff]  ;;  %v817_v28 = vld [vmem:[%s5408_s3 + $0x30] sm:$0xff]  ;;  %780 = vst.msk [vmem:[#allocation3 + $0x48] sm:$0xff] %vm771_vm3, %v4108_v12  ;;  %782 = vst.msk [vmem:[#allocation3 + $0x58] sm:$0xff] %vm771_vm3, %v4108_v12 }
  0x51   :  { %711 = vmatprep.subr.mxu1 %v3001_v29  ;;  %593 = vmatpush1.msra.mxu0 %v2968_v30  ;;  %v3040_v29 = vld [vmem:[%s5408_s3 + $0x150] sm:$0xff]  ;;  %v816_v30 = vld [vmem:[%s5408_s3 + $0x28] sm:$0xff]  ;;  %784 = vst.msk [vmem:[#allocation3 + $0x68] sm:$0xff] %vm771_vm3, %v4108_v12  ;;  %786 = vst.msk [vmem:[#allocation3 + $0x78] sm:$0xff] %vm771_vm3, %v4108_v12 }
  0x52   :  { %626 = vmatprep.mubr.f32.mxu0 %v3421_v3  ;;  %712 = vmatpush1.msra.mxu1 %v3000_v31  ;;  %v3039_v31 = vld [vmem:[%s5408_s3 + $0x148] sm:$0xff]  ;;  %788 = vst.msk [vmem:[#allocation3 + $0x88] sm:$0xff] %vm771_vm3, %v4108_v12  ;;  %790 = vst.msk [vmem:[#allocation3 + $0x98] sm:$0xff] %vm771_vm3, %v4108_v12 }
  0x53   :  { %2997 = vmatmul.mubr.msk.f32.vlgmr.msra.gmra.mxu0 %vm66_vm1, %v3648_v52  ;;  %713 = vmatprep.subr.mxu1 %v2999_v32  ;;  %v815_v32 = vld [vmem:[%s5408_s3 + $0x20] sm:$0xff]  ;;  %792 = vst.msk [vmem:[#allocation3 + $0xa8] sm:$0xff] %vm771_vm3, %v4108_v12  ;;  %794 = vst.msk [vmem:[#allocation3 + $0xb8] sm:$0xff] %vm771_vm3, %v4108_v12 }
  0x54   :  { %714 = vmatpush1.msra.mxu1 %v2998_v33  ;;  %747 = vmatprep.mubr.f32.mxu1 %v3421_v3  ;;  %v3038_v33 = vld [vmem:[%s5408_s3 + $0x140] sm:$0xff]  ;;  %796 = vst.msk [vmem:[#allocation3 + $0xc8] sm:$0xff] %vm771_vm3, %v4108_v12  ;;  %798 = vst.msk [vmem:[#allocation3 + $0xd8] sm:$0xff] %vm771_vm3, %v4108_v12  ;;  %v1686_v12 = vld [vmem:[%s5411_s5 + $0x70] sm:$0xff] }
  0x55   :  { %3027 = vmatmul.mubr.msk.f32.vlgmr.msra.gmra.mxu1 %vm66_vm1, %v3648_v52  ;;  %865 = vmatprep.subr.mxu0 %v842_v34  ;;  %v3061_v52 = vld [vmem:[%s5408_s3 + $0x1f8] sm:$0xff]  ;;  %vm2654_vm1 = vcmask 654752  }
  0x56   :  { %1039 = vmatprep.subr.mxu1 %v3065_v35  ;;  %866 = vmatpush1.msra.mxu0 %v841_v36  ;;  %v814_v34 = vld [vmem:[%s5408_s3 + $0x18] sm:$0xff]  ;;  %v813_v36 = vld [vmem:[%s5408_s3 + $0x10] sm:$0xff] }
  0x57   :  { %1040 = vmatpush1.msra.mxu1 %v3064_v37  ;;  %867 = vmatprep.subr.mxu0 %v840_v38  ;;  %v3037_v35 = vld [vmem:[%s5408_s3 + $0x138] sm:$0xff]  ;;  %v3036_v37 = vld [vmem:[%s5408_s3 + $0x130] sm:$0xff]  ;;  %v812_v38 = vld [vmem:[%s5408_s3 + $0x8] sm:$0xff] }
  0x58   :  { %1041 = vmatprep.subr.mxu1 %v3063_v39  ;;  %868 = vmatpush1.msra.mxu0 %v839_v40  ;;  %v3035_v39 = vld [vmem:[%s5408_s3 + $0x128] sm:$0xff]  ;;  %v811_v40 = vld [vmem:[%s5408_s3] sm:$0xff] }
  0x59   :  { %1042 = vmatpush1.msra.mxu1 %v3062_v41  ;;  %869 = vmatprep.subr.mxu0 %v838_v42  ;;  %v3034_v41 = vld [vmem:[%s5408_s3 + $0x120] sm:$0xff]  ;;  %v846_v42 = vld [vmem:[%s5408_s3 + $0x118] sm:$0xff] }
  0x5a   :  { %1043 = vmatprep.subr.mxu1 %v3061_v52  ;;  %870 = vmatpush1.msra.mxu0 %v837_v43  ;;  %v3069_v52 = vld [vmem:[%s5408_s3 + $0x238] sm:$0xff]  ;;  %v845_v43 = vld [vmem:[%s5408_s3 + $0x110] sm:$0xff] }
  0x5b   :  { %1044 = vmatpush1.msra.mxu1 %v3060_v44  ;;  %871 = vmatprep.subr.mxu0 %v836_v45  ;;  %v3068_v44 = vld [vmem:[%s5408_s3 + $0x230] sm:$0xff]  ;;  %v844_v45 = vld [vmem:[%s5408_s3 + $0x108] sm:$0xff] }
  0x5c   :  { %1045 = vmatprep.subr.mxu1 %v3059_v47  ;;  %872 = vmatpush1.msra.mxu0 %v835_v48  ;;  %v843_v47 = vld [vmem:[%s5408_s3 + $0x100] sm:$0xff] }
  0x5d   :  { %1046 = vmatpush1.msra.mxu1 %v3058_v49  ;;  %873 = vmatprep.subr.mxu0 %v834_v50  ;;  %v3066_v48 = vld [vmem:[%s5408_s3 + $0x220] sm:$0xff]  ;;  %v3107_v49 = vld [vmem:[%s5408_s3 + $0x338] sm:$0xff] }
  0x5e   :  { %1047 = vmatprep.subr.mxu1 %v3057_v51  ;;  %874 = vmatpush1.msra.mxu0 %v833_v53  ;;  %v3149_v50 = vld [vmem:[%s5408_s3 + $0x458] sm:$0xff]  ;;  %v54_v51 = vld [vmem:[%s5410_s2] sm:$0x3] }
  0x5f   :  { %1048 = vmatpush1.msra.mxu1 %v3056_v54  ;;  %875 = vmatprep.subr.mxu0 %v832_v55  ;;  %v59_v53 = vrot.slane %v54_v51, %v4079_v1  ;;  %v2904_v54 = vld [vmem:[%s5410_s2 + $0x2] sm:$0x3]  ;;  %v63_v55 = vrot.slane %v54_v51, %v4090_v6 }
  0x60   :  { %1049 = vmatprep.subr.mxu1 %v3055_v57  ;;  %876 = vmatpush1.msra.mxu0 %v831_v58  ;;  %v186_v57 = vrot.slane %v2904_v54, %v4079_v1  ;;  %v3092_v51 = vld [vmem:[%s5408_s3 + $0x2c0] sm:$0xff] }
  0x61   :  { %1050 = vmatpush1.msra.mxu1 %v3054_v59  ;;  %877 = vmatprep.subr.mxu0 %v830_v60  ;;  %v190_v60 = vrot.slane %v2904_v54, %v4090_v6 }
  0x62   :  { %1051 = vmatprep.subr.mxu1 %v3053_v61  ;;  %878 = vmatpush1.msra.mxu0 %v829_v62 }
  0x63   :  { %1052 = vmatpush1.msra.mxu1 %v3052_v63  ;;  %879 = vmatprep.subr.mxu0 %v828_v0 }
  0x64   :  { %1053 = vmatprep.subr.mxu1 %v3051_v2  ;;  %880 = vmatpush1.msra.mxu0 %v827_v4 }
  0x65   :  { %1054 = vmatpush1.msra.mxu1 %v3050_v7  ;;  %881 = vmatprep.subr.mxu0 %v826_v8 }
  0x66   :  { %1055 = vmatprep.subr.mxu1 %v3049_v10  ;;  %882 = vmatpush1.msra.mxu0 %v825_v11  ;;  %v3106_v11 = vld [vmem:[%s5408_s3 + $0x330] sm:$0xff] }
  0x67   :  { %1056 = vmatpush1.msra.mxu1 %v3048_v13  ;;  %883 = vmatprep.subr.mxu0 %v824_v14  ;;  %v3148_v13 = vld [vmem:[%s5408_s3 + $0x450] sm:$0xff]  ;;  %v3105_v14 = vld [vmem:[%s5408_s3 + $0x328] sm:$0xff] }
  0x68   :  { %1057 = vmatprep.subr.mxu1 %v3047_v15  ;;  %884 = vmatpush1.msra.mxu0 %v823_v16  ;;  %v3147_v15 = vld [vmem:[%s5408_s3 + $0x448] sm:$0xff] }
  0x69   :  { %1058 = vmatpush1.msra.mxu1 %v3046_v17  ;;  %885 = vmatprep.subr.mxu0 %v822_v18  ;;  %v3104_v17 = vld [vmem:[%s5408_s3 + $0x320] sm:$0xff] }
  0x6a   :  { %1059 = vmatprep.subr.mxu1 %v3045_v19  ;;  %886 = vmatpush1.msra.mxu0 %v821_v20  ;;  %v3146_v18 = vld [vmem:[%s5408_s3 + $0x440] sm:$0xff]  ;;  %v3103_v19 = vld [vmem:[%s5408_s3 + $0x318] sm:$0xff] }
  0x6b   :  { %1060 = vmatpush1.msra.mxu1 %v3044_v21  ;;  %887 = vmatprep.subr.mxu0 %v820_v22  ;;  %v3145_v20 = vld [vmem:[%s5408_s3 + $0x438] sm:$0xff]  ;;  %v3102_v21 = vld [vmem:[%s5408_s3 + $0x310] sm:$0xff] }
  0x6c   :  { %1061 = vmatprep.subr.mxu1 %v3043_v23  ;;  %888 = vmatpush1.msra.mxu0 %v819_v24  ;;  %v3144_v22 = vld [vmem:[%s5408_s3 + $0x430] sm:$0xff]  ;;  %v2934_v23 = vld [vmem:[%s5410_s2 + $0x4] sm:$0x3]  ;;  %v3101_v24 = vld [vmem:[%s5408_s3 + $0x308] sm:$0xff] }
  0x6d   :  { %1062 = vmatpush1.msra.mxu1 %v3042_v25  ;;  %889 = vmatprep.subr.mxu0 %v818_v26  ;;  %v3143_v25 = vld [vmem:[%s5408_s3 + $0x428] sm:$0xff]  ;;  %v3100_v26 = vld [vmem:[%s5408_s3 + $0x300] sm:$0xff] }
  0x6e   :  { %1063 = vmatprep.subr.mxu1 %v3041_v27  ;;  %890 = vmatpush1.msra.mxu0 %v817_v28  ;;  %v3142_v27 = vld [vmem:[%s5408_s3 + $0x420] sm:$0xff]  ;;  %v3099_v28 = vld [vmem:[%s5408_s3 + $0x2f8] sm:$0xff] }
  0x6f   :  { %1064 = vmatpush1.msra.mxu1 %v3040_v29  ;;  %891 = vmatprep.subr.mxu0 %v816_v30  ;;  %v3141_v29 = vld [vmem:[%s5408_s3 + $0x418] sm:$0xff]  ;;  %v307_v30 = vrot.slane %v2934_v23, %v4079_v1 }
  0x70   :  { %1065 = vmatprep.subr.mxu1 %v3039_v31  ;;  %892 = vmatpush1.msra.mxu0 %v815_v32  ;;  %v3098_v31 = vld [vmem:[%s5408_s3 + $0x2f0] sm:$0xff] }
  0x71   :  { %1066 = vmatpush1.msra.mxu1 %v3038_v33  ;;  %893 = vmatprep.subr.mxu0 %v814_v34  ;;  %v3140_v32 = vld [vmem:[%s5408_s3 + $0x410] sm:$0xff]  ;;  %v2964_v33 = vld [vmem:[%s5410_s2 + $0x6] sm:$0x3]  ;;  %v3097_v34 = vld [vmem:[%s5408_s3 + $0x2e8] sm:$0xff] }
  0x72   :  { %1067 = vmatprep.subr.mxu1 %v3037_v35  ;;  %894 = vmatpush1.msra.mxu0 %v813_v36  ;;  %v3139_v35 = vld [vmem:[%s5408_s3 + $0x408] sm:$0xff]  ;;  %v311_v36 = vrot.slane %v2934_v23, %v4090_v6  ;;  %v3083_v23 = vld [vmem:[%s5408_s3 + $0x278] sm:$0xff] }
  0x73   :  { %1068 = vmatpush1.msra.mxu1 %v3036_v37  ;;  %895 = vmatprep.subr.mxu0 %v812_v38  ;;  %v3096_v37 = vld [vmem:[%s5408_s3 + $0x2e0] sm:$0xff] }
  0x74   :  { %1069 = vmatprep.subr.mxu1 %v3035_v39  ;;  %896 = vmatpush1.msra.mxu0 %v811_v40  ;;  %v3138_v38 = vld [vmem:[%s5408_s3 + $0x400] sm:$0xff]  ;;  %v3095_v40 = vld [vmem:[%s5408_s3 + $0x2d8] sm:$0xff] }
  0x75   :  { %1070 = vmatpush1.msra.mxu1 %v3034_v41  ;;  %925 = vmatprep.subr.mxu0 %v846_v42  ;;  %v3137_v41 = vld [vmem:[%s5408_s3 + $0x3f8] sm:$0xff] }
  0x76   :  { %1099 = vmatprep.subr.mxu1 %v3069_v52  ;;  %926 = vmatpush2.msra.mxu0 %v845_v43  ;;  %v428_v52 = vrot.slane %v2964_v33, %v4079_v1  ;;  %v3094_v43 = vld [vmem:[%s5408_s3 + $0x2d0] sm:$0xff] }
  0x77   :  { %1100 = vmatpush2.msra.mxu1 %v3068_v44  ;;  %927 = vmatprep.subr.mxu0 %v844_v45  ;;  %v3136_v44 = vld [vmem:[%s5408_s3 + $0x3f0] sm:$0xff] }
  0x78   :  { %1101 = vmatprep.subr.mxu1 %v3067_v46  ;;  %928 = vmatpush2.msra.mxu0 %v843_v47  ;;  %v3093_v46 = vld [vmem:[%s5408_s3 + $0x2c8] sm:$0xff] }
  0x79   :  { %1102 = vmatpush2.msra.mxu1 %v3066_v48  ;;  %1213 = vmatprep.subr.mxu0 %v3107_v49  ;;  %v3135_v47 = vld [vmem:[%s5408_s3 + $0x3e8] sm:$0xff] }
  0x7a   :  { %1387 = vmatprep.subr.mxu1 %v3149_v50  ;;  %v432_v50 = vrot.slane %v2964_v33, %v4090_v6  ;;  %v3121_v33 = vld [vmem:[%s5408_s3 + $0x378] sm:$0xff] }
  0xdc   :  { %v143_v56 = vpop.f32.mrf.mxu0 }
  0xdd   :  { %v144_v58 = vadd.f32 %v143_v56, %v59_v53  ;;  %v3134_v53 = vld [vmem:[%s5408_s3 + $0x3e0] sm:$0xff]  ;;  %v3133_v56 = vld [vmem:[%s5408_s3 + $0x3d8] sm:$0xff] }
  0xde   :  { %v145_v59 = vpop.f32.mrf.mxu0 }
  0xdf   :  { %v4247_v61 = vmax.f32 %v144_v58, 0.0  ;;  %v146_v62 = vadd.f32 %v145_v59, %v63_v55  ;;  %v265_v63 = vpop.f32.mrf.mxu1  ;;  %v3091_v55 = vld [vmem:[%s5408_s3 + $0x2b8] sm:$0xff]  ;;  %v3090_v59 = vld [vmem:[%s5408_s3 + $0x2b0] sm:$0xff] }
  0xe0   :  { %v266_v0 = vadd.f32 %v265_v63, %v186_v57  ;;  %v3089_v63 = vld [vmem:[%s5408_s3 + $0x2a8] sm:$0xff] }
  0xe1   :  { %v149_v2 = vmax.f32 %v146_v62, 0.0  ;;  %v267_v4 = vpop.f32.mrf.mxu1 }
  0xe2   :  { %v4249_v5 = vmax.f32 %v266_v0, 0.0  ;;  %v268_v7 = vadd.f32 %v267_v4, %v190_v60  ;;  %v3132_v60 = vld [vmem:[%s5408_s3 + $0x3d0] sm:$0xff]  ;;  %v3131_v0 = vld [vmem:[%s5408_s3 + $0x3c8] sm:$0xff] }
  0xe3   :  { %152 = vst.msk [vmem:[#allocation2 + $0x8] sm:$0xff] %vm151_vm2, %v149_v2 }
  0xe4   :  { %v271_v8 = vmax.f32 %v268_v7, 0.0  ;;  %v3088_v7 = vld [vmem:[%s5408_s3 + $0x2a0] sm:$0xff] }
  0xe6   :  { %273 = vst.msk [vmem:[#allocation2 + $0x18] sm:$0xff] %vm151_vm2, %v271_v8  ;;  %v3130_v8 = vld [vmem:[%s5408_s3 + $0x3c0] sm:$0xff] }
  0xea   :  { %v4253_v10 = vld [vmem:[#allocation2 + $0x8] sm:$0xff] }
  0xeb   :  { %3028 = vmatprep.mubr.msk.f32.mxu0 %vm151_vm2, %v4253_v10  ;;  %3070 = vmatprep.mubr.msk.f32.mxu1 %vm151_vm2, %v4253_v10 }
  0xec   :  { %930 = vmatmul.mubr.f32.vlgmr.msra.gmra.mxu0 %v4247_v61  ;;  %1104 = vmatmul.mubr.f32.vlgmr.msra.gmra.mxu1 %v4247_v61 }
  0xed   :  { %v4273_v16 = vld [vmem:[#allocation2 + $0x18] sm:$0xff]  ;;  %1214 = vmatpush1.msra.mxu0 %v3106_v11  ;;  %1388 = vmatpush1.msra.mxu1 %v3148_v13 }
  0xee   :  { %3029 = vmatprep.mubr.msk.f32.mxu0 %vm151_vm2, %v4273_v16  ;;  %3071 = vmatprep.mubr.msk.f32.mxu1 %vm151_vm2, %v4273_v16  ;;  %v3087_v11 = vld [vmem:[%s5408_s3 + $0x298] sm:$0xff] }
  0xef   :  { %1215 = vmatprep.subr.mxu0 %v3105_v14  ;;  %1389 = vmatprep.subr.mxu1 %v3147_v15  ;;  %v3129_v13 = vld [vmem:[%s5408_s3 + $0x3b8] sm:$0xff]  ;;  %v3086_v15 = vld [vmem:[%s5408_s3 + $0x290] sm:$0xff] }
  0xf0   :  { %936 = vmatmul.mubr.f32.gmra.mxu0 %v4249_v5  ;;  %1110 = vmatmul.mubr.f32.gmra.mxu1 %v4249_v5 }
  0xf1   :  { %1216 = vmatpush1.msra.mxu0 %v3104_v17  ;;  %1390 = vmatpush1.msra.mxu1 %v3146_v18  ;;  %v3128_v17 = vld [vmem:[%s5408_s3 + $0x3b0] sm:$0xff]  ;;  %v3085_v18 = vld [vmem:[%s5408_s3 + $0x288] sm:$0xff] }
  0xf2   :  { %1217 = vmatprep.subr.mxu0 %v3103_v19  ;;  %1391 = vmatprep.subr.mxu1 %v3145_v20  ;;  %v3127_v19 = vld [vmem:[%s5408_s3 + $0x3a8] sm:$0xff]  ;;  %v3084_v20 = vld [vmem:[%s5408_s3 + $0x280] sm:$0xff] }
  0xf3   :  { %1218 = vmatpush1.msra.mxu0 %v3102_v21  ;;  %1392 = vmatpush1.msra.mxu1 %v3144_v22  ;;  %v3126_v21 = vld [vmem:[%s5408_s3 + $0x3a0] sm:$0xff] }
  0xf4   :  { %1219 = vmatprep.subr.mxu0 %v3101_v24  ;;  %1393 = vmatprep.subr.mxu1 %v3143_v25  ;;  %v3125_v24 = vld [vmem:[%s5408_s3 + $0x398] sm:$0xff]  ;;  %v3082_v25 = vld [vmem:[%s5408_s3 + $0x270] sm:$0xff] }
  0xf5   :  { %1220 = vmatpush1.msra.mxu0 %v3100_v26  ;;  %1394 = vmatpush1.msra.mxu1 %v3142_v27  ;;  %v3124_v26 = vld [vmem:[%s5408_s3 + $0x390] sm:$0xff] }
  0xf6   :  { %1221 = vmatprep.subr.mxu0 %v3099_v28  ;;  %1395 = vmatprep.subr.mxu1 %v3141_v29  ;;  %v3081_v28 = vld [vmem:[%s5408_s3 + $0x268] sm:$0xff] }
  0xf7   :  { %v386_v39 = vpop.f32.mrf.mxu0  ;;  %1222 = vmatpush1.msra.mxu0 %v3098_v31  ;;  %1396 = vmatpush1.msra.mxu1 %v3140_v32  ;;  %v3123_v29 = vld [vmem:[%s5408_s3 + $0x388] sm:$0xff]  ;;  %v3122_v31 = vld [vmem:[%s5408_s3 + $0x380] sm:$0xff]  ;;  %v3079_v32 = vld [vmem:[%s5408_s3 + $0x258] sm:$0xff] }
  0xf8   :  { %v387_v42 = vadd.f32 %v386_v39, %v307_v30  ;;  %1223 = vmatprep.subr.mxu0 %v3097_v34  ;;  %1397 = vmatprep.subr.mxu1 %v3139_v35  ;;  %v3080_v30 = vld [vmem:[%s5408_s3 + $0x260] sm:$0xff]  ;;  %v3078_v34 = vld [vmem:[%s5408_s3 + $0x250] sm:$0xff] }
  0xf9   :  { %v388_v45 = vpop.f32.mrf.mxu0  ;;  %1224 = vmatpush1.msra.mxu0 %v3096_v37  ;;  %1398 = vmatpush1.msra.mxu1 %v3138_v38  ;;  %v3120_v35 = vld [vmem:[%s5408_s3 + $0x370] sm:$0xff]  ;;  %v3077_v37 = vld [vmem:[%s5408_s3 + $0x248] sm:$0xff]  ;;  %v3076_v39 = vld [vmem:[%s5408_s3 + $0x240] sm:$0xff] }
  0xfa   :  { %v4362_v48 = vmax.f32 %v387_v42, 0.0  ;;  %v389_v49 = vadd.f32 %v388_v45, %v311_v36  ;;  %1225 = vmatprep.subr.mxu0 %v3095_v40  ;;  %1399 = vmatprep.subr.mxu1 %v3137_v41  ;;  %v2994_v36 = vld [vmem:[%s5410_s2 + $0x8] sm:$0x3]  ;;  %v3118_v40 = vld [vmem:[%s5408_s3 + $0x360] sm:$0xff]  ;;  %v3024_v41 = vld [vmem:[%s5410_s2 + $0xa] sm:$0x3] }
  0xfb   :  { %v507_v54 = vpop.f32.mrf.mxu1  ;;  %1226 = vmatpush1.msra.mxu0 %v3094_v43  ;;  %1400 = vmatpush1.msra.mxu1 %v3136_v44  ;;  %v3119_v38 = vld [vmem:[%s5408_s3 + $0x368] sm:$0xff]  ;;  %v3111_v42 = vld [vmem:[%s5408_s3 + $0x358] sm:$0xff]  ;;  %v549_v43 = vrot.slane %v2994_v36, %v4079_v1  ;;  %v3110_v44 = vld [vmem:[%s5408_s3 + $0x350] sm:$0xff]  ;;  %s3439_s2 = smov 92  }
  0xfc   :  { %v392_v57 = vmax.f32 %v389_v49, 0.0  ;;  %v508_v58 = vadd.f32 %v507_v54, %v428_v52  ;;  %1227 = vmatprep.subr.mxu0 %v3093_v46  ;;  %1401 = vmatprep.subr.mxu1 %v3135_v47  ;;  %v3153_v52 = vld [vmem:[%s5408_s3 + $0x478] sm:$0xff]  ;;  %v3152_v45 = vld [vmem:[%s5408_s3 + $0x470] sm:$0xff]  ;;  %v3109_v46 = vld [vmem:[%s5408_s3 + $0x348] sm:$0xff]  ;;  %v553_v49 = vrot.slane %v2994_v36, %v4090_v6 }
  0xfd   :  { %v509_v62 = vpop.f32.mrf.mxu1  ;;  %1228 = vmatpush1.msra.mxu0 %v3092_v51  ;;  %1402 = vmatpush1.msra.mxu1 %v3134_v53  ;;  %v3151_v47 = vld [vmem:[%s5408_s3 + $0x468] sm:$0xff]  ;;  %v3108_v51 = vld [vmem:[%s5408_s3 + $0x340] sm:$0xff] }
  0xfe   :  { %394 = vst.msk [vmem:[#allocation2 + $0x28] sm:$0xff] %vm151_vm2, %v392_v57  ;;  %v4390_v2 = vmax.f32 %v508_v58, 0.0  ;;  %v510_v4 = vadd.f32 %v509_v62, %v432_v50  ;;  %1229 = vmatprep.subr.mxu0 %v3091_v55  ;;  %1403 = vmatprep.subr.mxu1 %v3133_v56  ;;  %v670_v50 = vrot.slane %v3024_v41, %v4079_v1  ;;  %v3150_v53 = vld [vmem:[%s5408_s3 + $0x460] sm:$0xff] }
  0xff   :  { %1230 = vmatpush1.msra.mxu0 %v3090_v59  ;;  %1404 = vmatpush1.msra.mxu1 %v3132_v60  ;;  %v674_v56 = vrot.slane %v3024_v41, %v4090_v6  ;;  %v1672_v36 = vld [vmem:[%s5411_s5] sm:$0xff] }
 0x100   :  { %v513_v14 = vmax.f32 %v510_v4, 0.0  ;;  %1231 = vmatprep.subr.mxu0 %v3089_v63  ;;  %1405 = vmatprep.subr.mxu1 %v3131_v0  ;;  %v3194_v41 = vld [vmem:[%s5411_s5 + $0x140] sm:$0xff] }
 0x101   :  { %1232 = vmatpush1.msra.mxu0 %v3088_v7  ;;  %1406 = vmatpush1.msra.mxu1 %v3130_v8 }
 0x102   :  { %515 = vst.msk [vmem:[#allocation2 + $0x38] sm:$0xff] %vm151_vm2, %v513_v14  ;;  %1233 = vmatprep.subr.mxu0 %v3087_v11  ;;  %1407 = vmatprep.subr.mxu1 %v3129_v13  ;;  %v1687_v11 = vld [vmem:[%s5411_s5 + $0x78] sm:$0xff]  ;;  %v3190_v13 = vld [vmem:[%s5411_s5 + $0x120] sm:$0xff] }
 0x103   :  { %1234 = vmatpush1.msra.mxu0 %v3086_v15  ;;  %1408 = vmatpush1.msra.mxu1 %v3128_v17  ;;  %v1683_v14 = vld [vmem:[%s5411_s5 + $0x58] sm:$0xff]  ;;  %v1682_v15 = vld [vmem:[%s5411_s5 + $0x50] sm:$0xff] }
 0x104   :  { %1235 = vmatprep.subr.mxu0 %v3085_v18  ;;  %1409 = vmatprep.subr.mxu1 %v3127_v19  ;;  %v3185_v17 = vld [vmem:[%s5411_s5 + $0xf8] sm:$0xff]  ;;  %v1681_v18 = vld [vmem:[%s5411_s5 + $0x48] sm:$0xff]  ;;  %v3184_v19 = vld [vmem:[%s5411_s5 + $0xf0] sm:$0xff] }
 0x105   :  { %v4423_v22 = vld [vmem:[#allocation2 + $0x28] sm:$0xff]  ;;  %1236 = vmatpush1.msra.mxu0 %v3084_v20  ;;  %1410 = vmatpush1.msra.mxu1 %v3126_v21  ;;  %v1680_v20 = vld [vmem:[%s5411_s5 + $0x40] sm:$0xff] }
 0x106   :  { %3030 = vmatprep.mubr.msk.f32.mxu0 %vm151_vm2, %v4423_v22  ;;  %3072 = vmatprep.mubr.msk.f32.mxu1 %vm151_vm2, %v4423_v22  ;;  %v3183_v21 = vld [vmem:[%s5411_s5 + $0xe8] sm:$0xff] }
 0x107   :  { %942 = vmatmul.mubr.f32.gmra.mxu0 %v4362_v48  ;;  %1116 = vmatmul.mubr.f32.gmra.mxu1 %v4362_v48 }
 0x108   :  { %1237 = vmatprep.subr.mxu0 %v3083_v23  ;;  %1411 = vmatprep.subr.mxu1 %v3125_v24  ;;  %v3182_v23 = vld [vmem:[%s5411_s5 + $0xe0] sm:$0xff]  ;;  %v1678_v24 = vld [vmem:[%s5411_s5 + $0x30] sm:$0xff] }
 0x109   :  { %v4443_v27 = vld [vmem:[#allocation2 + $0x38] sm:$0xff]  ;;  %1238 = vmatpush1.msra.mxu0 %v3082_v25  ;;  %1412 = vmatpush1.msra.mxu1 %v3124_v26  ;;  %v1677_v26 = vld [vmem:[%s5411_s5 + $0x28] sm:$0xff] }
 0x10a   :  { %3031 = vmatprep.mubr.msk.f32.mxu0 %vm151_vm2, %v4443_v27  ;;  %3073 = vmatprep.mubr.msk.f32.mxu1 %vm151_vm2, %v4443_v27  ;;  %v3181_v25 = vld [vmem:[%s5411_s5 + $0xd8] sm:$0xff] }
 0x10b   :  { %948 = vmatmul.mubr.f32.gmra.mxu0 %v4390_v2  ;;  %1122 = vmatmul.mubr.f32.gmra.mxu1 %v4390_v2 }
 0x10c   :  { %1239 = vmatprep.subr.mxu0 %v3081_v28  ;;  %1413 = vmatprep.subr.mxu1 %v3123_v29  ;;  %v1676_v28 = vld [vmem:[%s5411_s5 + $0x20] sm:$0xff]  ;;  %v3179_v29 = vld [vmem:[%s5411_s5 + $0xc8] sm:$0xff] }
 0x10d   :  { %1240 = vmatpush1.msra.mxu0 %v3080_v30  ;;  %1414 = vmatpush1.msra.mxu1 %v3122_v31  ;;  %v1675_v30 = vld [vmem:[%s5411_s5 + $0x18] sm:$0xff]  ;;  %v3178_v31 = vld [vmem:[%s5411_s5 + $0xc0] sm:$0xff] }
 0x10e   :  { %1241 = vmatprep.subr.mxu0 %v3079_v32  ;;  %1415 = vmatprep.subr.mxu1 %v3121_v33  ;;  %v1674_v32 = vld [vmem:[%s5411_s5 + $0x10] sm:$0xff]  ;;  %v3177_v33 = vld [vmem:[%s5411_s5 + $0xb8] sm:$0xff] }
 0x10f   :  { %1242 = vmatpush1.msra.mxu0 %v3078_v34  ;;  %1416 = vmatpush1.msra.mxu1 %v3120_v35  ;;  %v1673_v34 = vld [vmem:[%s5411_s5 + $0x8] sm:$0xff]  ;;  %v3176_v35 = vld [vmem:[%s5411_s5 + $0xb0] sm:$0xff] }
 0x110   :  { %1243 = vmatprep.subr.mxu0 %v3077_v37  ;;  %1417 = vmatprep.subr.mxu1 %v3119_v38  ;;  %v3175_v37 = vld [vmem:[%s5411_s5 + $0xa8] sm:$0xff]  ;;  %v1692_v38 = vld [vmem:[%s5411_s5 + $0xa0] sm:$0xff] }
 0x111   :  { %1244 = vmatpush1.msra.mxu0 %v3076_v39  ;;  %1418 = vmatpush1.msra.mxu1 %v3118_v40  ;;  %v3195_v39 = vld [vmem:[%s5411_s5 + $0x148] sm:$0xff]  ;;  %v1691_v40 = vld [vmem:[%s5411_s5 + $0x98] sm:$0xff] }
 0x112   :  { %1273 = vmatprep.subr.mxu0 %v3111_v42  ;;  %1447 = vmatprep.subr.mxu1 %v3153_v52  ;;  %v1690_v42 = vld [vmem:[%s5411_s5 + $0x90] sm:$0xff]  ;;  %v3193_v52 = vld [vmem:[%s5411_s5 + $0x138] sm:$0xff] }
 0x113   :  { %v628_v54 = vpop.f32.mrf.mxu0  ;;  %1274 = vmatpush2.msra.mxu0 %v3110_v44  ;;  %1448 = vmatpush2.msra.mxu1 %v3152_v45  ;;  %v3192_v44 = vld [vmem:[%s5411_s5 + $0x130] sm:$0xff]  ;;  %v1688_v45 = vld [vmem:[%s5411_s5 + $0x80] sm:$0xff] }
 0x114   :  { %v629_v55 = vadd.f32 %v628_v54, %v549_v43  ;;  %1275 = vmatprep.subr.mxu0 %v3109_v46  ;;  %1449 = vmatprep.subr.mxu1 %v3151_v47  ;;  %v1689_v43 = vld [vmem:[%s5411_s5 + $0x88] sm:$0xff] }
 0x115   :  { %v630_v57 = vpop.f32.mrf.mxu0  ;;  %v749_v1 = vpop.f32.mrf.mxu1  ;;  %1276 = vmatpush2.msra.mxu0 %v3108_v51  ;;  %1450 = vmatpush2.msra.mxu1 %v3150_v53  ;;  %v3191_v46 = vld [vmem:[%s5411_s5 + $0x128] sm:$0xff]  ;;  %v1141_v51 = vld [vmem:[#allocation3 + $0x18] sm:$0xff] }
 0x116   :  { %v4521_v58 = vmax.f32 %v629_v55, 0.0  ;;  %v631_v59 = vadd.f32 %v630_v57, %v553_v49  ;;  %v750_v60 = vadd.f32 %v749_v1, %v670_v50  ;;  %1735 = vmatprep.subr.mxu0 %v3421_v3  ;;  %1930 = vmatprep.subr.mxu1 %v3421_v3  ;;  %v967_v50 = vld [vmem:[#allocation3 + $0x8] sm:$0xff] }
 0x117   :  { %v751_v62 = vpop.f32.mrf.mxu1 }
 0x118   :  { %v634_v63 = vmax.f32 %v631_v59, 0.0  ;;  %v4525_v0 = vmax.f32 %v750_v60, 0.0  ;;  %v752_v4 = vadd.f32 %v751_v62, %v674_v56 }
 0x11a   :  { %636 = vst.msk [vmem:[#allocation2 + $0x48] sm:$0xff] %vm151_vm2, %v634_v63  ;;  %v755_v6 = vmax.f32 %v752_v4, 0.0  ;;  %v973_v63 = vld [vmem:[#allocation3 + $0x28] sm:$0xff] }
 0x11c   :  { %757 = vst.msk [vmem:[#allocation2 + $0x58] sm:$0xff] %vm151_vm2, %v755_v6 }
 0x121   :  { %v4529_v7 = vld [vmem:[#allocation2 + $0x48] sm:$0xff] }
 0x122   :  { %3032 = vmatprep.mubr.msk.f32.mxu0 %vm151_vm2, %v4529_v7  ;;  %3074 = vmatprep.mubr.msk.f32.mxu1 %vm151_vm2, %v4529_v7 }
 0x123   :  { %954 = vmatmul.mubr.f32.gmra.mxu0 %v4521_v58  ;;  %1128 = vmatmul.mubr.f32.gmra.mxu1 %v4521_v58  ;;  %v4537_v8 = vld [vmem:[#allocation2 + $0x58] sm:$0xff] }
 0x124   :  { %3033 = vmatprep.mubr.msk.f32.mxu0 %vm151_vm2, %v4537_v8  ;;  %3075 = vmatprep.mubr.msk.f32.mxu1 %vm151_vm2, %v4537_v8 }
 0x127   :  { %960 = vmatmul.mubr.f32.gmra.mxu0 %v4525_v0  ;;  %1134 = vmatmul.mubr.f32.gmra.mxu1 %v4525_v0 }
 0x128   :  { %3112 = vmatprep.mubr.msk.f32.mxu0 %vm151_vm2, %v4253_v10  ;;  %3154 = vmatprep.mubr.msk.f32.mxu1 %vm151_vm2, %v4253_v10  ;;  %v1685_v10 = vld [vmem:[%s5411_s5 + $0x68] sm:$0xff] }
 0x12b   :  { %1278 = vmatmul.mubr.f32.vlgmr.msra.gmra.mxu0 %v4247_v61  ;;  %1452 = vmatmul.mubr.f32.vlgmr.msra.gmra.mxu1 %v4247_v61  ;;  %v3189_v61 = vld [vmem:[%s5411_s5 + $0x118] sm:$0xff] }
 0x12c   :  { %3113 = vmatprep.mubr.msk.f32.mxu0 %vm151_vm2, %v4273_v16  ;;  %3155 = vmatprep.mubr.msk.f32.mxu1 %vm151_vm2, %v4273_v16  ;;  %v1684_v16 = vld [vmem:[%s5411_s5 + $0x60] sm:$0xff] }
 0x12d   :  { %1736 = vmatpush1.msra.mxu0 %v1687_v11  ;;  %1931 = vmatpush1.msra.mxu1 %v3190_v13 }
 0x12e   :  { %1737 = vmatprep.subr.mxu0 %v3421_v3  ;;  %1932 = vmatprep.subr.mxu1 %v3421_v3 }
 0x12f   :  { %1284 = vmatmul.mubr.f32.gmra.mxu0 %v4249_v5  ;;  %1458 = vmatmul.mubr.f32.gmra.mxu1 %v4249_v5  ;;  %v3188_v5 = vld [vmem:[%s5411_s5 + $0x110] sm:$0xff] }
 0x130   :  { %3114 = vmatprep.mubr.msk.f32.mxu0 %vm151_vm2, %v4423_v22  ;;  %3156 = vmatprep.mubr.msk.f32.mxu1 %vm151_vm2, %v4423_v22  ;;  %v1679_v22 = vld [vmem:[%s5411_s5 + $0x38] sm:$0xff] }
 0x131   :  { %1738 = vmatpush1.msra.mxu0 %v1686_v12  ;;  %1933 = vmatpush1.msra.mxu1 %v3189_v61 }
 0x132   :  { %1739 = vmatprep.subr.mxu0 %v3421_v3  ;;  %1934 = vmatprep.subr.mxu1 %v3421_v3 }
 0x133   :  { %1290 = vmatmul.mubr.f32.gmra.mxu0 %v4362_v48  ;;  %1464 = vmatmul.mubr.f32.gmra.mxu1 %v4362_v48  ;;  %v3187_v48 = vld [vmem:[%s5411_s5 + $0x108] sm:$0xff] }
 0x134   :  { %3115 = vmatprep.mubr.msk.f32.mxu0 %vm151_vm2, %v4443_v27  ;;  %3157 = vmatprep.mubr.msk.f32.mxu1 %vm151_vm2, %v4443_v27  ;;  %v3180_v27 = vld [vmem:[%s5411_s5 + $0xd0] sm:$0xff] }
 0x135   :  { %1740 = vmatpush1.msra.mxu0 %v1685_v10  ;;  %1935 = vmatpush1.msra.mxu1 %v3188_v5  ;;  %v3225_v10 = vld [vmem:[%s5411_s5 + $0x1c8] sm:$0xff]  ;;  %v3260_v5 = vld [vmem:[%s5411_s5 + $0x270] sm:$0xff] }
 0x136   :  { %1741 = vmatprep.subr.mxu0 %v3421_v3  ;;  %1936 = vmatprep.subr.mxu1 %v3421_v3 }
 0x137   :  { %1296 = vmatmul.mubr.f32.gmra.mxu0 %v4390_v2  ;;  %1470 = vmatmul.mubr.f32.gmra.mxu1 %v4390_v2  ;;  %v3186_v2 = vld [vmem:[%s5411_s5 + $0x100] sm:$0xff] }
 0x138   :  { %3116 = vmatprep.mubr.msk.f32.mxu0 %vm151_vm2, %v4529_v7  ;;  %3158 = vmatprep.mubr.msk.f32.mxu1 %vm151_vm2, %v4529_v7 }
 0x139   :  { %1742 = vmatpush1.msra.mxu0 %v1684_v16  ;;  %1937 = vmatpush1.msra.mxu1 %v3187_v48  ;;  %v3224_v48 = vld [vmem:[%s5411_s5 + $0x1c0] sm:$0xff] }
 0x13a   :  { %1743 = vmatprep.subr.mxu0 %v3421_v3  ;;  %1938 = vmatprep.subr.mxu1 %v3421_v3 }
 0x13b   :  { %1302 = vmatmul.mubr.f32.gmra.mxu0 %v4521_v58  ;;  %1476 = vmatmul.mubr.f32.gmra.mxu1 %v4521_v58 }
 0x13c   :  { %3117 = vmatprep.mubr.msk.f32.mxu0 %vm151_vm2, %v4537_v8  ;;  %3159 = vmatprep.mubr.msk.f32.mxu1 %vm151_vm2, %v4537_v8 }
 0x13d   :  { %1744 = vmatpush1.msra.mxu0 %v1683_v14  ;;  %1939 = vmatpush1.msra.mxu1 %v3186_v2  ;;  %v3259_v14 = vld [vmem:[%s5411_s5 + $0x268] sm:$0xff] }
 0x13e   :  { %1745 = vmatprep.subr.mxu0 %v3421_v3  ;;  %1940 = vmatprep.subr.mxu1 %v3421_v3 }
 0x13f   :  { %1308 = vmatmul.mubr.f32.gmra.mxu0 %v4525_v0  ;;  %1482 = vmatmul.mubr.f32.gmra.mxu1 %v4525_v0  ;;  %v1147_v0 = vld [vmem:[#allocation3 + $0x38] sm:$0xff] }
 0x140   :  { %1746 = vmatpush1.msra.mxu0 %v1682_v15  ;;  %1941 = vmatpush1.msra.mxu1 %v3185_v17  ;;  %v979_v17 = vld [vmem:[#allocation3 + $0x48] sm:$0xff] }
 0x141   :  { %1747 = vmatprep.subr.mxu0 %v3421_v3  ;;  %1942 = vmatprep.subr.mxu1 %v3421_v3 }
 0x142   :  { %1748 = vmatpush1.msra.mxu0 %v1681_v18  ;;  %1943 = vmatpush1.msra.mxu1 %v3184_v19  ;;  %v1153_v18 = vld [vmem:[#allocation3 + $0x58] sm:$0xff] }
 0x143   :  { %1749 = vmatprep.subr.mxu0 %v3421_v3  ;;  %1944 = vmatprep.subr.mxu1 %v3421_v3  ;;  %v3223_v19 = vld [vmem:[%s5411_s5 + $0x1b8] sm:$0xff] }
 0x144   :  { %1750 = vmatpush1.msra.mxu0 %v1680_v20  ;;  %1945 = vmatpush1.msra.mxu1 %v3183_v21  ;;  %v3258_v20 = vld [vmem:[%s5411_s5 + $0x260] sm:$0xff] }
 0x145   :  { %1751 = vmatprep.subr.mxu0 %v3421_v3  ;;  %1946 = vmatprep.subr.mxu1 %v3421_v3 }
 0x146   :  { %1752 = vmatpush1.msra.mxu0 %v1679_v22  ;;  %1947 = vmatpush1.msra.mxu1 %v3182_v23 }
 0x147   :  { %1753 = vmatprep.subr.mxu0 %v3421_v3  ;;  %1948 = vmatprep.subr.mxu1 %v3421_v3 }
 0x148   :  { %1754 = vmatpush1.msra.mxu0 %v1678_v24  ;;  %1949 = vmatpush1.msra.mxu1 %v3181_v25  ;;  %v3222_v25 = vld [vmem:[%s5411_s5 + $0x1b0] sm:$0xff] }
 0x149   :  { %1755 = vmatprep.subr.mxu0 %v3421_v3  ;;  %1950 = vmatprep.subr.mxu1 %v3421_v3 }
 0x14a   :  { %1756 = vmatpush1.msra.mxu0 %v1677_v26  ;;  %1951 = vmatpush1.msra.mxu1 %v3180_v27  ;;  %v3257_v26 = vld [vmem:[%s5411_s5 + $0x258] sm:$0xff] }
 0x14b   :  { %1757 = vmatprep.subr.mxu0 %v3421_v3  ;;  %1952 = vmatprep.subr.mxu1 %v3421_v3 }
 0x14c   :  { %1758 = vmatpush1.msra.mxu0 %v1676_v28  ;;  %1953 = vmatpush1.msra.mxu1 %v3179_v29  ;;  %v985_v29 = vld [vmem:[#allocation3 + $0x68] sm:$0xff] }
 0x14d   :  { %1759 = vmatprep.subr.mxu0 %v3421_v3  ;;  %1954 = vmatprep.subr.mxu1 %v3421_v3 }
 0x14e   :  { %1760 = vmatpush1.msra.mxu0 %v1675_v30  ;;  %1955 = vmatpush1.msra.mxu1 %v3178_v31  ;;  %v1159_v30 = vld [vmem:[#allocation3 + $0x78] sm:$0xff]  ;;  %v3221_v31 = vld [vmem:[%s5411_s5 + $0x1a8] sm:$0xff] }
 0x14f   :  { %1761 = vmatprep.subr.mxu0 %v3421_v3  ;;  %1956 = vmatprep.subr.mxu1 %v3421_v3 }
 0x150   :  { %1762 = vmatpush1.msra.mxu0 %v1674_v32  ;;  %1957 = vmatpush1.msra.mxu1 %v3177_v33  ;;  %v3256_v32 = vld [vmem:[%s5411_s5 + $0x250] sm:$0xff] }
 0x151   :  { %1763 = vmatprep.subr.mxu0 %v3421_v3  ;;  %1958 = vmatprep.subr.mxu1 %v3421_v3 }
 0x152   :  { %1764 = vmatpush1.msra.mxu0 %v1673_v34  ;;  %1959 = vmatpush1.msra.mxu1 %v3176_v35 }
 0x153   :  { %1765 = vmatprep.subr.mxu0 %v3421_v3  ;;  %1960 = vmatprep.subr.mxu1 %v3421_v3 }
 0x154   :  { %1766 = vmatpush1.msra.mxu0 %v1672_v36  ;;  %1961 = vmatpush1.msra.mxu1 %v3175_v37  ;;  %v3220_v37 = vld [vmem:[%s5411_s5 + $0x1a0] sm:$0xff] }
 0x155   :  { %1789 = vmatprep.subr.mxu0 %v3421_v3  ;;  %1984 = vmatprep.subr.mxu1 %v3421_v3 }
 0x156   :  { %1790 = vmatpush2.msra.mxu0 %v1692_v38  ;;  %1985 = vmatpush2.msra.mxu1 %v3195_v39  ;;  %v3255_v38 = vld [vmem:[%s5411_s5 + $0x248] sm:$0xff]  ;;  %v3219_v39 = vld [vmem:[%s5411_s5 + $0x198] sm:$0xff] }
 0x157   :  { %1791 = vmatprep.subr.mxu0 %v3421_v3  ;;  %1986 = vmatprep.subr.mxu1 %v3421_v3 }
 0x158   :  { %1792 = vmatpush2.msra.mxu0 %v1691_v40  ;;  %1987 = vmatpush2.msra.mxu1 %v3194_v41  ;;  %v3254_v40 = vld [vmem:[%s5411_s5 + $0x240] sm:$0xff]  ;;  %v3218_v41 = vld [vmem:[%s5411_s5 + $0x190] sm:$0xff] }
 0x159   :  { %1793 = vmatprep.subr.mxu0 %v3421_v3  ;;  %1988 = vmatprep.subr.mxu1 %v3421_v3 }
 0x15a   :  { %1794 = vmatpush2.msra.mxu0 %v1690_v42  ;;  %1989 = vmatpush2.msra.mxu1 %v3193_v52  ;;  %v3253_v42 = vld [vmem:[%s5411_s5 + $0x238] sm:$0xff]  ;;  %v3217_v52 = vld [vmem:[%s5411_s5 + $0x188] sm:$0xff] }
 0x15b   :  { %1795 = vmatprep.subr.mxu0 %v3421_v3  ;;  %1990 = vmatprep.subr.mxu1 %v3421_v3 }
 0x15c   :  { %1796 = vmatpush2.msra.mxu0 %v1689_v43  ;;  %1991 = vmatpush2.msra.mxu1 %v3192_v44  ;;  %v3252_v43 = vld [vmem:[%s5411_s5 + $0x230] sm:$0xff]  ;;  %v3216_v44 = vld [vmem:[%s5411_s5 + $0x180] sm:$0xff] }
 0x15d   :  { %1797 = vmatprep.subr.mxu0 %v3421_v3  ;;  %1992 = vmatprep.subr.mxu1 %v3421_v3 }
 0x15e   :  { %1798 = vmatpush2.msra.mxu0 %v1688_v45  ;;  %1993 = vmatpush2.msra.mxu1 %v3191_v46  ;;  %v3251_v45 = vld [vmem:[%s5411_s5 + $0x228] sm:$0xff]  ;;  %v3215_v46 = vld [vmem:[%s5411_s5 + $0x178] sm:$0xff] }
 0x15f   :  { %2129 = vmatprep.subr.mxu0 %v3421_v3  ;;  %2328 = vmatprep.subr.mxu1 %v3421_v3 }
 0x1ac   :  { %v931_v47 = vpop.f32.mrf.mxu0  ;;  %v1105_v49 = vpop.f32.mrf.mxu1 }
 0x1ad   :  { %v968_v53 = vadd.f32 %v931_v47, %v4099_v9  ;;  %v1142_v54 = vadd.f32 %v1105_v49, %v4099_v9  ;;  %v3250_v47 = vld [vmem:[%s5411_s5 + $0x220] sm:$0xff]  ;;  %v3214_v49 = vld [vmem:[%s5411_s5 + $0x170] sm:$0xff] }
 0x1ae   :  { %v933_v55 = vpop.f32.mrf.mxu0  ;;  %v1107_v56 = vpop.f32.mrf.mxu1 }
 0x1af   :  { %v4779_v57 = vmax.f32 %v968_v53, 0.0  ;;  %v4781_v1 = vmax.f32 %v1142_v54, 0.0  ;;  %v969_v58 = vadd.f32 %v967_v50, %v933_v55  ;;  %v1143_v59 = vadd.f32 %v1141_v51, %v1107_v56  ;;  %v3249_v50 = vld [vmem:[%s5411_s5 + $0x218] sm:$0xff]  ;;  %v3213_v51 = vld [vmem:[%s5411_s5 + $0x168] sm:$0xff]  ;;  %v3248_v53 = vld [vmem:[%s5411_s5 + $0x210] sm:$0xff] }
 0x1b0   :  { %v4783_v60 = vpop.f32.mrf.mxu0  ;;  %v4785_v62 = vpop.f32.mrf.mxu1  ;;  %v3212_v54 = vld [vmem:[%s5411_s5 + $0x160] sm:$0xff]  ;;  %v3247_v55 = vld [vmem:[%s5411_s5 + $0x208] sm:$0xff]  ;;  %v3211_v56 = vld [vmem:[%s5411_s5 + $0x158] sm:$0xff] }
 0x1b1   :  { %971 = vst.msk [vmem:[#allocation3 + $0x8] sm:$0xff] %vm771_vm3, %v969_v58  ;;  %1145 = vst.msk [vmem:[#allocation3 + $0x18] sm:$0xff] %vm771_vm3, %v1143_v59  ;;  %v3246_v58 = vld [vmem:[%s5411_s5 + $0x200] sm:$0xff]  ;;  %v3210_v59 = vld [vmem:[%s5411_s5 + $0x150] sm:$0xff] }
 0x1b2   :  { %v939_v4 = vpop.f32.mrf.mxu0  ;;  %v1113_v9 = vpop.f32.mrf.mxu1 }
 0x1b3   :  { %v975_v6 = vadd.f32 %v973_v63, %v939_v4  ;;  %v1149_v7 = vadd.f32 %v1147_v0, %v1113_v9  ;;  %v3245_v63 = vld [vmem:[%s5411_s5 + $0x1f8] sm:$0xff]  ;;  %v991_v9 = vld [vmem:[#allocation3 + $0x88] sm:$0xff] }
 0x1b5   :  { %977 = vst.msk [vmem:[#allocation3 + $0x28] sm:$0xff] %vm771_vm3, %v975_v6  ;;  %1151 = vst.msk [vmem:[#allocation3 + $0x38] sm:$0xff] %vm771_vm3, %v1149_v7  ;;  %v1165_v6 = vld [vmem:[#allocation3 + $0x98] sm:$0xff]  ;;  %v3230_v7 = vld [vmem:[%s5411_s5 + $0x1f0] sm:$0xff] }
 0x1b8   :  { %v1525_v8 = vld [vmem:[#allocation3 + $0x8] sm:$0xff]  ;;  %v1527_v11 = vld [vmem:[#allocation3 + $0x18] sm:$0xff] }
 0x1b9   :  { %v1553_v13 = vmax.f32 %v1525_v8, 0.0  ;;  %v1555_v12 = vmax.f32 %v1527_v11, 0.0  ;;  %v3265_v8 = vld [vmem:[%s5411_s5 + $0x298] sm:$0xff] }
 0x1bb   :  { %1581 = vst.msk [vmem:[#allocation3 + $0x8] sm:$0xff] %vm771_vm3, %v1553_v13  ;;  %1583 = vst.msk [vmem:[#allocation3 + $0x18] sm:$0xff] %vm771_vm3, %v1555_v12 }
 0x1c2   :  { %v4793_v61 = vld [vmem:[#allocation3 + $0x8] sm:$0xff]  ;;  %v4807_v16 = vld [vmem:[#allocation3 + $0x18] sm:$0xff] }
 0x1c3   :  { %3161 = vmatprep.mubr.msk.f32.mxu0 %vm771_vm3, %v4793_v61  ;;  %3196 = vmatprep.mubr.msk.f32.mxu1 %vm771_vm3, %v4793_v61 }
 0x1c4   :  { %1800 = vmatmul.mubr.f32.vlgmr.msra.gmra.mxu0 %v4779_v57  ;;  %1995 = vmatmul.mubr.f32.vlgmr.msra.gmra.mxu1 %v4779_v57 }
 0x1c5   :  { %3162 = vmatprep.mubr.msk.f32.mxu0 %vm771_vm3, %v4807_v16  ;;  %3197 = vmatprep.mubr.msk.f32.mxu1 %vm771_vm3, %v4807_v16 }
 0x1c6   :  { %2130 = vmatpush1.msra.mxu0 %v3225_v10  ;;  %2329 = vmatpush1.msra.mxu1 %v3260_v5  ;;  %v3229_v5 = vld [vmem:[%s5411_s5 + $0x1e8] sm:$0xff] }
 0x1c7   :  { %v4819_v2 = vpop.f32.mrf.mxu0  ;;  %v4821_v15 = vpop.f32.mrf.mxu1  ;;  %2131 = vmatprep.subr.mxu0 %v3421_v3  ;;  %2330 = vmatprep.subr.mxu1 %v3421_v3 }
 0x1c8   :  { %1804 = vmatmul.mubr.f32.gmra.mxu0 %v4781_v1  ;;  %2000 = vmatmul.mubr.f32.gmra.mxu1 %v4781_v1 }
 0x1c9   :  { %v945_v21 = vpop.f32.mrf.mxu0  ;;  %v1119_v22 = vpop.f32.mrf.mxu1  ;;  %2132 = vmatpush1.msra.mxu0 %v3224_v48  ;;  %2331 = vmatpush1.msra.mxu1 %v3259_v14  ;;  %v3264_v48 = vld [vmem:[%s5411_s5 + $0x290] sm:$0xff] }
 0x1ca   :  { %v981_v23 = vadd.f32 %v979_v17, %v945_v21  ;;  %v1155_v24 = vadd.f32 %v1153_v18, %v1119_v22  ;;  %2133 = vmatprep.subr.mxu0 %v3421_v3  ;;  %2332 = vmatprep.subr.mxu1 %v3421_v3  ;;  %v997_v18 = vld [vmem:[#allocation3 + $0xa8] sm:$0xff]  ;;  %v3420_v22 = vld [vmem:[#allocation3 + $0x40] sm:$0xff] }
 0x1cb   :  { %v4841_v27 = vpop.f32.mrf.mxu0  ;;  %v4843_v28 = vpop.f32.mrf.mxu1  ;;  %2134 = vmatpush1.msra.mxu0 %v3223_v19  ;;  %2333 = vmatpush1.msra.mxu1 %v3258_v20  ;;  %v1171_v19 = vld [vmem:[#allocation3 + $0xb8] sm:$0xff]  ;;  %v3228_v20 = vld [vmem:[%s5411_s5 + $0x1e0] sm:$0xff]  ;;  %v3263_v21 = vld [vmem:[%s5411_s5 + $0x288] sm:$0xff] }
 0x1cc   :  { %983 = vst.msk [vmem:[#allocation3 + $0x48] sm:$0xff] %vm771_vm3, %v981_v23  ;;  %1157 = vst.msk [vmem:[#allocation3 + $0x58] sm:$0xff] %vm771_vm3, %v1155_v24  ;;  %2135 = vmatprep.subr.mxu0 %v3421_v3  ;;  %2334 = vmatprep.subr.mxu1 %v3421_v3  ;;  %v974_v23 = vadd.f32 %v3420_v22, %v4783_v60  ;;  %v978_v24 = vld [vmem:[#allocation3 + $0x40] sm:$0xff] }
 0x1cd   :  { %v951_v33 = vpop.f32.mrf.mxu0  ;;  %v1125_v34 = vpop.f32.mrf.mxu1  ;;  %2136 = vmatpush1.msra.mxu0 %v3222_v25  ;;  %2335 = vmatpush1.msra.mxu1 %v3257_v26  ;;  %v3262_v60 = vld [vmem:[%s5411_s5 + $0x280] sm:$0xff] }
 0x1ce   :  { %v987_v35 = vadd.f32 %v985_v29, %v951_v33  ;;  %v1161_v36 = vadd.f32 %v1159_v30, %v1125_v34  ;;  %2137 = vmatprep.subr.mxu0 %v3421_v3  ;;  %2336 = vmatprep.subr.mxu1 %v3421_v3  ;;  %v1148_v29 = vadd.f32 %v3420_v22, %v4785_v62  ;;  %v1152_v30 = vld [vmem:[#allocation3 + $0x50] sm:$0xff]  ;;  %v3227_v33 = vld [vmem:[%s5411_s5 + $0x1d8] sm:$0xff] }
 0x1cf   :  { %2138 = vmatpush1.msra.mxu0 %v3221_v31  ;;  %2337 = vmatpush1.msra.mxu1 %v3256_v32  ;;  %v1170_v22 = vld [vmem:[#allocation3 + $0xb0] sm:$0xff] }
 0x1d0   :  { %989 = vst.msk [vmem:[#allocation3 + $0x68] sm:$0xff] %vm771_vm3, %v987_v35  ;;  %1163 = vst.msk [vmem:[#allocation3 + $0x78] sm:$0xff] %vm771_vm3, %v1161_v36  ;;  %2139 = vmatprep.subr.mxu0 %v3421_v3  ;;  %2338 = vmatprep.subr.mxu1 %v3421_v3 }
 0x1d1   :  { %2140 = vmatpush1.msra.mxu0 %v3220_v37  ;;  %2339 = vmatpush1.msra.mxu1 %v3255_v38  ;;  %v3226_v37 = vld [vmem:[%s5411_s5 + $0x1d0] sm:$0xff]  ;;  %v3261_v38 = vld [vmem:[%s5411_s5 + $0x278] sm:$0xff]  ;;  %s3448_s5 = smov 88  }
 0x1d2   :  { %2141 = vmatprep.subr.mxu0 %v3421_v3  ;;  %2340 = vmatprep.subr.mxu1 %v3421_v3 }
 0x1d3   :  { %2142 = vmatpush1.msra.mxu0 %v3219_v39  ;;  %2341 = vmatpush1.msra.mxu1 %v3254_v40  ;;  %v980_v39 = vadd.f32 %v978_v24, %v4819_v2  ;;  %v1154_v40 = vadd.f32 %v1152_v30, %v4821_v15 }
 0x1d4   :  { %2143 = vmatprep.subr.mxu0 %v3421_v3  ;;  %2342 = vmatprep.subr.mxu1 %v3421_v3 }
 0x1d5   :  { %2144 = vmatpush1.msra.mxu0 %v3218_v41  ;;  %2343 = vmatpush1.msra.mxu1 %v3253_v42  ;;  %v1315_v42 = vld [vmem:[#allocation3 + $0x28] sm:$0xff] }
 0x1d6   :  { %2145 = vmatprep.subr.mxu0 %v3421_v3  ;;  %2344 = vmatprep.subr.mxu1 %v3421_v3 }
 0x1d7   :  { %2146 = vmatpush1.msra.mxu0 %v3217_v52  ;;  %2345 = vmatpush1.msra.mxu1 %v3252_v43  ;;  %v1489_v43 = vld [vmem:[#allocation3 + $0x38] sm:$0xff] }
 0x1d8   :  { %2147 = vmatprep.subr.mxu0 %v3421_v3  ;;  %2346 = vmatprep.subr.mxu1 %v3421_v3 }
 0x1d9   :  { %2148 = vmatpush1.msra.mxu0 %v3216_v44  ;;  %2347 = vmatpush1.msra.mxu1 %v3251_v45  ;;  %v984_v44 = vld [vmem:[#allocation3 + $0x60] sm:$0xff]  ;;  %v1158_v45 = vld [vmem:[#allocation3 + $0x70] sm:$0xff] }
 0x1da   :  { %2149 = vmatprep.subr.mxu0 %v3421_v3  ;;  %2348 = vmatprep.subr.mxu1 %v3421_v3 }
 0x1db   :  { %2150 = vmatpush1.msra.mxu0 %v3215_v46  ;;  %2349 = vmatpush1.msra.mxu1 %v3250_v47 }
 0x1dc   :  { %2151 = vmatprep.subr.mxu0 %v3421_v3  ;;  %2350 = vmatprep.subr.mxu1 %v3421_v3 }
 0x1dd   :  { %2152 = vmatpush1.msra.mxu0 %v3214_v49  ;;  %2351 = vmatpush1.msra.mxu1 %v3249_v50 }
 0x1de   :  { %2153 = vmatprep.subr.mxu0 %v3421_v3  ;;  %2352 = vmatprep.subr.mxu1 %v3421_v3 }
 0x1df   :  { %2154 = vmatpush1.msra.mxu0 %v3213_v51  ;;  %2353 = vmatpush1.msra.mxu1 %v3248_v53 }
 0x1e0   :  { %2155 = vmatprep.subr.mxu0 %v3421_v3  ;;  %2354 = vmatprep.subr.mxu1 %v3421_v3 }
 0x1e1   :  { %2156 = vmatpush1.msra.mxu0 %v3212_v54  ;;  %2355 = vmatpush1.msra.mxu1 %v3247_v55  ;;  %v986_v54 = vadd.f32 %v984_v44, %v4841_v27  ;;  %v1160_v55 = vadd.f32 %v1158_v45, %v4843_v28 }
 0x1e2   :  { %2157 = vmatprep.subr.mxu0 %v3421_v3  ;;  %2356 = vmatprep.subr.mxu1 %v3421_v3 }
 0x1e3   :  { %v4945_v0 = vpop.f32.mrf.mxu0  ;;  %v4947_v4 = vpop.f32.mrf.mxu1  ;;  %2158 = vmatpush1.msra.mxu0 %v3211_v56  ;;  %2357 = vmatpush1.msra.mxu1 %v3246_v58  ;;  %v1321_v58 = vld [vmem:[#allocation3 + $0x48] sm:$0xff] }
 0x1e4   :  { %2159 = vmatprep.subr.mxu0 %v3421_v3  ;;  %2358 = vmatprep.subr.mxu1 %v3421_v3 }
 0x1e5   :  { %v957_v11 = vpop.f32.mrf.mxu0  ;;  %v1131_v13 = vpop.f32.mrf.mxu1  ;;  %2160 = vmatpush1.msra.mxu0 %v3210_v59  ;;  %2359 = vmatpush1.msra.mxu1 %v3245_v63  ;;  %v1495_v63 = vld [vmem:[#allocation3 + $0x58] sm:$0xff] }
 0x1e6   :  { %v993_v12 = vadd.f32 %v991_v9, %v957_v11  ;;  %v1167_v10 = vadd.f32 %v1165_v6, %v1131_v13  ;;  %2183 = vmatprep.subr.mxu0 %v3421_v3  ;;  %2382 = vmatprep.subr.mxu1 %v3421_v3  ;;  %v990_v9 = vld [vmem:[#allocation3 + $0x80] sm:$0xff] }
 0x1e7   :  { %v4965_v14 = vpop.f32.mrf.mxu0  ;;  %v4967_v17 = vpop.f32.mrf.mxu1  ;;  %2184 = vmatpush2.msra.mxu0 %v3230_v7  ;;  %2383 = vmatpush2.msra.mxu1 %v3265_v8 }
 0x1e8   :  { %995 = vst.msk [vmem:[#allocation3 + $0x88] sm:$0xff] %vm771_vm3, %v993_v12  ;;  %1169 = vst.msk [vmem:[#allocation3 + $0x98] sm:$0xff] %vm771_vm3, %v1167_v10  ;;  %2185 = vmatprep.subr.mxu0 %v3421_v3  ;;  %2384 = vmatprep.subr.mxu1 %v3421_v3  ;;  %v992_v10 = vadd.f32 %v990_v9, %v4945_v0  ;;  %v1345_v9 = vld [vmem:[#allocation3 + $0xc8] sm:$0xff] }
 0x1e9   :  { %v963_v25 = vpop.f32.mrf.mxu0  ;;  %v1137_v26 = vpop.f32.mrf.mxu1  ;;  %2186 = vmatpush2.msra.mxu0 %v3229_v5  ;;  %2385 = vmatpush2.msra.mxu1 %v3264_v48 }
 0x1ea   :  { %v999_v31 = vadd.f32 %v997_v18, %v963_v25  ;;  %v1173_v32 = vadd.f32 %v1171_v19, %v1137_v26  ;;  %2187 = vmatprep.subr.mxu0 %v3421_v3  ;;  %2386 = vmatprep.subr.mxu1 %v3421_v3  ;;  %v1327_v18 = vld [vmem:[#allocation3 + $0x68] sm:$0xff] }
 0x1eb   :  { %v1279_v34 = vpop.f32.mrf.mxu0  ;;  %v1453_v35 = vpop.f32.mrf.mxu1  ;;  %2188 = vmatpush2.msra.mxu0 %v3228_v20  ;;  %2387 = vmatpush2.msra.mxu1 %v3263_v21  ;;  %v1501_v20 = vld [vmem:[#allocation3 + $0x78] sm:$0xff]  ;;  %v996_v21 = vld [vmem:[#allocation3 + $0xa0] sm:$0xff] }
 0x1ec   :  { %1001 = vst.msk [vmem:[#allocation3 + $0xa8] sm:$0xff] %vm771_vm3, %v999_v31  ;;  %1175 = vst.msk [vmem:[#allocation3 + $0xb8] sm:$0xff] %vm771_vm3, %v1173_v32  ;;  %v1316_v62 = vadd.f32 %v1279_v34, %v974_v23  ;;  %v1490_v36 = vadd.f32 %v1453_v35, %v1148_v29  ;;  %2189 = vmatprep.subr.mxu0 %v3421_v3  ;;  %2388 = vmatprep.subr.mxu1 %v3421_v3 }
 0x1ed   :  { %v1281_v41 = vpop.f32.mrf.mxu0  ;;  %v1455_v52 = vpop.f32.mrf.mxu1  ;;  %2190 = vmatpush2.msra.mxu0 %v3227_v33  ;;  %2389 = vmatpush2.msra.mxu1 %v3262_v60  ;;  %v998_v34 = vadd.f32 %v996_v21, %v4965_v14  ;;  %v1172_v35 = vadd.f32 %v1170_v22, %v4967_v17 }
 0x1ee   :  { %v5001_v46 = vmax.f32 %v1316_v62, 0.0  ;;  %v5003_v47 = vmax.f32 %v1490_v36, 0.0  ;;  %v1317_v49 = vadd.f32 %v1315_v42, %v1281_v41  ;;  %v1491_v50 = vadd.f32 %v1489_v43, %v1455_v52  ;;  %2191 = vmatprep.subr.mxu0 %v3421_v3  ;;  %2390 = vmatprep.subr.mxu1 %v3421_v3  ;;  %v1164_v3 = vld [vmem:[#allocation3 + $0x90] sm:$0xff] }
 0x1ef   :  { %v1285_v2 = vpop.f32.mrf.mxu0  ;;  %v1459_v15 = vpop.f32.mrf.mxu1  ;;  %2192 = vmatpush2.msra.mxu0 %v3226_v37  ;;  %2391 = vmatpush2.msra.mxu1 %v3261_v38  ;;  %v1166_v5 = vadd.f32 %v1164_v3, %v4947_v4  ;;  %v1333_v36 = vld [vmem:[#allocation3 + $0x88] sm:$0xff]  ;;  %v1507_v38 = vld [vmem:[#allocation3 + $0x98] sm:$0xff] }
 0x1f0   :  { %1319 = vst.msk [vmem:[#allocation3 + $0x28] sm:$0xff] %vm771_vm3, %v1317_v49  ;;  %1493 = vst.msk [vmem:[#allocation3 + $0x38] sm:$0xff] %vm771_vm3, %v1491_v50  ;;  %v1322_v51 = vadd.f32 %v1285_v2, %v980_v39  ;;  %v1496_v53 = vadd.f32 %v1459_v15, %v1154_v40  ;;  %v1344_v2 = vld [vmem:[#allocation3 + $0xc0] sm:$0xff]  ;;  %v1519_v3 = vld [vmem:[#allocation3 + $0xd8] sm:$0xff] }
 0x1f1   :  { %v1287_v56 = vpop.f32.mrf.mxu0  ;;  %v1461_v59 = vpop.f32.mrf.mxu1 }
 0x1f2   :  { %v5011_v6 = vmax.f32 %v1322_v51, 0.0  ;;  %v5013_v7 = vmax.f32 %v1496_v53, 0.0  ;;  %v1323_v8 = vadd.f32 %v1321_v58, %v1287_v56  ;;  %v1497_v11 = vadd.f32 %v1495_v63, %v1461_v59 }
 0x1f3   :  { %v1291_v13 = vpop.f32.mrf.mxu0  ;;  %v1465_v12 = vpop.f32.mrf.mxu1  ;;  %v1339_v51 = vld [vmem:[#allocation3 + $0xa8] sm:$0xff] }
 0x1f4   :  { %1588 = vst [vmem:[#allocation3 + $0x40] sm:$0xff] %v5011_v6  ;;  %1590 = vst [vmem:[#allocation3 + $0x50] sm:$0xff] %v5013_v7  ;;  %v1328_v27 = vadd.f32 %v1291_v13, %v986_v54  ;;  %v1502_v28 = vadd.f32 %v1465_v12, %v1160_v55  ;;  %v1513_v54 = vld [vmem:[#allocation3 + $0xb8] sm:$0xff]  ;;  %v1518_v55 = vld [vmem:[#allocation3 + $0xd0] sm:$0xff] }
 0x1f5   :  { %1325 = vst.msk [vmem:[#allocation3 + $0x48] sm:$0xff] %vm771_vm3, %v1323_v8  ;;  %1499 = vst.msk [vmem:[#allocation3 + $0x58] sm:$0xff] %vm771_vm3, %v1497_v11  ;;  %v1293_v48 = vpop.f32.mrf.mxu0  ;;  %v1467_v19 = vpop.f32.mrf.mxu1 }
 0x1f6   :  { %v5021_v23 = vmax.f32 %v1328_v27, 0.0  ;;  %v5023_v24 = vmax.f32 %v1502_v28, 0.0  ;;  %v1329_v25 = vadd.f32 %v1327_v18, %v1293_v48  ;;  %v1503_v26 = vadd.f32 %v1501_v20, %v1467_v19  ;;  %v3160_v27 = vld [vmem:[%s5412_s6] ss:$0 sm:$0xff] }
 0x1f7   :  { %v1529_v29 = vld [vmem:[#allocation3 + $0x28] sm:$0xff]  ;;  %v1531_v30 = vld [vmem:[#allocation3 + $0x38] sm:$0xff]  ;;  %v1297_v31 = vpop.f32.mrf.mxu0  ;;  %v1471_v32 = vpop.f32.mrf.mxu1  ;;  %1616 = vst.msk [vmem:[#allocation4] sm:$0xff] %vm1615_vm4, %v3160_v27  ;;  %1617 = vst.msk [vmem:[#allocation4 + $0x8] sm:$0xff] %vm1615_vm4, %v3160_v27 }
 0x1f8   :  { %v1557_v33 = vmax.f32 %v1529_v29, 0.0  ;;  %v1559_v0 = vmax.f32 %v1531_v30, 0.0  ;;  %1592 = vst [vmem:[#allocation3 + $0x60] sm:$0xff] %v5021_v23  ;;  %1594 = vst [vmem:[#allocation3 + $0x70] sm:$0xff] %v5023_v24  ;;  %v1334_v4 = vadd.f32 %v1297_v31, %v992_v10  ;;  %v1508_v60 = vadd.f32 %v1471_v32, %v1166_v5 }
 0x1f9   :  { %1331 = vst.msk [vmem:[#allocation3 + $0x68] sm:$0xff] %vm771_vm3, %v1329_v25  ;;  %1505 = vst.msk [vmem:[#allocation3 + $0x78] sm:$0xff] %vm771_vm3, %v1503_v26  ;;  %v1299_v62 = vpop.f32.mrf.mxu0  ;;  %v1473_v37 = vpop.f32.mrf.mxu1 }
 0x1fa   :  { %1585 = vst.msk [vmem:[#allocation3 + $0x28] sm:$0xff] %vm771_vm3, %v1557_v33  ;;  %1587 = vst.msk [vmem:[#allocation3 + $0x38] sm:$0xff] %vm771_vm3, %v1559_v0  ;;  %v5033_v39 = vmax.f32 %v1334_v4, 0.0  ;;  %v5035_v40 = vmax.f32 %v1508_v60, 0.0  ;;  %v1335_v41 = vadd.f32 %v1333_v36, %v1299_v62  ;;  %v1509_v42 = vadd.f32 %v1507_v38, %v1473_v37 }
 0x1fb   :  { %v1303_v44 = vpop.f32.mrf.mxu0  ;;  %v1477_v14 = vpop.f32.mrf.mxu1  ;;  %1618 = vst.msk [vmem:[#allocation4 + $0x10] sm:$0xff] %vm1615_vm4, %v3160_v27  ;;  %1619 = vst.msk [vmem:[#allocation4 + $0x18] sm:$0xff] %vm1615_vm4, %v3160_v27 }
 0x1fc   :  { %v1533_v52 = vld [vmem:[#allocation3 + $0x48] sm:$0xff]  ;;  %v1535_v43 = vld [vmem:[#allocation3 + $0x58] sm:$0xff]  ;;  %1596 = vst [vmem:[#allocation3 + $0x80] sm:$0xff] %v5033_v39  ;;  %1598 = vst [vmem:[#allocation3 + $0x90] sm:$0xff] %v5035_v40  ;;  %v1340_v49 = vadd.f32 %v1303_v44, %v998_v34  ;;  %v1514_v50 = vadd.f32 %v1477_v14, %v1172_v35 }
 0x1fd   :  { %v1561_v45 = vmax.f32 %v1533_v52, 0.0  ;;  %v1563_v17 = vmax.f32 %v1535_v43, 0.0  ;;  %1337 = vst.msk [vmem:[#allocation3 + $0x88] sm:$0xff] %vm771_vm3, %v1335_v41  ;;  %1511 = vst.msk [vmem:[#allocation3 + $0x98] sm:$0xff] %vm771_vm3, %v1509_v42  ;;  %v1305_v15 = vpop.f32.mrf.mxu0  ;;  %v1479_v53 = vpop.f32.mrf.mxu1 }
 0x1fe   :  { %v5043_v56 = vmax.f32 %v1340_v49, 0.0  ;;  %v5045_v58 = vmax.f32 %v1514_v50, 0.0  ;;  %v1341_v59 = vadd.f32 %v1339_v51, %v1305_v15  ;;  %v1515_v63 = vadd.f32 %v1513_v54, %v1479_v53  ;;  %1620 = vst.msk [vmem:[#allocation4 + $0x20] sm:$0xff] %vm1615_vm4, %v3160_v27  ;;  %1621 = vst.msk [vmem:[#allocation4 + $0x28] sm:$0xff] %vm1615_vm4, %v3160_v27 }
 0x1ff   :  { %1589 = vst.msk [vmem:[#allocation3 + $0x48] sm:$0xff] %vm771_vm3, %v1561_v45  ;;  %1591 = vst.msk [vmem:[#allocation3 + $0x58] sm:$0xff] %vm771_vm3, %v1563_v17  ;;  %v1309_v13 = vpop.f32.mrf.mxu0  ;;  %v1483_v12 = vpop.f32.mrf.mxu1 }
 0x200   :  { %v1537_v8 = vld [vmem:[#allocation3 + $0x68] sm:$0xff]  ;;  %v1539_v11 = vld [vmem:[#allocation3 + $0x78] sm:$0xff]  ;;  %1600 = vst [vmem:[#allocation3 + $0xa0] sm:$0xff] %v5043_v56  ;;  %1602 = vst [vmem:[#allocation3 + $0xb0] sm:$0xff] %v5045_v58  ;;  %v1346_v5 = vadd.f32 %v1344_v2, %v1309_v13  ;;  %v1520_v48 = vadd.f32 %v1518_v55, %v1483_v12 }
 0x201   :  { %v1565_v28 = vmax.f32 %v1537_v8, 0.0  ;;  %v1567_v10 = vmax.f32 %v1539_v11, 0.0  ;;  %1343 = vst.msk [vmem:[#allocation3 + $0xa8] sm:$0xff] %vm771_vm3, %v1341_v59  ;;  %1517 = vst.msk [vmem:[#allocation3 + $0xb8] sm:$0xff] %vm771_vm3, %v1515_v63  ;;  %v1311_v18 = vpop.f32.mrf.mxu0  ;;  %v1485_v19 = vpop.f32.mrf.mxu1  ;;  %v5082_v20 = vld [vmem:[#allocation3 + $0x28] sm:$0xff]  ;;  %v5096_v31 = vld [vmem:[#allocation3 + $0x38] sm:$0xff] }
 0x202   :  { %1622 = vst.msk [vmem:[#allocation4 + $0x30] sm:$0xff] %vm1615_vm4, %v3160_v27  ;;  %1623 = vst.msk [vmem:[#allocation4 + $0x38] sm:$0xff] %vm1615_vm4, %v3160_v27  ;;  %v5086_v21 = vmax.f32 %v1346_v5, 0.0  ;;  %v5088_v22 = vmax.f32 %v1520_v48, 0.0  ;;  %v1347_v25 = vadd.f32 %v1345_v9, %v1311_v18  ;;  %v1521_v26 = vadd.f32 %v1519_v3, %v1485_v19  ;;  %3163 = vmatprep.mubr.msk.f32.mxu0 %vm771_vm3, %v5082_v20 }
 0x203   :  { %1624 = vst.msk [vmem:[#allocation4 + $0x40] sm:$0xff] %vm1615_vm4, %v3160_v27  ;;  %1625 = vst.msk [vmem:[#allocation4 + $0x48] sm:$0xff] %vm1615_vm4, %v3160_v27  ;;  %3198 = vmatprep.mubr.msk.f32.mxu1 %vm771_vm3, %v5082_v20  ;;  %1809 = vmatmul.mubr.f32.gmra.mxu0 %v5001_v46 }
 0x204   :  { %1626 = vst.msk [vmem:[#allocation4 + $0x50] sm:$0xff] %vm1615_vm4, %v3160_v27  ;;  %1627 = vst.msk [vmem:[#allocation4 + $0x58] sm:$0xff] %vm1615_vm4, %v3160_v27  ;;  %v1541_v29 = vld [vmem:[#allocation3 + $0x88] sm:$0xff]  ;;  %v1543_v30 = vld [vmem:[#allocation3 + $0x98] sm:$0xff]  ;;  %2005 = vmatmul.mubr.f32.gmra.mxu1 %v5001_v46  ;;  %3164 = vmatprep.mubr.msk.f32.mxu0 %vm771_vm3, %v5096_v31 }
 0x205   :  { %1628 = vst.msk [vmem:[#allocation4 + $0x60] sm:$0xff] %vm1615_vm4, %v3160_v27  ;;  %1629 = vst.msk [vmem:[#allocation4 + $0x68] sm:$0xff] %vm1615_vm4, %v3160_v27  ;;  %v1569_v32 = vmax.f32 %v1541_v29, 0.0  ;;  %v1571_v33 = vmax.f32 %v1543_v30, 0.0  ;;  %3199 = vmatprep.mubr.msk.f32.mxu1 %vm771_vm3, %v5096_v31  ;;  %v2071_v59 = vld [vmem:[#allocation4 + $0x20] sm:$0xff]  ;;  %v1875_v12 = vld [vmem:[#allocation4 + $0x28] sm:$0xff] }
 0x206   :  { %1630 = vst.msk [vmem:[#allocation4 + $0x70] sm:$0xff] %vm1615_vm4, %v3160_v27  ;;  %1631 = vst.msk [vmem:[#allocation4 + $0x78] sm:$0xff] %vm1615_vm4, %v3160_v27  ;;  %v5110_v60 = vld [vmem:[#allocation3 + $0x48] sm:$0xff]  ;;  %v5120_v37 = vld [vmem:[#allocation3 + $0x58] sm:$0xff] }
 0x207   :  { %1632 = vst.msk [vmem:[#allocation4 + $0x80] sm:$0xff] %vm1615_vm4, %v3160_v27  ;;  %1633 = vst.msk [vmem:[#allocation4 + $0x88] sm:$0xff] %vm1615_vm4, %v3160_v27  ;;  %1814 = vmatmul.mubr.f32.gmra.mxu0 %v5003_v47 }
 0x208   :  { %1634 = vst.msk [vmem:[#allocation4 + $0x90] sm:$0xff] %vm1615_vm4, %v3160_v27  ;;  %1635 = vst.msk [vmem:[#allocation4 + $0x98] sm:$0xff] %vm1615_vm4, %v3160_v27  ;;  %v1545_v0 = vld [vmem:[#allocation3 + $0xa8] sm:$0xff]  ;;  %v1547_v4 = vld [vmem:[#allocation3 + $0xb8] sm:$0xff]  ;;  %2010 = vmatmul.mubr.f32.gmra.mxu1 %v5003_v47  ;;  %3165 = vmatprep.mubr.msk.f32.mxu0 %vm771_vm3, %v5110_v60 }
 0x209   :  { %1636 = vst.msk [vmem:[#allocation4 + $0xa0] sm:$0xff] %vm1615_vm4, %v3160_v27  ;;  %1637 = vst.msk [vmem:[#allocation4 + $0xa8] sm:$0xff] %vm1615_vm4, %v3160_v27  ;;  %v1573_v34 = vmax.f32 %v1545_v0, 0.0  ;;  %v1575_v35 = vmax.f32 %v1547_v4, 0.0  ;;  %3200 = vmatprep.mubr.msk.f32.mxu1 %vm771_vm3, %v5110_v60 }
 0x20a   :  { %1638 = vst.msk [vmem:[#allocation4 + $0xb0] sm:$0xff] %vm1615_vm4, %v3160_v27  ;;  %1639 = vst.msk [vmem:[#allocation4 + $0xb8] sm:$0xff] %vm1615_vm4, %v3160_v27 }
 0x20b   :  { %1640 = vst.msk [vmem:[#allocation4 + $0xc0] sm:$0xff] %vm1615_vm4, %v3160_v27  ;;  %1641 = vst.msk [vmem:[#allocation4 + $0xc8] sm:$0xff] %vm1615_vm4, %v3160_v27  ;;  %1819 = vmatmul.mubr.f32.gmra.mxu0 %v5011_v6 }
 0x20c   :  { %1642 = vst.msk [vmem:[#allocation4 + $0xd0] sm:$0xff] %vm1615_vm4, %v3160_v27  ;;  %1643 = vst.msk [vmem:[#allocation4 + $0xd8] sm:$0xff] %vm1615_vm4, %v3160_v27  ;;  %2015 = vmatmul.mubr.f32.gmra.mxu1 %v5011_v6  ;;  %3166 = vmatprep.mubr.msk.f32.mxu0 %vm771_vm3, %v5120_v37  ;;  %v2074_v27 = vld [vmem:[#allocation4 + $0x30] sm:$0xff] }
 0x20d   :  { %1593 = vst.msk [vmem:[#allocation3 + $0x68] sm:$0xff] %vm771_vm3, %v1565_v28  ;;  %1595 = vst.msk [vmem:[#allocation3 + $0x78] sm:$0xff] %vm771_vm3, %v1567_v10  ;;  %3201 = vmatprep.mubr.msk.f32.mxu1 %vm771_vm3, %v5120_v37 }
 0x20e   :  { %1604 = vst [vmem:[#allocation3 + $0xc0] sm:$0xff] %v5086_v21  ;;  %1606 = vst [vmem:[#allocation3 + $0xd0] sm:$0xff] %v5088_v22 }
 0x20f   :  { %1349 = vst.msk [vmem:[#allocation3 + $0xc8] sm:$0xff] %vm771_vm3, %v1347_v25  ;;  %1523 = vst.msk [vmem:[#allocation3 + $0xd8] sm:$0xff] %vm771_vm3, %v1521_v26  ;;  %1824 = vmatmul.mubr.f32.gmra.mxu0 %v5013_v7 }
 0x210   :  { %1597 = vst.msk [vmem:[#allocation3 + $0x88] sm:$0xff] %vm771_vm3, %v1569_v32  ;;  %1599 = vst.msk [vmem:[#allocation3 + $0x98] sm:$0xff] %vm771_vm3, %v1571_v33  ;;  %2020 = vmatmul.mubr.f32.gmra.mxu1 %v5013_v7  ;;  %v1881_v32 = vld [vmem:[#allocation4 + $0x48] sm:$0xff]  ;;  %v2080_v33 = vld [vmem:[#allocation4 + $0x50] sm:$0xff] }
 0x211   :  { %1601 = vst.msk [vmem:[#allocation3 + $0xa8] sm:$0xff] %vm771_vm3, %v1573_v34  ;;  %1603 = vst.msk [vmem:[#allocation3 + $0xb8] sm:$0xff] %vm771_vm3, %v1575_v35 }
 0x214   :  { %v5130_v42 = vld [vmem:[#allocation3 + $0x68] sm:$0xff]  ;;  %v5138_v52 = vld [vmem:[#allocation3 + $0x78] sm:$0xff] }
 0x215   :  { %3167 = vmatprep.mubr.msk.f32.mxu0 %vm771_vm3, %v5130_v42  ;;  %3202 = vmatprep.mubr.msk.f32.mxu1 %vm771_vm3, %v5130_v42 }
 0x216   :  { %v1549_v62 = vld [vmem:[#allocation3 + $0xc8] sm:$0xff]  ;;  %v1551_v36 = vld [vmem:[#allocation3 + $0xd8] sm:$0xff]  ;;  %1829 = vmatmul.mubr.f32.gmra.mxu0 %v5021_v23  ;;  %2025 = vmatmul.mubr.f32.gmra.mxu1 %v5021_v23 }
 0x217   :  { %v1577_v38 = vmax.f32 %v1549_v62, 0.0  ;;  %v1579_v41 = vmax.f32 %v1551_v36, 0.0  ;;  %3168 = vmatprep.mubr.msk.f32.mxu0 %vm771_vm3, %v5138_v52  ;;  %3203 = vmatprep.mubr.msk.f32.mxu1 %vm771_vm3, %v5138_v52  ;;  %v5146_v43 = vld [vmem:[#allocation3 + $0x88] sm:$0xff]  ;;  %v1663_v44 = vld [vmem:[#allocation3 + $0x98] sm:$0xff] }
 0x218   :  { %v1665_v14 = vld [vmem:[#allocation3 + $0xa8] sm:$0xff]  ;;  %v1667_v45 = vld [vmem:[#allocation3 + $0xb8] sm:$0xff] }
 0x219   :  { %1605 = vst.msk [vmem:[#allocation3 + $0xc8] sm:$0xff] %vm771_vm3, %v1577_v38  ;;  %1607 = vst.msk [vmem:[#allocation3 + $0xd8] sm:$0xff] %vm771_vm3, %v1579_v41  ;;  %v1884_v36 = vld [vmem:[#allocation4 + $0x58] sm:$0xff] }
 0x21a   :  { %1834 = vmatmul.mubr.f32.gmra.mxu0 %v5023_v24  ;;  %2030 = vmatmul.mubr.f32.gmra.mxu1 %v5023_v24 }
 0x21b   :  { %3169 = vmatprep.mubr.msk.f32.mxu0 %vm771_vm3, %v5146_v43  ;;  %3204 = vmatprep.mubr.msk.f32.mxu1 %vm771_vm3, %v5146_v43 }
 0x21e   :  { %1839 = vmatmul.mubr.f32.gmra.mxu0 %v5033_v39  ;;  %2035 = vmatmul.mubr.f32.gmra.mxu1 %v5033_v39 }
 0x21f   :  { %3170 = vmatprep.mubr.msk.f32.mxu0 %vm771_vm3, %v1663_v44  ;;  %3205 = vmatprep.mubr.msk.f32.mxu1 %vm771_vm3, %v1663_v44 }
 0x220   :  { %v1669_v17 = vld [vmem:[#allocation3 + $0xc8] sm:$0xff]  ;;  %v1671_v49 = vld [vmem:[#allocation3 + $0xd8] sm:$0xff] }
 0x222   :  { %1844 = vmatmul.mubr.f32.gmra.mxu0 %v5035_v40  ;;  %2040 = vmatmul.mubr.f32.gmra.mxu1 %v5035_v40 }
 0x223   :  { %3171 = vmatprep.mubr.msk.f32.mxu0 %vm771_vm3, %v1665_v14  ;;  %3206 = vmatprep.mubr.msk.f32.mxu1 %vm771_vm3, %v1665_v14 }
 0x226   :  { %1849 = vmatmul.mubr.f32.gmra.mxu0 %v5043_v56  ;;  %2045 = vmatmul.mubr.f32.gmra.mxu1 %v5043_v56 }
 0x227   :  { %3172 = vmatprep.mubr.msk.f32.mxu0 %vm771_vm3, %v1667_v45  ;;  %3207 = vmatprep.mubr.msk.f32.mxu1 %vm771_vm3, %v1667_v45 }
 0x22a   :  { %1854 = vmatmul.mubr.f32.gmra.mxu0 %v5045_v58  ;;  %2050 = vmatmul.mubr.f32.gmra.mxu1 %v5045_v58 }
 0x22b   :  { %3173 = vmatprep.mubr.msk.f32.mxu0 %vm771_vm3, %v1669_v17  ;;  %3208 = vmatprep.mubr.msk.f32.mxu1 %vm771_vm3, %v1669_v17 }
 0x22e   :  { %1859 = vmatmul.mubr.f32.gmra.mxu0 %v5086_v21  ;;  %2055 = vmatmul.mubr.f32.gmra.mxu1 %v5086_v21 }
 0x22f   :  { %3174 = vmatprep.mubr.msk.f32.mxu0 %vm771_vm3, %v1671_v49  ;;  %3209 = vmatprep.mubr.msk.f32.mxu1 %vm771_vm3, %v1671_v49 }
 0x232   :  { %1864 = vmatmul.mubr.f32.gmra.mxu0 %v5088_v22  ;;  %2060 = vmatmul.mubr.f32.gmra.mxu1 %v5088_v22 }
 0x233   :  { %3231 = vmatprep.mubr.msk.f32.mxu0 %vm771_vm3, %v4793_v61  ;;  %3266 = vmatprep.mubr.msk.f32.mxu1 %vm771_vm3, %v4793_v61 }
 0x236   :  { %2194 = vmatmul.mubr.f32.vlgmr.msra.gmra.mxu0 %v4779_v57  ;;  %2393 = vmatmul.mubr.f32.vlgmr.msra.gmra.mxu1 %v4779_v57  ;;  %v2065_v57 = vld [vmem:[#allocation4] sm:$0xff] }
 0x237   :  { %3232 = vmatprep.mubr.msk.f32.mxu0 %vm771_vm3, %v4807_v16  ;;  %3267 = vmatprep.mubr.msk.f32.mxu1 %vm771_vm3, %v4807_v16 }
 0x23a   :  { %2199 = vmatmul.mubr.f32.gmra.mxu0 %v4781_v1  ;;  %2398 = vmatmul.mubr.f32.gmra.mxu1 %v4781_v1 }
 0x23b   :  { %3233 = vmatprep.mubr.msk.f32.mxu0 %vm771_vm3, %v5082_v20  ;;  %3268 = vmatprep.mubr.msk.f32.mxu1 %vm771_vm3, %v5082_v20  ;;  %v1878_v20 = vld [vmem:[#allocation4 + $0x38] sm:$0xff] }
 0x23e   :  { %2204 = vmatmul.mubr.f32.gmra.mxu0 %v5001_v46  ;;  %2403 = vmatmul.mubr.f32.gmra.mxu1 %v5001_v46 }
 0x23f   :  { %3234 = vmatprep.mubr.msk.f32.mxu0 %vm771_vm3, %v5096_v31  ;;  %3269 = vmatprep.mubr.msk.f32.mxu1 %vm771_vm3, %v5096_v31 }
 0x242   :  { %2209 = vmatmul.mubr.f32.gmra.mxu0 %v5003_v47  ;;  %2408 = vmatmul.mubr.f32.gmra.mxu1 %v5003_v47 }
 0x243   :  { %3235 = vmatprep.mubr.msk.f32.mxu0 %vm771_vm3, %v5110_v60  ;;  %3270 = vmatprep.mubr.msk.f32.mxu1 %vm771_vm3, %v5110_v60 }
 0x246   :  { %2214 = vmatmul.mubr.f32.gmra.mxu0 %v5011_v6  ;;  %2413 = vmatmul.mubr.f32.gmra.mxu1 %v5011_v6  ;;  %v1869_v6 = vld [vmem:[#allocation4 + $0x8] sm:$0xff] }
 0x247   :  { %3236 = vmatprep.mubr.msk.f32.mxu0 %vm771_vm3, %v5120_v37  ;;  %3271 = vmatprep.mubr.msk.f32.mxu1 %vm771_vm3, %v5120_v37  ;;  %v2083_v37 = vld [vmem:[#allocation4 + $0x60] sm:$0xff] }
 0x24a   :  { %2219 = vmatmul.mubr.f32.gmra.mxu0 %v5013_v7  ;;  %2418 = vmatmul.mubr.f32.gmra.mxu1 %v5013_v7  ;;  %v2068_v7 = vld [vmem:[#allocation4 + $0x10] sm:$0xff] }
 0x24b   :  { %3237 = vmatprep.mubr.msk.f32.mxu0 %vm771_vm3, %v5130_v42  ;;  %3272 = vmatprep.mubr.msk.f32.mxu1 %vm771_vm3, %v5130_v42 }
 0x24e   :  { %2224 = vmatmul.mubr.f32.gmra.mxu0 %v5021_v23  ;;  %2423 = vmatmul.mubr.f32.gmra.mxu1 %v5021_v23 }
 0x24f   :  { %3238 = vmatprep.mubr.msk.f32.mxu0 %vm771_vm3, %v5138_v52  ;;  %3273 = vmatprep.mubr.msk.f32.mxu1 %vm771_vm3, %v5138_v52 }
 0x252   :  { %2229 = vmatmul.mubr.f32.gmra.mxu0 %v5023_v24  ;;  %2428 = vmatmul.mubr.f32.gmra.mxu1 %v5023_v24 }
 0x253   :  { %3239 = vmatprep.mubr.msk.f32.mxu0 %vm771_vm3, %v5146_v43  ;;  %3274 = vmatprep.mubr.msk.f32.mxu1 %vm771_vm3, %v5146_v43 }
 0x256   :  { %2234 = vmatmul.mubr.f32.gmra.mxu0 %v5033_v39  ;;  %2433 = vmatmul.mubr.f32.gmra.mxu1 %v5033_v39 }
 0x257   :  { %3240 = vmatprep.mubr.msk.f32.mxu0 %vm771_vm3, %v1663_v44  ;;  %3275 = vmatprep.mubr.msk.f32.mxu1 %vm771_vm3, %v1663_v44 }
 0x25a   :  { %2239 = vmatmul.mubr.f32.gmra.mxu0 %v5035_v40  ;;  %2438 = vmatmul.mubr.f32.gmra.mxu1 %v5035_v40 }
 0x25b   :  { %3241 = vmatprep.mubr.msk.f32.mxu0 %vm771_vm3, %v1665_v14  ;;  %3276 = vmatprep.mubr.msk.f32.mxu1 %vm771_vm3, %v1665_v14  ;;  %v1887_v14 = vld [vmem:[#allocation4 + $0x68] sm:$0xff] }
 0x25e   :  { %2244 = vmatmul.mubr.f32.gmra.mxu0 %v5043_v56  ;;  %2443 = vmatmul.mubr.f32.gmra.mxu1 %v5043_v56 }
 0x25f   :  { %3242 = vmatprep.mubr.msk.f32.mxu0 %vm771_vm3, %v1667_v45  ;;  %3277 = vmatprep.mubr.msk.f32.mxu1 %vm771_vm3, %v1667_v45  ;;  %v2086_v45 = vld [vmem:[#allocation4 + $0x70] sm:$0xff] }
 0x262   :  { %2249 = vmatmul.mubr.f32.gmra.mxu0 %v5045_v58  ;;  %2448 = vmatmul.mubr.f32.gmra.mxu1 %v5045_v58  ;;  %v1872_v58 = vld [vmem:[#allocation4 + $0x18] sm:$0xff] }
 0x263   :  { %3243 = vmatprep.mubr.msk.f32.mxu0 %vm771_vm3, %v1669_v17  ;;  %3278 = vmatprep.mubr.msk.f32.mxu1 %vm771_vm3, %v1669_v17 }
 0x266   :  { %2254 = vmatmul.mubr.f32.gmra.mxu0 %v5086_v21  ;;  %2453 = vmatmul.mubr.f32.gmra.mxu1 %v5086_v21  ;;  %v2077_v21 = vld [vmem:[#allocation4 + $0x40] sm:$0xff] }
 0x267   :  { %3244 = vmatprep.mubr.msk.f32.mxu0 %vm771_vm3, %v1671_v49  ;;  %3279 = vmatprep.mubr.msk.f32.mxu1 %vm771_vm3, %v1671_v49  ;;  %vm2667_vm3 = vcmask 884352  }
 0x26a   :  { %2259 = vmatmul.mubr.f32.gmra.mxu0 %v5088_v22  ;;  %2458 = vmatmul.mubr.f32.gmra.mxu1 %v5088_v22 }
 0x284   :  { %v1801_v1 = vpop.f32.mrf.mxu0  ;;  %v1996_v61 = vpop.f32.mrf.mxu1 }
 0x285   :  { %v2066_v16 = vadd.f32 %v2065_v57, %v1996_v61 }
 0x286   :  { %v1802_v46 = vpop.f32.mrf.mxu0  ;;  %v1998_v47 = vpop.f32.mrf.mxu1 }
 0x287   :  { %2067 = vst.msk [vmem:[#allocation4] sm:$0xff] %vm1615_vm4, %v2066_v16  ;;  %v1890_v46 = vld [vmem:[#allocation4 + $0x78] sm:$0xff]  ;;  %v2089_v47 = vld [vmem:[#allocation4 + $0x80] sm:$0xff] }
 0x288   :  { %v1805_v23 = vpop.f32.mrf.mxu0  ;;  %v2001_v24 = vpop.f32.mrf.mxu1 }
 0x289   :  { %v1870_v39 = vadd.f32 %v1869_v6, %v1805_v23  ;;  %v2069_v40 = vadd.f32 %v2068_v7, %v2001_v24 }
 0x28a   :  { %v1807_v50 = vpop.f32.mrf.mxu0  ;;  %v2003_v2 = vpop.f32.mrf.mxu1 }
 0x28b   :  { %1871 = vst.msk [vmem:[#allocation4 + $0x8] sm:$0xff] %vm1615_vm4, %v1870_v39  ;;  %2070 = vst.msk [vmem:[#allocation4 + $0x10] sm:$0xff] %vm1615_vm4, %v2069_v40  ;;  %v1893_v50 = vld [vmem:[#allocation4 + $0x88] sm:$0xff]  ;;  %v2092_v2 = vld [vmem:[#allocation4 + $0x90] sm:$0xff] }
 0x28e   :  { %v2501_v15 = vld [vmem:[#allocation4] sm:$0xff] }
 0x28f   :  { %v2502_v51 = vsub.f32 0.0, %v2501_v15 }
 0x291   :  { %v2503_v53 = vmul.f32 1.442695, %v2502_v51 }
 0x293   :  { %3308 = vpow2.f32 %v2503_v53 }
 0x2a0   :  { %v3309_v54 = vpop.eup %3308 }
 0x2a1   :  { %v2505_v55 = vadd.f32 1.0, %v3309_v54 }
 0x2a3   :  { %3310 = vrcp.f32 %v2505_v55 }
 0x2b0   :  { %v3311_v56 = vpop.eup %3310 }
 0x2b1   :  { %2508 = vst.msk [vmem:[%s5413_s7] sm:$0xff] %vm1615_vm4, %v3311_v56 }
 0x2c3   :  { %v1810_v63 = vpop.f32.mrf.mxu0 }
 0x2c4   :  { %v2006_v9 = vpop.f32.mrf.mxu1  ;;  %v1873_v3 = vadd.f32 %v1872_v58, %v1810_v63  ;;  %v1896_v58 = vld [vmem:[#allocation4 + $0x98] sm:$0xff] }
 0x2c5   :  { %v2072_v8 = vadd.f32 %v2071_v59, %v2006_v9  ;;  %v1812_v11 = vpop.f32.mrf.mxu0  ;;  %v2095_v59 = vld [vmem:[#allocation4 + $0xa0] sm:$0xff] }
 0x2c6   :  { %v2008_v13 = vpop.f32.mrf.mxu1  ;;  %1874 = vst.msk [vmem:[#allocation4 + $0x18] sm:$0xff] %vm1615_vm4, %v1873_v3 }
 0x2c7   :  { %2073 = vst.msk [vmem:[#allocation4 + $0x20] sm:$0xff] %vm1615_vm4, %v2072_v8  ;;  %v1815_v28 = vpop.f32.mrf.mxu0 }
 0x2c8   :  { %v2011_v10 = vpop.f32.mrf.mxu1  ;;  %v1876_v5 = vadd.f32 %v1875_v12, %v1815_v28  ;;  %v1899_v12 = vld [vmem:[#allocation4 + $0xa8] sm:$0xff] }
 0x2c9   :  { %v2075_v48 = vadd.f32 %v2074_v27, %v2011_v10  ;;  %v1817_v18 = vpop.f32.mrf.mxu0  ;;  %v2098_v27 = vld [vmem:[#allocation4 + $0xb0] sm:$0xff] }
 0x2ca   :  { %v2013_v19 = vpop.f32.mrf.mxu1  ;;  %1877 = vst.msk [vmem:[#allocation4 + $0x28] sm:$0xff] %vm1615_vm4, %v1876_v5 }
 0x2cb   :  { %2076 = vst.msk [vmem:[#allocation4 + $0x30] sm:$0xff] %vm1615_vm4, %v2075_v48  ;;  %v1820_v22 = vpop.f32.mrf.mxu0 }
 0x2cc   :  { %v2016_v25 = vpop.f32.mrf.mxu1  ;;  %v1879_v26 = vadd.f32 %v1878_v20, %v1820_v22  ;;  %v1902_v20 = vld [vmem:[#allocation4 + $0xb8] sm:$0xff] }
 0x2cd   :  { %v2078_v29 = vadd.f32 %v2077_v21, %v2016_v25  ;;  %v1822_v30 = vpop.f32.mrf.mxu0  ;;  %v2101_v21 = vld [vmem:[#allocation4 + $0xc0] sm:$0xff] }
 0x2ce   :  { %v2018_v31 = vpop.f32.mrf.mxu1  ;;  %1880 = vst.msk [vmem:[#allocation4 + $0x38] sm:$0xff] %vm1615_vm4, %v1879_v26 }
 0x2cf   :  { %2079 = vst.msk [vmem:[#allocation4 + $0x40] sm:$0xff] %vm1615_vm4, %v2078_v29  ;;  %v1825_v0 = vpop.f32.mrf.mxu0 }
 0x2d0   :  { %v2021_v4 = vpop.f32.mrf.mxu1  ;;  %v1882_v60 = vadd.f32 %v1881_v32, %v1825_v0  ;;  %v1905_v32 = vld [vmem:[#allocation4 + $0xc8] sm:$0xff] }
 0x2d1   :  { %v2081_v34 = vadd.f32 %v2080_v33, %v2021_v4  ;;  %v1827_v35 = vpop.f32.mrf.mxu0  ;;  %v2104_v33 = vld [vmem:[#allocation4 + $0xd0] sm:$0xff] }
 0x2d2   :  { %v2023_v62 = vpop.f32.mrf.mxu1  ;;  %1883 = vst.msk [vmem:[#allocation4 + $0x48] sm:$0xff] %vm1615_vm4, %v1882_v60 }
 0x2d3   :  { %2082 = vst.msk [vmem:[#allocation4 + $0x50] sm:$0xff] %vm1615_vm4, %v2081_v34 }
 0x2d6   :  { %v1830_v38 = vpop.f32.mrf.mxu0  ;;  %v2026_v41 = vpop.f32.mrf.mxu1 }
 0x2d7   :  { %v1885_v42 = vadd.f32 %v1884_v36, %v1830_v38  ;;  %v2084_v52 = vadd.f32 %v2083_v37, %v2026_v41  ;;  %v2264_v37 = vld [vmem:[#allocation4 + $0x8] sm:$0xff]  ;;  %v2462_v41 = vld [vmem:[#allocation4 + $0x10] sm:$0xff] }
 0x2d8   :  { %v1832_v43 = vpop.f32.mrf.mxu0  ;;  %v2028_v44 = vpop.f32.mrf.mxu1 }
 0x2d9   :  { %1886 = vst.msk [vmem:[#allocation4 + $0x58] sm:$0xff] %vm1615_vm4, %v1885_v42  ;;  %2085 = vst.msk [vmem:[#allocation4 + $0x60] sm:$0xff] %vm1615_vm4, %v2084_v52 }
 0x2da   :  { %v1835_v17 = vpop.f32.mrf.mxu0  ;;  %v2031_v49 = vpop.f32.mrf.mxu1 }
 0x2db   :  { %v1888_v57 = vadd.f32 %v1887_v14, %v1835_v17  ;;  %v2087_v1 = vadd.f32 %v2086_v45, %v2031_v49  ;;  %v2267_v45 = vld [vmem:[#allocation4 + $0x18] sm:$0xff]  ;;  %v2465_v49 = vld [vmem:[#allocation4 + $0x20] sm:$0xff] }
 0x2dc   :  { %v1837_v61 = vpop.f32.mrf.mxu0  ;;  %v2033_v16 = vpop.f32.mrf.mxu1 }
 0x2dd   :  { %1889 = vst.msk [vmem:[#allocation4 + $0x68] sm:$0xff] %vm1615_vm4, %v1888_v57  ;;  %2088 = vst.msk [vmem:[#allocation4 + $0x70] sm:$0xff] %vm1615_vm4, %v2087_v1 }
 0x2de   :  { %v1840_v6 = vpop.f32.mrf.mxu0  ;;  %v2036_v7 = vpop.f32.mrf.mxu1 }
 0x2df   :  { %v1891_v23 = vadd.f32 %v1890_v46, %v1840_v6  ;;  %v2090_v24 = vadd.f32 %v2089_v47, %v2036_v7  ;;  %v2270_v47 = vld [vmem:[#allocation4 + $0x28] sm:$0xff]  ;;  %v2468_v7 = vld [vmem:[#allocation4 + $0x30] sm:$0xff] }
 0x2e0   :  { %v1842_v39 = vpop.f32.mrf.mxu0  ;;  %v2038_v40 = vpop.f32.mrf.mxu1 }
 0x2e1   :  { %1892 = vst.msk [vmem:[#allocation4 + $0x78] sm:$0xff] %vm1615_vm4, %v1891_v23  ;;  %2091 = vst.msk [vmem:[#allocation4 + $0x80] sm:$0xff] %vm1615_vm4, %v2090_v24 }
 0x2e2   :  { %v1845_v15 = vpop.f32.mrf.mxu0  ;;  %v2041_v51 = vpop.f32.mrf.mxu1 }
 0x2e3   :  { %v1894_v53 = vadd.f32 %v1893_v50, %v1845_v15  ;;  %v2093_v54 = vadd.f32 %v2092_v2, %v2041_v51 }
 0x2e4   :  { %v1847_v55 = vpop.f32.mrf.mxu0  ;;  %v2043_v56 = vpop.f32.mrf.mxu1 }
 0x2e5   :  { %1895 = vst.msk [vmem:[#allocation4 + $0x88] sm:$0xff] %vm1615_vm4, %v1894_v53  ;;  %2094 = vst.msk [vmem:[#allocation4 + $0x90] sm:$0xff] %vm1615_vm4, %v2093_v54  ;;  %v2273_v54 = vld [vmem:[#allocation4 + $0x38] sm:$0xff]  ;;  %v2471_v56 = vld [vmem:[#allocation4 + $0x40] sm:$0xff] }
 0x2e6   :  { %v1850_v63 = vpop.f32.mrf.mxu0  ;;  %v2046_v9 = vpop.f32.mrf.mxu1 }
 0x2e7   :  { %v1897_v3 = vadd.f32 %v1896_v58, %v1850_v63  ;;  %v2096_v8 = vadd.f32 %v2095_v59, %v2046_v9 }
 0x2e8   :  { %v1852_v11 = vpop.f32.mrf.mxu0  ;;  %v2048_v13 = vpop.f32.mrf.mxu1 }
 0x2e9   :  { %1898 = vst.msk [vmem:[#allocation4 + $0x98] sm:$0xff] %vm1615_vm4, %v1897_v3  ;;  %2097 = vst.msk [vmem:[#allocation4 + $0xa0] sm:$0xff] %vm1615_vm4, %v2096_v8 }
 0x2ea   :  { %v1855_v28 = vpop.f32.mrf.mxu0  ;;  %v2051_v10 = vpop.f32.mrf.mxu1 }
 0x2eb   :  { %v1900_v5 = vadd.f32 %v1899_v12, %v1855_v28  ;;  %v2099_v48 = vadd.f32 %v2098_v27, %v2051_v10  ;;  %v2276_v10 = vld [vmem:[#allocation4 + $0x48] sm:$0xff] }
 0x2ec   :  { %v1857_v18 = vpop.f32.mrf.mxu0  ;;  %v2053_v19 = vpop.f32.mrf.mxu1 }
 0x2ed   :  { %1901 = vst.msk [vmem:[#allocation4 + $0xa8] sm:$0xff] %vm1615_vm4, %v1900_v5  ;;  %2100 = vst.msk [vmem:[#allocation4 + $0xb0] sm:$0xff] %vm1615_vm4, %v2099_v48  ;;  %v2474_v48 = vld [vmem:[#allocation4 + $0x50] sm:$0xff] }
 0x2ee   :  { %v1860_v22 = vpop.f32.mrf.mxu0  ;;  %v2056_v25 = vpop.f32.mrf.mxu1 }
 0x2ef   :  { %v1903_v26 = vadd.f32 %v1902_v20, %v1860_v22  ;;  %v2102_v29 = vadd.f32 %v2101_v21, %v2056_v25 }
 0x2f0   :  { %v1862_v30 = vpop.f32.mrf.mxu0  ;;  %v2058_v31 = vpop.f32.mrf.mxu1 }
 0x2f1   :  { %1904 = vst.msk [vmem:[#allocation4 + $0xb8] sm:$0xff] %vm1615_vm4, %v1903_v26  ;;  %2103 = vst.msk [vmem:[#allocation4 + $0xc0] sm:$0xff] %vm1615_vm4, %v2102_v29 }
 0x2f2   :  { %v1865_v0 = vpop.f32.mrf.mxu0  ;;  %v2061_v4 = vpop.f32.mrf.mxu1 }
 0x2f3   :  { %v1906_v60 = vadd.f32 %v1905_v32, %v1865_v0  ;;  %v2105_v34 = vadd.f32 %v2104_v33, %v2061_v4  ;;  %v2279_v33 = vld [vmem:[#allocation4 + $0x58] sm:$0xff]  ;;  %v2477_v4 = vld [vmem:[#allocation4 + $0x60] sm:$0xff] }
 0x2f4   :  { %v1867_v35 = vpop.f32.mrf.mxu0  ;;  %v2063_v62 = vpop.f32.mrf.mxu1 }
 0x2f5   :  { %1907 = vst.msk [vmem:[#allocation4 + $0xc8] sm:$0xff] %vm1615_vm4, %v1906_v60  ;;  %2106 = vst.msk [vmem:[#allocation4 + $0xd0] sm:$0xff] %vm1615_vm4, %v2105_v34 }
 0x2f6   :  { %v2195_v36 = vpop.f32.mrf.mxu0  ;;  %v2394_v38 = vpop.f32.mrf.mxu1 }
 0x2f7   :  { %v2265_v42 = vadd.f32 %v2264_v37, %v2195_v36  ;;  %v2463_v52 = vadd.f32 %v2462_v41, %v2394_v38 }
 0x2f8   :  { %v2197_v43 = vpop.f32.mrf.mxu0  ;;  %v2396_v44 = vpop.f32.mrf.mxu1 }
 0x2f9   :  { %2266 = vst.msk [vmem:[#allocation4 + $0x8] sm:$0xff] %vm1615_vm4, %v2265_v42  ;;  %2464 = vst.msk [vmem:[#allocation4 + $0x10] sm:$0xff] %vm1615_vm4, %v2463_v52  ;;  %v2282_v44 = vld [vmem:[#allocation4 + $0x68] sm:$0xff] }
 0x2fa   :  { %v2200_v14 = vpop.f32.mrf.mxu0  ;;  %v2399_v17 = vpop.f32.mrf.mxu1 }
 0x2fb   :  { %v2268_v57 = vadd.f32 %v2267_v45, %v2200_v14  ;;  %v2466_v1 = vadd.f32 %v2465_v49, %v2399_v17  ;;  %v2480_v45 = vld [vmem:[#allocation4 + $0x70] sm:$0xff] }
 0x2fc   :  { %v2202_v61 = vpop.f32.mrf.mxu0  ;;  %v2401_v16 = vpop.f32.mrf.mxu1 }
 0x2fd   :  { %2269 = vst.msk [vmem:[#allocation4 + $0x18] sm:$0xff] %vm1615_vm4, %v2268_v57  ;;  %2467 = vst.msk [vmem:[#allocation4 + $0x20] sm:$0xff] %vm1615_vm4, %v2466_v1 }
 0x2fe   :  { %v2205_v46 = vpop.f32.mrf.mxu0  ;;  %v2404_v6 = vpop.f32.mrf.mxu1 }
 0x2ff   :  { %v2271_v23 = vadd.f32 %v2270_v47, %v2205_v46  ;;  %v2469_v24 = vadd.f32 %v2468_v7, %v2404_v6 }
 0x300   :  { %v2207_v39 = vpop.f32.mrf.mxu0  ;;  %v2406_v40 = vpop.f32.mrf.mxu1  ;;  %v2509_v50 = vld [vmem:[#allocation4 + $0x8] sm:$0xff]  ;;  %v2522_v2 = vld [vmem:[#allocation4 + $0x10] sm:$0xff] }
 0x301   :  { %2272 = vst.msk [vmem:[#allocation4 + $0x28] sm:$0xff] %vm1615_vm4, %v2271_v23  ;;  %2470 = vst.msk [vmem:[#allocation4 + $0x30] sm:$0xff] %vm1615_vm4, %v2469_v24  ;;  %v2510_v15 = vsub.f32 0.0, %v2509_v50  ;;  %v2523_v51 = vsub.f32 0.0, %v2522_v2  ;;  %v2285_v39 = vld [vmem:[#allocation4 + $0x78] sm:$0xff]  ;;  %v2483_v50 = vld [vmem:[#allocation4 + $0x80] sm:$0xff] }
 0x302   :  { %v2210_v53 = vpop.f32.mrf.mxu0  ;;  %v2409_v55 = vpop.f32.mrf.mxu1 }
 0x303   :  { %v2274_v58 = vadd.f32 %v2273_v54, %v2210_v53  ;;  %v2472_v59 = vadd.f32 %v2471_v56, %v2409_v55  ;;  %v2511_v63 = vmul.f32 1.442695, %v2510_v15  ;;  %v2524_v9 = vmul.f32 1.442695, %v2523_v51 }
 0x304   :  { %v2212_v3 = vpop.f32.mrf.mxu0  ;;  %v2411_v8 = vpop.f32.mrf.mxu1  ;;  %v2548_v11 = vld [vmem:[#allocation4 + $0x20] sm:$0xff]  ;;  %v2535_v13 = vld [vmem:[#allocation4 + $0x18] sm:$0xff] }
 0x305   :  { %2275 = vst.msk [vmem:[#allocation4 + $0x38] sm:$0xff] %vm1615_vm4, %v2274_v58  ;;  %2473 = vst.msk [vmem:[#allocation4 + $0x40] sm:$0xff] %vm1615_vm4, %v2472_v59  ;;  %3312 = vpow2.f32 %v2511_v63  ;;  %v2549_v12 = vsub.f32 0.0, %v2548_v11  ;;  %v2536_v27 = vsub.f32 0.0, %v2535_v13  ;;  %v2288_v13 = vld [vmem:[#allocation4 + $0x88] sm:$0xff] }
 0x306   :  { %v2215_v28 = vpop.f32.mrf.mxu0  ;;  %v2414_v5 = vpop.f32.mrf.mxu1  ;;  %3314 = vpow2.f32 %v2524_v9 }
 0x307   :  { %v2277_v18 = vadd.f32 %v2276_v10, %v2215_v28  ;;  %v2475_v19 = vadd.f32 %v2474_v48, %v2414_v5  ;;  %v2550_v20 = vmul.f32 1.442695, %v2549_v12  ;;  %v2537_v21 = vmul.f32 1.442695, %v2536_v27  ;;  %v2486_v27 = vld [vmem:[#allocation4 + $0x90] sm:$0xff] }
 0x308   :  { %v2217_v22 = vpop.f32.mrf.mxu0  ;;  %v2416_v25 = vpop.f32.mrf.mxu1  ;;  %v2563_v26 = vld [vmem:[#allocation4 + $0x28] sm:$0xff]  ;;  %v2576_v29 = vld [vmem:[#allocation4 + $0x30] sm:$0xff] }
 0x309   :  { %2278 = vst.msk [vmem:[#allocation4 + $0x48] sm:$0xff] %vm1615_vm4, %v2277_v18  ;;  %2476 = vst.msk [vmem:[#allocation4 + $0x50] sm:$0xff] %vm1615_vm4, %v2475_v19  ;;  %3316 = vpow2.f32 %v2550_v20  ;;  %v2564_v30 = vsub.f32 0.0, %v2563_v26  ;;  %v2577_v31 = vsub.f32 0.0, %v2576_v29 }
 0x30a   :  { %v2220_v32 = vpop.f32.mrf.mxu0  ;;  %v2419_v0 = vpop.f32.mrf.mxu1  ;;  %3318 = vpow2.f32 %v2537_v21 }
 0x30b   :  { %v2280_v60 = vadd.f32 %v2279_v33, %v2220_v32  ;;  %v2478_v34 = vadd.f32 %v2477_v4, %v2419_v0  ;;  %v2565_v35 = vmul.f32 1.442695, %v2564_v30  ;;  %v2578_v62 = vmul.f32 1.442695, %v2577_v31  ;;  %v2291_v32 = vld [vmem:[#allocation4 + $0x98] sm:$0xff]  ;;  %v2489_v0 = vld [vmem:[#allocation4 + $0xa0] sm:$0xff] }
 0x30c   :  { %v2222_v36 = vpop.f32.mrf.mxu0  ;;  %v2421_v37 = vpop.f32.mrf.mxu1  ;;  %v2589_v38 = vld [vmem:[#allocation4 + $0x38] sm:$0xff]  ;;  %v2602_v41 = vld [vmem:[#allocation4 + $0x40] sm:$0xff] }
 0x30d   :  { %2281 = vst.msk [vmem:[#allocation4 + $0x58] sm:$0xff] %vm1615_vm4, %v2280_v60  ;;  %2479 = vst.msk [vmem:[#allocation4 + $0x60] sm:$0xff] %vm1615_vm4, %v2478_v34  ;;  %3320 = vpow2.f32 %v2565_v35  ;;  %v2590_v42 = vsub.f32 0.0, %v2589_v38  ;;  %v2603_v52 = vsub.f32 0.0, %v2602_v41 }
 0x30e   :  { %v2225_v43 = vpop.f32.mrf.mxu0  ;;  %v2424_v14 = vpop.f32.mrf.mxu1  ;;  %3322 = vpow2.f32 %v2578_v62 }
 0x30f   :  { %v2283_v17 = vadd.f32 %v2282_v44, %v2225_v43  ;;  %v2481_v49 = vadd.f32 %v2480_v45, %v2424_v14  ;;  %v2591_v57 = vmul.f32 1.442695, %v2590_v42  ;;  %v2604_v1 = vmul.f32 1.442695, %v2603_v52 }
 0x310   :  { %v2227_v61 = vpop.f32.mrf.mxu0  ;;  %v2426_v16 = vpop.f32.mrf.mxu1  ;;  %v2615_v46 = vld [vmem:[#allocation4 + $0x48] sm:$0xff]  ;;  %v2630_v47 = vld [vmem:[#allocation4 + $0x50] sm:$0xff] }
 0x311   :  { %2284 = vst.msk [vmem:[#allocation4 + $0x68] sm:$0xff] %vm1615_vm4, %v2283_v17  ;;  %2482 = vst.msk [vmem:[#allocation4 + $0x70] sm:$0xff] %vm1615_vm4, %v2481_v49  ;;  %3324 = vpow2.f32 %v2591_v57  ;;  %v2616_v6 = vsub.f32 0.0, %v2615_v46  ;;  %v2631_v7 = vsub.f32 0.0, %v2630_v47  ;;  %v2294_v49 = vld [vmem:[#allocation4 + $0xa8] sm:$0xff] }
 0x312   :  { %v3313_v23 = vpop.eup %3312  ;;  %v2230_v24 = vpop.f32.mrf.mxu0  ;;  %3326 = vpow2.f32 %v2604_v1  ;;  %v2492_v1 = vld [vmem:[#allocation4 + $0xb0] sm:$0xff] }
 0x313   :  { %v2429_v40 = vpop.f32.mrf.mxu1  ;;  %v3315_v2 = vpop.eup %3314  ;;  %v2286_v15 = vadd.f32 %v2285_v39, %v2230_v24  ;;  %v2513_v53 = vadd.f32 1.0, %v3313_v23  ;;  %v2617_v54 = vmul.f32 1.442695, %v2616_v6  ;;  %v2632_v59 = vmul.f32 1.442695, %v2631_v7 }
 0x314   :  { %v2484_v51 = vadd.f32 %v2483_v50, %v2429_v40  ;;  %v2232_v55 = vpop.f32.mrf.mxu0  ;;  %v2526_v58 = vadd.f32 1.0, %v3315_v2  ;;  %v2643_v63 = vld [vmem:[#allocation4 + $0x58] sm:$0xff]  ;;  %v2656_v3 = vld [vmem:[#allocation4 + $0x60] sm:$0xff] }
 0x315   :  { %v2431_v56 = vpop.f32.mrf.mxu1  ;;  %2287 = vst.msk [vmem:[#allocation4 + $0x78] sm:$0xff] %vm1615_vm4, %v2286_v15  ;;  %3328 = vrcp.f32 %v2513_v53  ;;  %v2644_v9 = vsub.f32 0.0, %v2643_v63  ;;  %v2657_v25 = vsub.f32 0.0, %v2656_v3 }
 0x316   :  { %2485 = vst.msk [vmem:[#allocation4 + $0x80] sm:$0xff] %vm1615_vm4, %v2484_v51  ;;  %v3317_v8 = vpop.eup %3316  ;;  %v2235_v11 = vpop.f32.mrf.mxu0  ;;  %3330 = vrcp.f32 %v2526_v58  ;;  %v2495_v56 = vld [vmem:[#allocation4 + $0xc0] sm:$0xff] }
 0x317   :  { %v2434_v12 = vpop.f32.mrf.mxu1  ;;  %v3319_v28 = vpop.eup %3318  ;;  %v2289_v10 = vadd.f32 %v2288_v13, %v2235_v11  ;;  %v2552_v48 = vadd.f32 1.0, %v3317_v8  ;;  %3332 = vpow2.f32 %v2617_v54  ;;  %v2645_v22 = vmul.f32 1.442695, %v2644_v9  ;;  %v2297_v54 = vld [vmem:[#allocation4 + $0xb8] sm:$0xff] }
 0x318   :  { %v2487_v5 = vadd.f32 %v2486_v27, %v2434_v12  ;;  %v2237_v18 = vpop.f32.mrf.mxu0  ;;  %v2539_v20 = vadd.f32 1.0, %v3319_v28  ;;  %3334 = vpow2.f32 %v2632_v59  ;;  %v2684_v21 = vld [vmem:[#allocation4 + $0x70] sm:$0xff]  ;;  %v2669_v29 = vld [vmem:[#allocation4 + $0x68] sm:$0xff]  ;;  %v2658_v41 = vmul.f32 1.442695, %v2657_v25 }
 0x319   :  { %v2436_v19 = vpop.f32.mrf.mxu1  ;;  %2290 = vst.msk [vmem:[#allocation4 + $0x88] sm:$0xff] %vm1615_vm4, %v2289_v10  ;;  %3336 = vrcp.f32 %v2552_v48  ;;  %v2685_v26 = vsub.f32 0.0, %v2684_v21  ;;  %v2670_v52 = vsub.f32 0.0, %v2669_v29  ;;  %v2300_v21 = vld [vmem:[#allocation4 + $0xc8] sm:$0xff]  ;;  %v2498_v25 = vld [vmem:[#allocation4 + $0xd0] sm:$0xff] }
 0x31a   :  { %2488 = vst.msk [vmem:[#allocation4 + $0x90] sm:$0xff] %vm1615_vm4, %v2487_v5  ;;  %v3321_v30 = vpop.eup %3320  ;;  %v2240_v31 = vpop.f32.mrf.mxu0  ;;  %3338 = vrcp.f32 %v2539_v20 }
 0x31b   :  { %v2439_v33 = vpop.f32.mrf.mxu1  ;;  %v3323_v4 = vpop.eup %3322  ;;  %v2292_v60 = vadd.f32 %v2291_v32, %v2240_v31  ;;  %v2567_v35 = vadd.f32 1.0, %v3321_v30  ;;  %v2686_v62 = vmul.f32 1.442695, %v2685_v26  ;;  %3340 = vpow2.f32 %v2645_v22  ;;  %v2303_v32 = vld [vmem:[#allocation4 + $0xd8] sm:$0xff] }
 0x31c   :  { %v2490_v34 = vadd.f32 %v2489_v0, %v2439_v33  ;;  %v2242_v36 = vpop.f32.mrf.mxu0  ;;  %v2580_v38 = vadd.f32 1.0, %v3323_v4  ;;  %v2697_v42 = vld [vmem:[#allocation4 + $0x78] sm:$0xff]  ;;  %v2671_v39 = vmul.f32 1.442695, %v2670_v52 }
 0x31d   :  { %v2441_v37 = vpop.f32.mrf.mxu1  ;;  %v2710_v43 = vld [vmem:[#allocation4 + $0x80] sm:$0xff]  ;;  %2293 = vst.msk [vmem:[#allocation4 + $0x98] sm:$0xff] %vm1615_vm4, %v2292_v60  ;;  %3342 = vrcp.f32 %v2567_v35  ;;  %v2698_v44 = vsub.f32 0.0, %v2697_v42 }
 0x31e   :  { %2491 = vst.msk [vmem:[#allocation4 + $0xa0] sm:$0xff] %vm1615_vm4, %v2490_v34  ;;  %v2711_v14 = vsub.f32 0.0, %v2710_v43  ;;  %v3325_v45 = vpop.eup %3324  ;;  %v2245_v17 = vpop.f32.mrf.mxu0  ;;  %3344 = vrcp.f32 %v2580_v38 }
 0x31f   :  { %v2444_v57 = vpop.f32.mrf.mxu1  ;;  %v3327_v61 = vpop.eup %3326  ;;  %v2295_v16 = vadd.f32 %v2294_v49, %v2245_v17  ;;  %v2593_v47 = vadd.f32 1.0, %v3325_v45  ;;  %3346 = vpow2.f32 %v2686_v62  ;;  %v2699_v24 = vmul.f32 1.442695, %v2698_v44 }
 0x320   :  { %v2493_v46 = vadd.f32 %v2492_v1, %v2444_v57  ;;  %v2247_v6 = vpop.f32.mrf.mxu0  ;;  %v2606_v23 = vadd.f32 1.0, %v3327_v61  ;;  %3348 = vpow2.f32 %v2658_v41  ;;  %v2712_v50 = vmul.f32 1.442695, %v2711_v14  ;;  %v2723_v15 = vld [vmem:[#allocation4 + $0x88] sm:$0xff] }
 0x321   :  { %v2446_v7 = vpop.f32.mrf.mxu1  ;;  %v2736_v40 = vld [vmem:[#allocation4 + $0x90] sm:$0xff]  ;;  %2296 = vst.msk [vmem:[#allocation4 + $0xa8] sm:$0xff] %vm1615_vm4, %v2295_v16  ;;  %3350 = vrcp.f32 %v2593_v47  ;;  %v2724_v58 = vsub.f32 0.0, %v2723_v15 }
 0x322   :  { %2494 = vst.msk [vmem:[#allocation4 + $0xb0] sm:$0xff] %vm1615_vm4, %v2493_v46  ;;  %v2737_v2 = vsub.f32 0.0, %v2736_v40  ;;  %v3329_v51 = vpop.eup %3328  ;;  %v2250_v53 = vpop.f32.mrf.mxu0  ;;  %3352 = vrcp.f32 %v2606_v23 }
 0x323   :  { %v2449_v55 = vpop.f32.mrf.mxu1  ;;  %v3331_v59 = vpop.eup %3330  ;;  %v2298_v63 = vadd.f32 %v2297_v54, %v2250_v53  ;;  %2517 = vrot.lane.b32.xlu0 %v3329_v51, %s3422_s23  ;;  %3354 = vpow2.f32 %v2699_v24  ;;  %v2725_v12 = vmul.f32 1.442695, %v2724_v58 }
 0x324   :  { %v2496_v9 = vadd.f32 %v2495_v56, %v2449_v55  ;;  %v2738_v3 = vmul.f32 1.442695, %v2737_v2  ;;  %v3333_v8 = vpop.eup %3332  ;;  %v2252_v11 = vpop.f32.mrf.mxu0  ;;  %3356 = vpow2.f32 %v2671_v39  ;;  %v2751_v27 = vld [vmem:[#allocation4 + $0x98] sm:$0xff] }
 0x325   :  { %v2451_v13 = vpop.f32.mrf.mxu1  ;;  %v2764_v28 = vld [vmem:[#allocation4 + $0xa0] sm:$0xff]  ;;  %v3335_v10 = vpop.eup %3334  ;;  %2299 = vst.msk [vmem:[#allocation4 + $0xb8] sm:$0xff] %vm1615_vm4, %v2298_v63  ;;  %v2619_v5 = vadd.f32 1.0, %v3333_v8  ;;  %3358 = vpow2.f32 %v2712_v50  ;;  %v2752_v48 = vsub.f32 0.0, %v2751_v27 }
 0x326   :  { %2497 = vst.msk [vmem:[#allocation4 + $0xc0] sm:$0xff] %vm1615_vm4, %v2496_v9  ;;  %v2765_v18 = vsub.f32 0.0, %v2764_v28  ;;  %v3337_v19 = vpop.eup %3336  ;;  %v2255_v20 = vpop.f32.mrf.mxu0  ;;  %v2634_v26 = vadd.f32 1.0, %v3335_v10  ;;  %3360 = vpow2.f32 %v2738_v3 }
 0x327   :  { %v2454_v22 = vpop.f32.mrf.mxu1  ;;  %v3339_v29 = vpop.eup %3338  ;;  %v2301_v30 = vadd.f32 %v2300_v21, %v2255_v20  ;;  %2530 = vrot.lane.b32.xlu0 %v3331_v59, %s3423_s24  ;;  %3362 = vrcp.f32 %v2619_v5  ;;  %v2753_v33 = vmul.f32 1.442695, %v2752_v48 }
 0x328   :  { %v2499_v31 = vadd.f32 %v2498_v25, %v2454_v22  ;;  %v2257_v0 = vpop.f32.mrf.mxu0  ;;  %3364 = vrcp.f32 %v2634_v26  ;;  %v2766_v34 = vmul.f32 1.442695, %v2765_v18  ;;  %v2777_v35 = vld [vmem:[#allocation4 + $0xa8] sm:$0xff]  ;;  %v3341_v62 = vpop.eup %3340 }
 0x329   :  { %v2456_v4 = vpop.f32.mrf.mxu1  ;;  %v2790_v60 = vld [vmem:[#allocation4 + $0xb0] sm:$0xff]  ;;  %2302 = vst.msk [vmem:[#allocation4 + $0xc8] sm:$0xff] %vm1615_vm4, %v2301_v30  ;;  %3366 = vpow2.f32 %v2725_v12  ;;  %v2778_v37 = vsub.f32 0.0, %v2777_v35  ;;  %v2647_v52 = vadd.f32 1.0, %v3341_v62 }
 0x32a   :  { %2500 = vst.msk [vmem:[#allocation4 + $0xd0] sm:$0xff] %vm1615_vm4, %v2499_v31  ;;  %v2791_v36 = vsub.f32 0.0, %v2790_v60  ;;  %v3343_v38 = vpop.eup %3342  ;;  %v2260_v41 = vpop.f32.mrf.mxu0  ;;  %3368 = vpow2.f32 %v2753_v33 }
 0x32b   :  { %v2459_v42 = vpop.f32.mrf.mxu1  ;;  %v3345_v43 = vpop.eup %3344  ;;  %v2304_v44 = vadd.f32 %v2303_v32, %v2260_v41  ;;  %2556 = vrot.lane.b32.xlu0 %v3337_v19, %s3424_s4  ;;  %2571 = vrot.lane.b32.xlu1 %v3343_v38, %s3425_s25  ;;  %3370 = vpow2.f32 %v2766_v34  ;;  %v2779_v45 = vmul.f32 1.442695, %v2778_v37 }
 0x32c   :  { %v2792_v14 = vmul.f32 1.442695, %v2791_v36  ;;  %v3347_v17 = vpop.eup %3346  ;;  %v2262_v49 = vpop.f32.mrf.mxu0  ;;  %3372 = vrcp.f32 %v2647_v52  ;;  %v2805_v1 = vld [vmem:[#allocation4 + $0xb8] sm:$0xff] }
 0x32d   :  { %v2460_v57 = vpop.f32.mrf.mxu1  ;;  %v2818_v61 = vld [vmem:[#allocation4 + $0xc0] sm:$0xff]  ;;  %v3349_v16 = vpop.eup %3348  ;;  %2305 = vst.msk [vmem:[#allocation4 + $0xd8] sm:$0xff] %vm1615_vm4, %v2304_v44  ;;  %v2688_v46 = vadd.f32 1.0, %v3347_v17  ;;  %v2806_v47 = vsub.f32 0.0, %v2805_v1  ;;  %vm2680_vm4 = vcmask 1048416  }
 0x32e   :  { %3374 = vpow2.f32 %v2792_v14  ;;  %v2819_v6 = vsub.f32 0.0, %v2818_v61  ;;  %v3351_v7 = vpop.eup %3350  ;;  %v2660_v23 = vadd.f32 1.0, %v3349_v16 }
 0x32f   :  { %3376 = vpow2.f32 %v2779_v45  ;;  %v3353_v24 = vpop.eup %3352  ;;  %2543 = vrot.lane.b32.xlu0 %v3339_v29, %s3426_s26  ;;  %2584 = vrot.lane.b32.xlu1 %v3345_v43, %s3427_s27  ;;  %v2807_v39 = vmul.f32 1.442695, %v2806_v47 }
 0x330   :  { %3378 = vrcp.f32 %v2688_v46  ;;  %v2820_v40 = vmul.f32 1.442695, %v2819_v6  ;;  %v3355_v50 = vpop.eup %3354  ;;  %v2831_v2 = vld [vmem:[#allocation4 + $0xc8] sm:$0xff] }
 0x331   :  { %3380 = vrcp.f32 %v2660_v23  ;;  %v2844_v15 = vld [vmem:[#allocation4 + $0xd0] sm:$0xff]  ;;  %v3357_v51 = vpop.eup %3356  ;;  %v2701_v53 = vadd.f32 1.0, %v3355_v50  ;;  %v2832_v54 = vsub.f32 0.0, %v2831_v2 }
 0x332   :  { %3382 = vpow2.f32 %v2807_v39  ;;  %v3359_v55 = vpop.eup %3358  ;;  %v2673_v56 = vadd.f32 1.0, %v3357_v51  ;;  %v2845_v58 = vsub.f32 0.0, %v2844_v15 }
 0x333   :  { %3384 = vpow2.f32 %v2820_v40  ;;  %v3361_v59 = vpop.eup %3360  ;;  %2597 = vrot.lane.b32.xlu1 %v3351_v7, %s3428_s28  ;;  %v2714_v63 = vadd.f32 1.0, %v3359_v55  ;;  %v2833_v9 = vmul.f32 1.442695, %v2832_v54 }
 0x334   :  { %3386 = vrcp.f32 %v2701_v53  ;;  %v3363_v3 = vpop.eup %3362  ;;  %v2857_v8 = vld [vmem:[#allocation4 + $0xd8] sm:$0xff]  ;;  %v2740_v13 = vadd.f32 1.0, %v3361_v59  ;;  %v2846_v28 = vmul.f32 1.442695, %v2845_v58 }
 0x335   :  { %v3365_v11 = vpop.eup %3364  ;;  %2623 = vrot.lane.b32.xlu0 %v3363_v3, %s3429_s29  ;;  %3388 = vrcp.f32 %v2673_v56  ;;  %v2858_v12 = vsub.f32 0.0, %v2857_v8 }
 0x336   :  { %v3367_v27 = vpop.eup %3366  ;;  %3390 = vrcp.f32 %v2714_v63 }
 0x337   :  { %v3369_v10 = vpop.eup %3368  ;;  %2610 = vrot.lane.b32.xlu1 %v3353_v24, %s3430_s30  ;;  %v2727_v5 = vadd.f32 1.0, %v3367_v27  ;;  %3392 = vpow2.f32 %v2833_v9  ;;  %v2859_v18 = vmul.f32 1.442695, %v2858_v12 }
 0x338   :  { %v3371_v48 = vpop.eup %3370  ;;  %3394 = vrcp.f32 %v2740_v13  ;;  %v2755_v25 = vadd.f32 1.0, %v3369_v10 }
 0x339   :  { %v3373_v19 = vpop.eup %3372  ;;  %2638 = vrot.lane.b32.xlu0 %v3365_v11, %s3431_s8  ;;  %3396 = vpow2.f32 %v2846_v28  ;;  %v2768_v32 = vadd.f32 1.0, %v3371_v48 }
 0x33a   :  { %3398 = vrcp.f32 %v2727_v5 }
 0x33b   :  { %v3375_v20 = vpop.eup %3374  ;;  %3400 = vpow2.f32 %v2859_v18 }
 0x33c   :  { %v3377_v21 = vpop.eup %3376  ;;  %v2794_v22 = vadd.f32 1.0, %v3375_v20 }
 0x33d   :  { %v3379_v26 = vpop.eup %3378  ;;  %2651 = vrot.lane.b32.xlu0 %v3373_v19, %s3433_s9  ;;  %v2781_v60 = vadd.f32 1.0, %v3377_v21 }
 0x33e   :  { %v3381_v29 = vpop.eup %3380  ;;  %2692 = vrot.lane.b32.xlu1 %v3379_v26, %s3432_s0  ;;  %3402 = vrcp.f32 %v2794_v22 }
 0x33f   :  { %v3383_v30 = vpop.eup %3382  ;;  %3404 = vrcp.f32 %v2755_v25 }
 0x340   :  { %v3385_v31 = vpop.eup %3384  ;;  %v2809_v33 = vadd.f32 1.0, %v3383_v30 }
 0x341   :  { %v3387_v0 = vpop.eup %3386  ;;  %2664 = vrot.lane.b32.xlu0 %v3381_v29, %s3434_s10  ;;  %v2822_v35 = vadd.f32 1.0, %v3385_v31 }
 0x342   :  { %2705 = vrot.lane.b32.xlu1 %v3387_v0, %s3435_s11  ;;  %3406 = vrcp.f32 %v2809_v33  ;;  %v3389_v4 = vpop.eup %3388 }
 0x343   :  { %v3391_v34 = vpop.eup %3390  ;;  %3408 = vrcp.f32 %v2768_v32 }
 0x344   :  { %v3393_v62 = vpop.eup %3392  ;;  %3410 = vrcp.f32 %v2781_v60 }
 0x345   :  { %2677 = vrot.lane.b32.xlu0 %v3389_v4, %s3436_s1  ;;  %v3395_v36 = vpop.eup %3394  ;;  %3412 = vrcp.f32 %v2822_v35  ;;  %v2835_v38 = vadd.f32 1.0, %v3393_v62 }
 0x346   :  { %2718 = vrot.lane.b32.xlu1 %v3391_v34, %s3437_s12  ;;  %v3397_v37 = vpop.eup %3396 }
 0x347   :  { %v3399_v41 = vpop.eup %3398  ;;  %3414 = vrcp.f32 %v2835_v38  ;;  %v2848_v44 = vadd.f32 1.0, %v3397_v37 }
 0x348   :  { %v3401_v42 = vpop.eup %3400 }
 0x349   :  { %2744 = vrot.lane.b32.xlu0 %v3395_v36, %s3438_s13  ;;  %v2861_v43 = vadd.f32 1.0, %v3401_v42 }
 0x34a   :  { %2731 = vrot.lane.b32.xlu1 %v3399_v41, %s3439_s2 }
 0x34b   :  { %v3403_v52 = vpop.eup %3402  ;;  %3416 = vrcp.f32 %v2861_v43 }
 0x34c   :  { %v3405_v14 = vpop.eup %3404  ;;  %3418 = vrcp.f32 %v2848_v44 }
 0x34d   :  { %2759 = vrot.lane.b32.xlu0 %v3405_v14, %s3441_s15 }
 0x34e   :  { %2798 = vrot.lane.b32.xlu1 %v3403_v52, %s3440_s14 }
 0x34f   :  { %v3407_v45 = vpop.eup %3406 }
 0x350   :  { %v3409_v17 = vpop.eup %3408 }
 0x351   :  { %2772 = vrot.lane.b32.xlu0 %v3409_v17, %s3442_s16  ;;  %v3411_v49 = vpop.eup %3410 }
 0x352   :  { %2813 = vrot.lane.b32.xlu1 %v3407_v45, %s3443_s17  ;;  %v3413_v57 = vpop.eup %3412 }
 0x354   :  { %v3415_v1 = vpop.eup %3414 }
 0x355   :  { %2785 = vrot.lane.b32.xlu0 %v3411_v49, %s3444_s18 }
 0x356   :  { %2826 = vrot.lane.b32.xlu1 %v3413_v57, %s3445_s19 }
 0x358   :  { %v3417_v61 = vpop.eup %3416 }
 0x359   :  { %2865 = vrot.lane.b32.xlu0 %v3417_v61, %s3447_s21  ;;  %v3419_v16 = vpop.eup %3418 }
 0x35a   :  { %2839 = vrot.lane.b32.xlu1 %v3415_v1, %s3446_s20 }
 0x35e   :  { %2852 = vrot.lane.b32.xlu1 %v3419_v16, %s3448_s5 }
 0x395   :  { %v2518_v46 = vpop.permute.xlu0 %2517 }
 0x396   :  { %2521 = vst.msk [vmem:[%s5413_s7] sm:$0xff] %vm2520_vm5, %v2518_v46  ;;  %vm2682_vm5 = vcmask 64512  }
 0x399   :  { %v2531_v47 = vpop.permute.xlu0 %2530 }
 0x39a   :  { %2534 = vst.msk [vmem:[%s5413_s7] sm:$0xff] %vm2533_vm6, %v2531_v47  ;;  %vm2695_vm6 = vcmask 293952  }
 0x39d   :  { %v2557_v6 = vpop.permute.xlu0 %2556  ;;  %v2572_v7 = vpop.permute.xlu1 %2571 }
 0x39e   :  { %2562 = vst.msk [vmem:[%s5413_s7 + $0x8] sm:$0xff] %vm2561_vm7, %v2557_v6  ;;  %vm2708_vm7 = vcmask 523552  }
 0x39f   :  { %2575 = vst.msk [vmem:[%s5413_s7 + $0x8] sm:$0xff] %vm2574_vm8, %v2572_v7  ;;  %vm2721_vm8 = vcmask 753152  }
 0x3a1   :  { %v2544_v23 = vpop.permute.xlu0 %2543  ;;  %v2585_v24 = vpop.permute.xlu1 %2584 }
 0x3a2   :  { %2547 = vst.msk [vmem:[%s5413_s7] sm:$0xff] %vm2546_vm9, %v2544_v23  ;;  %vm2749_vm9 = vcmask 162816  }
 0x3a3   :  { %2588 = vst.msk [vmem:[%s5413_s7 + $0x8] sm:$0xff] %vm2587_vm10, %v2585_v24  ;;  %vm2734_vm10 = vcmask 982752  }
 0x3a4   :  { %2560 = vst.msk [vmem:[%s5413_s7] sm:$0xff] %vm2559_vm11, %v2557_v6  ;;  %vm2747_vm11 = vcmask 1048512  }
 0x3a5   :  { %v2598_v39 = vpop.permute.xlu1 %2597 }
 0x3a6   :  { %2601 = vst.msk [vmem:[%s5413_s7 + $0x8] sm:$0xff] %vm2600_vm12, %v2598_v39  ;;  %vm2803_vm12 = vcmask 31744  }
 0x3a7   :  { %v2624_v40 = vpop.permute.xlu0 %2623 }
 0x3a8   :  { %2629 = vst.msk [vmem:[%s5413_s7 + $0x10] sm:$0xff] %vm2628_vm13, %v2624_v40  ;;  %vm2762_vm13 = vcmask 392352  }
 0x3a9   :  { %v2611_v50 = vpop.permute.xlu1 %2610 }
 0x3aa   :  { %2614 = vst.msk [vmem:[%s5413_s7 + $0x8] sm:$0xff] %vm2613_vm14, %v2611_v50  ;;  %vm2775_vm14 = vcmask 621952  }
 0x3ab   :  { %2627 = vst.msk [vmem:[%s5413_s7 + $0x8] sm:$0xff] %vm2626_vm15, %v2624_v40  ;;  %v2639_v2 = vpop.permute.xlu0 %2638  ;;  %vm2816_vm15 = vcmask 261152  }
 0x3ac   :  { %2642 = vst.msk [vmem:[%s5413_s7 + $0x10] sm:$0xff] %vm2641_vm0, %v2639_v2  ;;  %vm2788_vm0 = vcmask 851552  }
 0x3af   :  { %v2652_v51 = vpop.permute.xlu0 %2651 }
 0x3b0   :  { %v2693_v15 = vpop.permute.xlu1 %2692  ;;  %2655 = vst.msk [vmem:[%s5413_s7 + $0x10] sm:$0xff] %vm2654_vm1, %v2652_v51  ;;  %vm2829_vm1 = vcmask 490752  }
 0x3b3   :  { %v2665_v53 = vpop.permute.xlu0 %2664 }
 0x3b4   :  { %v2706_v54 = vpop.permute.xlu1 %2705  ;;  %2668 = vst.msk [vmem:[%s5413_s7 + $0x10] sm:$0xff] %vm2667_vm3, %v2665_v53  ;;  %vm2801_vm3 = vcmask 1048384  }
 0x3b7   :  { %v2678_v55 = vpop.permute.xlu0 %2677 }
 0x3b8   :  { %v2719_v56 = vpop.permute.xlu1 %2718  ;;  %2681 = vst.msk [vmem:[%s5413_s7 + $0x10] sm:$0xff] %vm2680_vm4, %v2678_v55  ;;  %vm2842_vm4 = vcmask 720352  }
 0x3b9   :  { %2683 = vst.msk [vmem:[%s5413_s7 + $0x18] sm:$0xff] %vm2682_vm5, %v2678_v55  ;;  %vm2855_vm5 = vcmask 949952  }
 0x3ba   :  { %2696 = vst.msk [vmem:[%s5413_s7 + $0x18] sm:$0xff] %vm2695_vm6, %v2693_v15  ;;  %vm2868_vm6 = vcmask 1048480  }
 0x3bb   :  { %2709 = vst.msk [vmem:[%s5413_s7 + $0x18] sm:$0xff] %vm2708_vm7, %v2706_v54  ;;  %v2745_v58 = vpop.permute.xlu0 %2744 }
 0x3bc   :  { %2722 = vst.msk [vmem:[%s5413_s7 + $0x18] sm:$0xff] %vm2721_vm8, %v2719_v56  ;;  %v2732_v59 = vpop.permute.xlu1 %2731 }
 0x3bd   :  { %2750 = vst.msk [vmem:[%s5413_s7 + $0x20] sm:$0xff] %vm2749_vm9, %v2745_v58 }
 0x3be   :  { %2735 = vst.msk [vmem:[%s5413_s7 + $0x18] sm:$0xff] %vm2734_vm10, %v2732_v59 }
 0x3bf   :  { %2748 = vst.msk [vmem:[%s5413_s7 + $0x18] sm:$0xff] %vm2747_vm11, %v2745_v58  ;;  %v2760_v9 = vpop.permute.xlu0 %2759 }
 0x3c0   :  { %v2799_v63 = vpop.permute.xlu1 %2798  ;;  %2763 = vst.msk [vmem:[%s5413_s7 + $0x20] sm:$0xff] %vm2762_vm13, %v2760_v9 }
 0x3c1   :  { %2804 = vst.msk [vmem:[%s5413_s7 + $0x28] sm:$0xff] %vm2803_vm12, %v2799_v63 }
 0x3c3   :  { %v2773_v3 = vpop.permute.xlu0 %2772 }
 0x3c4   :  { %v2814_v8 = vpop.permute.xlu1 %2813  ;;  %2776 = vst.msk [vmem:[%s5413_s7 + $0x20] sm:$0xff] %vm2775_vm14, %v2773_v3 }
 0x3c5   :  { %2817 = vst.msk [vmem:[%s5413_s7 + $0x28] sm:$0xff] %vm2816_vm15, %v2814_v8 }
 0x3c7   :  { %v2786_v11 = vpop.permute.xlu0 %2785 }
 0x3c8   :  { %v2827_v13 = vpop.permute.xlu1 %2826  ;;  %2789 = vst.msk [vmem:[%s5413_s7 + $0x20] sm:$0xff] %vm2788_vm0, %v2786_v11 }
 0x3c9   :  { %2830 = vst.msk [vmem:[%s5413_s7 + $0x28] sm:$0xff] %vm2829_vm1, %v2827_v13 }
 0x3ca   :  { %2802 = vst.msk [vmem:[%s5413_s7 + $0x20] sm:$0xff] %vm2801_vm3, %v2799_v63 }
 0x3cb   :  { %v2866_v27 = vpop.permute.xlu0 %2865 }
 0x3cc   :  { %v2840_v12 = vpop.permute.xlu1 %2839  ;;  %2870 = vst.msk [vmem:[%s5413_s7 + $0x30] sm:$0xff] %vm151_vm2, %v2866_v27 }
 0x3cd   :  { %2843 = vst.msk [vmem:[%s5413_s7 + $0x28] sm:$0xff] %vm2842_vm4, %v2840_v12 }
 0x3d0   :  { %v2853_v28 = vpop.permute.xlu1 %2852 }
 0x3d1   :  { %2856 = vst.msk [vmem:[%s5413_s7 + $0x28] sm:$0xff] %vm2855_vm5, %v2853_v28 }
 0x3d2   :  { %2869 = vst.msk [vmem:[%s5413_s7 + $0x28] sm:$0xff] %vm2868_vm6, %v2866_v27 }

</bundles_post_ra>
